<compile_context>
chip_gen: v6e
topology: v6e:2x2x1
jax: 0.10.0
libtpu: 0.0.40
codegen_flags: <defaults>
</compile_context>

<pallas_src>
import jax
import jax.numpy as jnp
import numpy as np
from jax.experimental import pallas as pl
from jax.experimental.pallas import tpu as pltpu

EPS = 1e-5      # nn.LayerNorm default eps
KSIZE = 7       # depthwise conv kernel_size=7, padding=3
HALO = 8        # (KSIZE - 1) rounded up to the 8-sublane granule


# ---------------------------------------------------------------------------
# math helpers (used both inside the kernel and in the pure-JAX reference)
# ---------------------------------------------------------------------------
def _erf(x):
    # TODO(synk): F.gelu (default) uses exact erf; Mosaic has no guaranteed erf lowering, so
    # we use Abramowitz&Stegun 7.1.26 (|abs err| <= 1.5e-7) built from exp / mul / add.
    p = 0.3275911
    a1, a2, a3, a4, a5 = 0.254829592, -0.284496736, 1.421413741, -1.453152027, 1.061405429
    sgn = jnp.where(x >= 0.0, 1.0, -1.0)
    ax = jnp.abs(x)
    t = 1.0 / (1.0 + p * ax)
    poly = ((((a5 * t + a4) * t + a3) * t + a2) * t + a1) * t
    return sgn * (1.0 - poly * jnp.exp(-ax * ax))


def _gelu_exact(x):
    return 0.5 * x * (1.0 + _erf(x * 0.7071067811865476))


def _layernorm(x, g, b):
    mu = jnp.mean(x, axis=-1, keepdims=True)
    var = jnp.mean(jnp.square(x - mu), axis=-1, keepdims=True)
    return (x - mu) * jax.lax.rsqrt(var + EPS) * g + b


def _round_up(v, m):
    return (v + m - 1) // m * m


# ---------------------------------------------------------------------------
# fused ConvNeXt layer kernel
# ---------------------------------------------------------------------------
def _convnext_layer_kernel(x_ref, halo_ref, m_ref, dww_ref, dwb_ref, g_ref, b_ref,
                           w1_ref, b1_ref, w2_ref, b2_ref, s_ref, o_ref, xw_ref):
    # x_ref:    (1, TT, C)    rows [j*TT, (j+1)*TT) of the 3-left-padded input
    # halo_ref: (1, 8, C)     rows [(j+1)*TT, (j+1)*TT + 8)
    # m_ref:    (1, TT, 1)    mask rows of this tile
    # dww_ref:  (7, C), w1: (C, H) bf16, w2: (H, C) bf16, the rest (1, C)/(1, H) f32
    # xw_ref:   VMEM scratch (TT + 8, C) f32
    tt = x_ref.shape[1]
    n = tt + HALO

    # Assemble the padded window [tile | halo] in scratch; both stores are 8-sublane aligned.
    xw_ref[0:tt, :] = x_ref[0]
    xw_ref[tt:n, :] = halo_ref[0]
    xw = xw_ref[...]                                   # (TT + 8, C) f32

    # Depthwise Conv1d(k=7, pad=3, groups=C): out[t] = sum_k w[k] * xw[t + k].
    # Shifted taps via pltpu.roll (XLU) + aligned offset-0 slices; no concat, no realignment.
    w = dww_ref[...]                                   # (7, C)
    acc = xw[0:tt, :] * w[0]
    res = None
    for k in range(1, KSIZE):                          # static unroll
        wk = pltpu.roll(xw, shift=n - k, axis=0)[0:tt, :]
        if k == KSIZE // 2:
            res = wk                                   # tap k=3 == original x rows (residual)
        acc = acc + wk * w[k]
    y = acc + dwb_ref[...]                             # (TT, C) f32

    # LayerNorm over channels (f32).
    y = _layernorm(y, g_ref[...], b_ref[...])

    # pointwise conv1 -> GELU -> pointwise conv2 : bf16 operands, f32 MXU accumulation.
    h = jnp.dot(y.astype(jnp.bfloat16), w1_ref[...],
                preferred_element_type=jnp.float32) + b1_ref[...]
    h = _gelu_exact(h)                                 # f32 elementwise
    z = jnp.dot(h.astype(jnp.bfloat16), w2_ref[...],
                preferred_element_type=jnp.float32) + b2_ref[...]

    # layer scale, residual, mask (all f32).
    o_ref[0] = (res + z * s_ref[...]) * m_ref[0]


# ---------------------------------------------------------------------------
# wrapper (PyTorch NCW in / out)
# ---------------------------------------------------------------------------
def convnext_layer_forward(x_bct, mask_b1t, params, *, t_tile=256):
    """ConvNeXtLayer.forward. x: (B, C, T) f32, mask: (B, 1, T) f32 -> (B, C, T) f32."""
    B, C, T = x_bct.shape
    H = params["w1"].shape[1]

    x = jnp.swapaxes(x_bct, 1, 2)                      # (B, T, C)
    m = jnp.swapaxes(mask_b1t, 1, 2)                   # (B, T, 1)

    tt = min(t_tile, _round_up(T, 8))                  # tile rows (multiple of 8)
    assert tt % 8 == 0
    n_t = pl.cdiv(T, tt)
    t_out = n_t * tt
    pad = KSIZE // 2                                   # 3

    # Row r of xp is x row r-3 (zeros outside [0, T)); total length t_out + 8 so every tile
    # can fetch its full (tt + 8)-row window with plain blocked DMA.
    xp = jnp.pad(x, ((0, 0), (pad, t_out + HALO - T - pad), (0, 0)))
    mp = jnp.pad(m, ((0, 0), (0, t_out - T), (0, 0)))

    out = pl.pallas_call(
        _convnext_layer_kernel,
        out_shape=jax.ShapeDtypeStruct((B, t_out, C), x.dtype),
        grid=(B, n_t),
        in_specs=[
            pl.BlockSpec((1, tt, C), lambda b, j: (b, j, 0)),                          # x tile
            pl.BlockSpec((1, HALO, C), lambda b, j: (b, (j + 1) * (tt // HALO), 0)),   # halo
            pl.BlockSpec((1, tt, 1), lambda b, j: (b, j, 0)),                          # mask
            pl.BlockSpec((KSIZE, C), lambda b, j: (0, 0)),                             # dw weight
            pl.BlockSpec((1, C), lambda b, j: (0, 0)),                                 # dw bias
            pl.BlockSpec((1, C), lambda b, j: (0, 0)),                                 # ln gamma
            pl.BlockSpec((1, C), lambda b, j: (0, 0)),                                 # ln beta
            pl.BlockSpec((C, H), lambda b, j: (0, 0)),                                 # w1 (bf16)
            pl.BlockSpec((1, H), lambda b, j: (0, 0)),                                 # b1
            pl.BlockSpec((H, C), lambda b, j: (0, 0)),                                 # w2 (bf16)
            pl.BlockSpec((1, C), lambda b, j: (0, 0)),                                 # b2
            pl.BlockSpec((1, C), lambda b, j: (0, 0)),                                 # layer scale
        ],
        out_specs=pl.BlockSpec((1, tt, C), lambda b, j: (b, j, 0)),
        scratch_shapes=[pltpu.VMEM((tt + HALO, C), jnp.float32)],
        compiler_params=pltpu.CompilerParams(
            dimension_semantics=("parallel", "parallel")),
    )(xp, xp, mp,
      params["dw_w"], params["dw_b"], params["ln_g"], params["ln_b"],
      params["w1"], params["b1"], params["w2"], params["b2"], params["scale"])

    return jnp.swapaxes(out[:, :T, :], 1, 2)           # back to (B, C, T)


# ---------------------------------------------------------------------------
# deterministic parameter init (shapes from ConvNeXtLayer.__init__)
# ---------------------------------------------------------------------------
def init_params(key, channels, h_channels, scale_value):
    C, H = channels, h_channels
    ks = jax.random.split(key, 8)
    return {
        # torch dw_conv.weight is (C, 1, 7); stored transposed as (7, C)
        "dw_w": (0.2 * jax.random.normal(ks[0], (KSIZE, C))).astype(jnp.float32),
        "dw_b": (0.1 * jax.random.normal(ks[1], (1, C))).astype(jnp.float32),
        "ln_g": (1.0 + 0.1 * jax.random.normal(ks[2], (1, C))).astype(jnp.float32),
        "ln_b": (0.1 * jax.random.normal(ks[3], (1, C))).astype(jnp.float32),
        # torch Linear weights are (out, in); stored transposed (in, out), bf16 for the MXU
        "w1": (0.2 * jax.random.normal(ks[4], (C, H))).astype(jnp.bfloat16),
        "b1": (0.1 * jax.random.normal(ks[5], (1, H))).astype(jnp.float32),
        "w2": (0.2 * jax.random.normal(ks[6], (H, C))).astype(jnp.bfloat16),
        "b2": (0.1 * jax.random.normal(ks[7], (1, C))).astype(jnp.float32),
        "scale": jnp.full((1, C), scale_value, jnp.float32),
    }


# ---------------------------------------------------------------------------
# pure-JAX reference (module semantics) for the sanity check
# ---------------------------------------------------------------------------
def convnext_layer_ref(x_bct, mask_b1t, params, *, bf16_matmul):
    x = jnp.swapaxes(x_bct, 1, 2)                      # (B, T, C)
    m = jnp.swapaxes(mask_b1t, 1, 2)
    T = x.shape[1]
    res = x
    pad = KSIZE // 2
    xp = jnp.pad(x, ((0, 0), (pad, pad), (0, 0)))
    w = params["dw_w"]
    y = xp[:, 0:T, :] * w[0]
    for k in range(1, KSIZE):
        y = y + xp[:, k:k + T, :] * w[k]
    y = y + params["dw_b"]
    y = _layernorm(y, params["ln_g"], params["ln_b"])
    if bf16_matmul:   # mirror the kernel's bf16-operand / f32-accumulate matmuls
        h = jnp.matmul(y.astype(jnp.bfloat16), params["w1"],
                       preferred_element_type=jnp.float32)
    else:             # pure-f32 module math
        h = jnp.matmul(y, params["w1"].astype(jnp.float32))
    h = _gelu_exact(h + params["b1"])
    if bf16_matmul:
        z = jnp.matmul(h.astype(jnp.bfloat16), params["w2"],
                       preferred_element_type=jnp.float32)
    else:
        z = jnp.matmul(h, params["w2"].astype(jnp.float32))
    z = (z + params["b2"]) * params["scale"]
    return jnp.swapaxes((res + z) * m, 1, 2)


if __name__ == "__main__":
    B, C, H, T = 2, 128, 256, 200                      # lane-dense C/H; T not a tile multiple
    key = jax.random.PRNGKey(0)
    kx, kp = jax.random.split(key)

    x = jax.random.normal(kx, (B, C, T), jnp.float32)
    lengths = jnp.array([T, T - 48])
    mask = (jnp.arange(T)[None, None, :] < lengths[:, None, None]).astype(jnp.float32)

    params = init_params(kp, C, H, scale_value=0.25)

    out = convnext_layer_forward(x, mask, params, t_tile=128)
    out = jax.block_until_ready(out)

    # Tight check against the same math / same bf16 matmul operands (verifies the kernel).
    ref_bf16 = convnext_layer_ref(x, mask, params, bf16_matmul=True)
    np.testing.assert_allclose(np.asarray(out), np.asarray(ref_bf16), atol=2e-3, rtol=2e-3)

    # Loose check against pure-f32 module math: deviation is only the bf16 operand rounding
    # of the two pointwise matmuls (reviewer-approved fast path).
    ref_f32 = convnext_layer_ref(x, mask, params, bf16_matmul=False)
    np.testing.assert_allclose(np.asarray(out), np.asarray(ref_f32), atol=6e-2, rtol=6e-2)

    print("KERNEL_OK")
</pallas_src>

<mosaic_0001>
module attributes {stable_mosaic.version = 11 : i64} {
  func.func @_convnext_layer_kernel(%arg0: i32, %arg1: i32, %arg2: memref<1x128x128xf32, #tpu.memory_space<vmem>>, %arg3: memref<1x8x128xf32, #tpu.memory_space<vmem>>, %arg4: memref<1x128x1xf32, #tpu.memory_space<vmem>>, %arg5: memref<7x128xf32, #tpu.memory_space<vmem>>, %arg6: memref<1x128xf32, #tpu.memory_space<vmem>>, %arg7: memref<1x128xf32, #tpu.memory_space<vmem>>, %arg8: memref<1x128xf32, #tpu.memory_space<vmem>>, %arg9: memref<128x256xbf16, #tpu.memory_space<vmem>>, %arg10: memref<1x256xf32, #tpu.memory_space<vmem>>, %arg11: memref<256x128xbf16, #tpu.memory_space<vmem>>, %arg12: memref<1x128xf32, #tpu.memory_space<vmem>>, %arg13: memref<1x128xf32, #tpu.memory_space<vmem>>, %arg14: memref<1x128x128xf32, #tpu.memory_space<vmem>>, %arg15: memref<136x128xf32, #tpu.memory_space<vmem>>) attributes {dimension_semantics = [#tpu.dimension_semantics<parallel>, #tpu.dimension_semantics<parallel>], iteration_bounds = array<i64: 2, 2>, scalar_prefetch = 0 : i64, scratch_operands = 1 : i64, tpu.core_type = #tpu.core_type<tc>, window_params = [{transform_indices = @transform_0, window_bounds = array<i64: 1, 128, 128>}, {transform_indices = @transform_1, window_bounds = array<i64: 1, 8, 128>}, {transform_indices = @transform_2, window_bounds = array<i64: 1, 128, 1>}, {pipeline_mode = #tpu.pipeline_mode<synchronous>, transform_indices = @transform_3, window_bounds = array<i64: 7, 128>}, {pipeline_mode = #tpu.pipeline_mode<synchronous>, transform_indices = @transform_4, window_bounds = array<i64: 1, 128>}, {pipeline_mode = #tpu.pipeline_mode<synchronous>, transform_indices = @transform_5, window_bounds = array<i64: 1, 128>}, {pipeline_mode = #tpu.pipeline_mode<synchronous>, transform_indices = @transform_6, window_bounds = array<i64: 1, 128>}, {pipeline_mode = #tpu.pipeline_mode<synchronous>, transform_indices = @transform_7, window_bounds = array<i64: 128, 256>}, {pipeline_mode = #tpu.pipeline_mode<synchronous>, transform_indices = @transform_8, window_bounds = array<i64: 1, 256>}, {pipeline_mode = #tpu.pipeline_mode<synchronous>, transform_indices = @transform_9, window_bounds = array<i64: 256, 128>}, {pipeline_mode = #tpu.pipeline_mode<synchronous>, transform_indices = @transform_10, window_bounds = array<i64: 1, 128>}, {pipeline_mode = #tpu.pipeline_mode<synchronous>, transform_indices = @transform_11, window_bounds = array<i64: 1, 128>}, {transform_indices = @transform_12, window_bounds = array<i64: 1, 128, 128>}]} {
    %c0 = arith.constant 0 : index
    %c0_0 = arith.constant 0 : index
    %c0_1 = arith.constant 0 : index
    %0 = vector.load %arg2[%c0, %c0_0, %c0_1] : memref<1x128x128xf32, #tpu.memory_space<vmem>>, vector<1x128x128xf32>
    %1 = vector.shape_cast %0 : vector<1x128x128xf32> to vector<128x128xf32>
    %c0_2 = arith.constant 0 : index
    %c0_3 = arith.constant 0 : index
    %2 = vector.load %arg15[%c0_2, %c0_3] : memref<136x128xf32, #tpu.memory_space<vmem>>, vector<128x128xf32>
    tpu.vector_store %arg15[%c0_2, %c0_3], %1 {strides = array<i32>} : memref<136x128xf32, #tpu.memory_space<vmem>>, vector<128x128xf32>,
    %c0_4 = arith.constant 0 : index
    %c0_5 = arith.constant 0 : index
    %c0_6 = arith.constant 0 : index
    %3 = vector.load %arg3[%c0_4, %c0_5, %c0_6] : memref<1x8x128xf32, #tpu.memory_space<vmem>>, vector<1x8x128xf32>
    %4 = vector.shape_cast %3 : vector<1x8x128xf32> to vector<8x128xf32>
    %c128 = arith.constant 128 : index
    %c0_7 = arith.constant 0 : index
    %5 = vector.load %arg15[%c128, %c0_7] : memref<136x128xf32, #tpu.memory_space<vmem>>, vector<8x128xf32>
    tpu.vector_store %arg15[%c128, %c0_7], %4 {strides = array<i32>} : memref<136x128xf32, #tpu.memory_space<vmem>>, vector<8x128xf32>,
    %c0_8 = arith.constant 0 : index
    %c0_9 = arith.constant 0 : index
    %6 = vector.load %arg15[%c0_8, %c0_9] : memref<136x128xf32, #tpu.memory_space<vmem>>, vector<136x128xf32>
    %c0_10 = arith.constant 0 : index
    %c0_11 = arith.constant 0 : index
    %7 = vector.load %arg5[%c0_10, %c0_11] : memref<7x128xf32, #tpu.memory_space<vmem>>, vector<7x128xf32>
    %8 = vector.extract_strided_slice %6 {offsets = [0, 0], sizes = [128, 128], strides = [1, 1]} : vector<136x128xf32> to vector<128x128xf32>
    %9 = vector.extract_strided_slice %7 {offsets = [0, 0], sizes = [1, 128], strides = [1, 1]} : vector<7x128xf32> to vector<1x128xf32>
    %10 = vector.shape_cast %9 : vector<1x128xf32> to vector<128xf32>
    %11 = vector.shape_cast %10 : vector<128xf32> to vector<1x128xf32>
    %12 = vector.broadcast %11 : vector<1x128xf32> to vector<128x128xf32>
    %13 = arith.mulf %8, %12 : vector<128x128xf32>
    %c135_i32 = arith.constant 135 : i32
    %14 = tpu.dynamic_rotate %6 by %c135_i32 dim 0 : vector<136x128xf32>, i32 -> vector<136x128xf32>
    %15 = vector.extract_strided_slice %14 {offsets = [0, 0], sizes = [128, 128], strides = [1, 1]} : vector<136x128xf32> to vector<128x128xf32>
    %16 = vector.extract_strided_slice %7 {offsets = [1, 0], sizes = [1, 128], strides = [1, 1]} : vector<7x128xf32> to vector<1x128xf32>
    %17 = vector.shape_cast %16 : vector<1x128xf32> to vector<128xf32>
    %18 = vector.shape_cast %17 : vector<128xf32> to vector<1x128xf32>
    %19 = vector.broadcast %18 : vector<1x128xf32> to vector<128x128xf32>
    %20 = arith.mulf %15, %19 : vector<128x128xf32>
    %21 = arith.addf %13, %20 : vector<128x128xf32>
    %c134_i32 = arith.constant 134 : i32
    %22 = tpu.dynamic_rotate %6 by %c134_i32 dim 0 : vector<136x128xf32>, i32 -> vector<136x128xf32>
    %23 = vector.extract_strided_slice %22 {offsets = [0, 0], sizes = [128, 128], strides = [1, 1]} : vector<136x128xf32> to vector<128x128xf32>
    %24 = vector.extract_strided_slice %7 {offsets = [2, 0], sizes = [1, 128], strides = [1, 1]} : vector<7x128xf32> to vector<1x128xf32>
    %25 = vector.shape_cast %24 : vector<1x128xf32> to vector<128xf32>
    %26 = vector.shape_cast %25 : vector<128xf32> to vector<1x128xf32>
    %27 = vector.broadcast %26 : vector<1x128xf32> to vector<128x128xf32>
    %28 = arith.mulf %23, %27 : vector<128x128xf32>
    %29 = arith.addf %21, %28 : vector<128x128xf32>
    %c133_i32 = arith.constant 133 : i32
    %30 = tpu.dynamic_rotate %6 by %c133_i32 dim 0 : vector<136x128xf32>, i32 -> vector<136x128xf32>
    %31 = vector.extract_strided_slice %30 {offsets = [0, 0], sizes = [128, 128], strides = [1, 1]} : vector<136x128xf32> to vector<128x128xf32>
    %32 = vector.extract_strided_slice %7 {offsets = [3, 0], sizes = [1, 128], strides = [1, 1]} : vector<7x128xf32> to vector<1x128xf32>
    %33 = vector.shape_cast %32 : vector<1x128xf32> to vector<128xf32>
    %34 = vector.shape_cast %33 : vector<128xf32> to vector<1x128xf32>
    %35 = vector.broadcast %34 : vector<1x128xf32> to vector<128x128xf32>
    %36 = arith.mulf %31, %35 : vector<128x128xf32>
    %37 = arith.addf %29, %36 : vector<128x128xf32>
    %c132_i32 = arith.constant 132 : i32
    %38 = tpu.dynamic_rotate %6 by %c132_i32 dim 0 : vector<136x128xf32>, i32 -> vector<136x128xf32>
    %39 = vector.extract_strided_slice %38 {offsets = [0, 0], sizes = [128, 128], strides = [1, 1]} : vector<136x128xf32> to vector<128x128xf32>
    %40 = vector.extract_strided_slice %7 {offsets = [4, 0], sizes = [1, 128], strides = [1, 1]} : vector<7x128xf32> to vector<1x128xf32>
    %41 = vector.shape_cast %40 : vector<1x128xf32> to vector<128xf32>
    %42 = vector.shape_cast %41 : vector<128xf32> to vector<1x128xf32>
    %43 = vector.broadcast %42 : vector<1x128xf32> to vector<128x128xf32>
    %44 = arith.mulf %39, %43 : vector<128x128xf32>
    %45 = arith.addf %37, %44 : vector<128x128xf32>
    %c131_i32 = arith.constant 131 : i32
    %46 = tpu.dynamic_rotate %6 by %c131_i32 dim 0 : vector<136x128xf32>, i32 -> vector<136x128xf32>
    %47 = vector.extract_strided_slice %46 {offsets = [0, 0], sizes = [128, 128], strides = [1, 1]} : vector<136x128xf32> to vector<128x128xf32>
    %48 = vector.extract_strided_slice %7 {offsets = [5, 0], sizes = [1, 128], strides = [1, 1]} : vector<7x128xf32> to vector<1x128xf32>
    %49 = vector.shape_cast %48 : vector<1x128xf32> to vector<128xf32>
    %50 = vector.shape_cast %49 : vector<128xf32> to vector<1x128xf32>
    %51 = vector.broadcast %50 : vector<1x128xf32> to vector<128x128xf32>
    %52 = arith.mulf %47, %51 : vector<128x128xf32>
    %53 = arith.addf %45, %52 : vector<128x128xf32>
    %c130_i32 = arith.constant 130 : i32
    %54 = tpu.dynamic_rotate %6 by %c130_i32 dim 0 : vector<136x128xf32>, i32 -> vector<136x128xf32>
    %55 = vector.extract_strided_slice %54 {offsets = [0, 0], sizes = [128, 128], strides = [1, 1]} : vector<136x128xf32> to vector<128x128xf32>
    %56 = vector.extract_strided_slice %7 {offsets = [6, 0], sizes = [1, 128], strides = [1, 1]} : vector<7x128xf32> to vector<1x128xf32>
    %57 = vector.shape_cast %56 : vector<1x128xf32> to vector<128xf32>
    %58 = vector.shape_cast %57 : vector<128xf32> to vector<1x128xf32>
    %59 = vector.broadcast %58 : vector<1x128xf32> to vector<128x128xf32>
    %60 = arith.mulf %55, %59 : vector<128x128xf32>
    %61 = arith.addf %53, %60 : vector<128x128xf32>
    %c0_12 = arith.constant 0 : index
    %c0_13 = arith.constant 0 : index
    %62 = vector.load %arg6[%c0_12, %c0_13] : memref<1x128xf32, #tpu.memory_space<vmem>>, vector<1x128xf32>
    %63 = vector.broadcast %62 : vector<1x128xf32> to vector<128x128xf32>
    %64 = arith.addf %61, %63 : vector<128x128xf32>
    %c0_14 = arith.constant 0 : index
    %c0_15 = arith.constant 0 : index
    %65 = vector.load %arg7[%c0_14, %c0_15] : memref<1x128xf32, #tpu.memory_space<vmem>>, vector<1x128xf32>
    %c0_16 = arith.constant 0 : index
    %c0_17 = arith.constant 0 : index
    %66 = vector.load %arg8[%c0_16, %c0_17] : memref<1x128xf32, #tpu.memory_space<vmem>>, vector<1x128xf32>
    %cst = arith.constant dense<0.000000e+00> : vector<128xf32>
    %67 = vector.multi_reduction <add>, %64, %cst [1] : vector<128x128xf32> to vector<128xf32>
    %68 = vector.shape_cast %67 : vector<128xf32> to vector<128x1xf32>
    %cst_18 = arith.constant 1.280000e+02 : f32
    %69 = vector.broadcast %cst_18 : f32 to vector<128x1xf32>
    %70 = arith.divf %68, %69 : vector<128x1xf32>
    %71 = vector.broadcast %70 : vector<128x1xf32> to vector<128x128xf32>
    %72 = arith.subf %64, %71 : vector<128x128xf32>
    %73 = arith.mulf %72, %72 : vector<128x128xf32>
    %cst_19 = arith.constant dense<0.000000e+00> : vector<128xf32>
    %74 = vector.multi_reduction <add>, %73, %cst_19 [1] : vector<128x128xf32> to vector<128xf32>
    %75 = vector.shape_cast %74 : vector<128xf32> to vector<128x1xf32>
    %cst_20 = arith.constant 1.280000e+02 : f32
    %76 = vector.broadcast %cst_20 : f32 to vector<128x1xf32>
    %77 = arith.divf %75, %76 : vector<128x1xf32>
    %78 = vector.broadcast %70 : vector<128x1xf32> to vector<128x128xf32>
    %79 = arith.subf %64, %78 : vector<128x128xf32>
    %cst_21 = arith.constant 9.99999974E-6 : f32
    %80 = vector.broadcast %cst_21 : f32 to vector<128x1xf32>
    %81 = arith.addf %77, %80 : vector<128x1xf32>
    %82 = math.rsqrt %81 : vector<128x1xf32>
    %83 = vector.broadcast %82 : vector<128x1xf32> to vector<128x128xf32>
    %84 = arith.mulf %79, %83 : vector<128x128xf32>
    %85 = vector.broadcast %65 : vector<1x128xf32> to vector<128x128xf32>
    %86 = arith.mulf %84, %85 : vector<128x128xf32>
    %87 = vector.broadcast %66 : vector<1x128xf32> to vector<128x128xf32>
    %88 = arith.addf %86, %87 : vector<128x128xf32>
    %89 = arith.truncf %88 : vector<128x128xf32> to vector<128x128xbf16>
    %c0_22 = arith.constant 0 : index
    %c0_23 = arith.constant 0 : index
    %90 = vector.load %arg9[%c0_22, %c0_23] : memref<128x256xbf16, #tpu.memory_space<vmem>>, vector<128x256xbf16>
    %cst_24 = arith.constant dense<0.000000e+00> : vector<128x256xf32>
    %91 = tpu.matmul %89, %90, %cst_24 {dimension_numbers = #tpu.dot_dimension_numbers<[1], [0], [0], [1], [0, 0, 1, 1], [], []>} : vector<128x128xbf16>, vector<128x256xbf16>, vector<128x256xf32> -> vector<128x256xf32>
    %c0_25 = arith.constant 0 : index
    %c0_26 = arith.constant 0 : index
    %92 = vector.load %arg10[%c0_25, %c0_26] : memref<1x256xf32, #tpu.memory_space<vmem>>, vector<1x256xf32>
    %93 = vector.broadcast %92 : vector<1x256xf32> to vector<128x256xf32>
    %94 = arith.addf %91, %93 : vector<128x256xf32>
    %cst_27 = arith.constant 5.000000e-01 : f32
    %95 = vector.broadcast %cst_27 : f32 to vector<128x256xf32>
    %96 = arith.mulf %95, %94 : vector<128x256xf32>
    %cst_28 = arith.constant 0.707106769 : f32
    %97 = vector.broadcast %cst_28 : f32 to vector<128x256xf32>
    %98 = arith.mulf %94, %97 : vector<128x256xf32>
    %cst_29 = arith.constant 0.000000e+00 : f32
    %99 = vector.broadcast %cst_29 : f32 to vector<128x256xf32>
    %100 = arith.cmpf oge, %98, %99 : vector<128x256xf32>
    %cst_30 = arith.constant 1.000000e+00 : f32
    %cst_31 = arith.constant -1.000000e+00 : f32
    %101 = vector.broadcast %cst_30 : f32 to vector<128x256xf32>
    %102 = vector.broadcast %cst_31 : f32 to vector<128x256xf32>
    %103 = arith.select %100, %101, %102 : vector<128x256xi1>, vector<128x256xf32>
    %104 = math.absf %98 : vector<128x256xf32>
    %cst_32 = arith.constant 0.327591091 : f32
    %105 = vector.broadcast %cst_32 : f32 to vector<128x256xf32>
    %106 = arith.mulf %105, %104 : vector<128x256xf32>
    %cst_33 = arith.constant 1.000000e+00 : f32
    %107 = vector.broadcast %cst_33 : f32 to vector<128x256xf32>
    %108 = arith.addf %107, %106 : vector<128x256xf32>
    %cst_34 = arith.constant 1.000000e+00 : f32
    %109 = vector.broadcast %cst_34 : f32 to vector<128x256xf32>
    %110 = arith.divf %109, %108 : vector<128x256xf32>
    %cst_35 = arith.constant 1.06140542 : f32
    %111 = vector.broadcast %cst_35 : f32 to vector<128x256xf32>
    %112 = arith.mulf %111, %110 : vector<128x256xf32>
    %cst_36 = arith.constant -1.45315206 : f32
    %113 = vector.broadcast %cst_36 : f32 to vector<128x256xf32>
    %114 = arith.addf %112, %113 : vector<128x256xf32>
    %115 = arith.mulf %114, %110 : vector<128x256xf32>
    %cst_37 = arith.constant 1.42141378 : f32
    %116 = vector.broadcast %cst_37 : f32 to vector<128x256xf32>
    %117 = arith.addf %115, %116 : vector<128x256xf32>
    %118 = arith.mulf %117, %110 : vector<128x256xf32>
    %cst_38 = arith.constant -0.284496725 : f32
    %119 = vector.broadcast %cst_38 : f32 to vector<128x256xf32>
    %120 = arith.addf %118, %119 : vector<128x256xf32>
    %121 = arith.mulf %120, %110 : vector<128x256xf32>
    %cst_39 = arith.constant 0.254829586 : f32
    %122 = vector.broadcast %cst_39 : f32 to vector<128x256xf32>
    %123 = arith.addf %121, %122 : vector<128x256xf32>
    %124 = arith.mulf %123, %110 : vector<128x256xf32>
    %cst_40 = arith.constant 0.000000e+00 : f32
    %125 = vector.broadcast %cst_40 : f32 to vector<128x256xf32>
    %126 = arith.subf %125, %104 : vector<128x256xf32>
    %127 = arith.mulf %126, %104 : vector<128x256xf32>
    %128 = math.exp %127 : vector<128x256xf32>
    %129 = arith.mulf %124, %128 : vector<128x256xf32>
    %cst_41 = arith.constant 1.000000e+00 : f32
    %130 = vector.broadcast %cst_41 : f32 to vector<128x256xf32>
    %131 = arith.subf %130, %129 : vector<128x256xf32>
    %132 = arith.mulf %103, %131 : vector<128x256xf32>
    %cst_42 = arith.constant 1.000000e+00 : f32
    %133 = vector.broadcast %cst_42 : f32 to vector<128x256xf32>
    %134 = arith.addf %133, %132 : vector<128x256xf32>
    %135 = arith.mulf %96, %134 : vector<128x256xf32>
    %136 = arith.truncf %135 : vector<128x256xf32> to vector<128x256xbf16>
    %c0_43 = arith.constant 0 : index
    %c0_44 = arith.constant 0 : index
    %137 = vector.load %arg11[%c0_43, %c0_44] : memref<256x128xbf16, #tpu.memory_space<vmem>>, vector<256x128xbf16>
    %cst_45 = arith.constant dense<0.000000e+00> : vector<128x128xf32>
    %138 = tpu.matmul %136, %137, %cst_45 {dimension_numbers = #tpu.dot_dimension_numbers<[1], [0], [0], [1], [0, 0, 1, 1], [], []>} : vector<128x256xbf16>, vector<256x128xbf16>, vector<128x128xf32> -> vector<128x128xf32>
    %c0_46 = arith.constant 0 : index
    %c0_47 = arith.constant 0 : index
    %139 = vector.load %arg12[%c0_46, %c0_47] : memref<1x128xf32, #tpu.memory_space<vmem>>, vector<1x128xf32>
    %140 = vector.broadcast %139 : vector<1x128xf32> to vector<128x128xf32>
    %141 = arith.addf %138, %140 : vector<128x128xf32>
    %c0_48 = arith.constant 0 : index
    %c0_49 = arith.constant 0 : index
    %142 = vector.load %arg13[%c0_48, %c0_49] : memref<1x128xf32, #tpu.memory_space<vmem>>, vector<1x128xf32>
    %143 = vector.broadcast %142 : vector<1x128xf32> to vector<128x128xf32>
    %144 = arith.mulf %141, %143 : vector<128x128xf32>
    %145 = arith.addf %31, %144 : vector<128x128xf32>
    %c0_50 = arith.constant 0 : index
    %c0_51 = arith.constant 0 : index
    %c0_52 = arith.constant 0 : index
    %146 = vector.load %arg4[%c0_50, %c0_51, %c0_52] : memref<1x128x1xf32, #tpu.memory_space<vmem>>, vector<1x128x1xf32>
    %147 = vector.shape_cast %146 : vector<1x128x1xf32> to vector<128x1xf32>
    %148 = vector.broadcast %147 : vector<128x1xf32> to vector<128x128xf32>
    %149 = arith.mulf %145, %148 : vector<128x128xf32>
    %c0_53 = arith.constant 0 : index
    %c0_54 = arith.constant 0 : index
    %c0_55 = arith.constant 0 : index
    %150 = vector.load %arg14[%c0_53, %c0_54, %c0_55] : memref<1x128x128xf32, #tpu.memory_space<vmem>>, vector<1x128x128xf32>
    %151 = vector.shape_cast %150 : vector<1x128x128xf32> to vector<128x128xf32>
    %152 = vector.shape_cast %149 : vector<128x128xf32> to vector<1x128x128xf32>
    tpu.vector_store %arg14[%c0_53, %c0_54, %c0_55], %152 {strides = array<i32>} : memref<1x128x128xf32, #tpu.memory_space<vmem>>, vector<1x128x128xf32>,
    return
  }
  func.func @transform_0(%arg0: i32, %arg1: i32) -> (i32, i32, i32) {
    %c0_i32 = arith.constant 0 : i32
    %c0_i32_0 = arith.constant 0 : i32
    return %arg0, %arg1, %c0_i32 : i32, i32, i32
  }
  func.func @transform_1(%arg0: i32, %arg1: i32) -> (i32, i32, i32) {
    %c1_i32 = arith.constant 1 : i32
    %0 = arith.addi %arg1, %c1_i32 : i32
    %c16_i32 = arith.constant 16 : i32
    %1 = arith.muli %0, %c16_i32 : i32
    %c0_i32 = arith.constant 0 : i32
    %c0_i32_0 = arith.constant 0 : i32
    return %arg0, %1, %c0_i32 : i32, i32, i32
  }
  func.func @transform_2(%arg0: i32, %arg1: i32) -> (i32, i32, i32) {
    %c0_i32 = arith.constant 0 : i32
    %c0_i32_0 = arith.constant 0 : i32
    return %arg0, %arg1, %c0_i32 : i32, i32, i32
  }
  func.func @transform_3(%arg0: i32, %arg1: i32) -> (i32, i32) {
    %c0_i32 = arith.constant 0 : i32
    %c0_i32_0 = arith.constant 0 : i32
    %c0_i32_1 = arith.constant 0 : i32
    return %c0_i32, %c0_i32_0 : i32, i32
  }
  func.func @transform_4(%arg0: i32, %arg1: i32) -> (i32, i32) {
    %c0_i32 = arith.constant 0 : i32
    %c0_i32_0 = arith.constant 0 : i32
    %c0_i32_1 = arith.constant 0 : i32
    return %c0_i32, %c0_i32_0 : i32, i32
  }
  func.func @transform_5(%arg0: i32, %arg1: i32) -> (i32, i32) {
    %c0_i32 = arith.constant 0 : i32
    %c0_i32_0 = arith.constant 0 : i32
    %c0_i32_1 = arith.constant 0 : i32
    return %c0_i32, %c0_i32_0 : i32, i32
  }
  func.func @transform_6(%arg0: i32, %arg1: i32) -> (i32, i32) {
    %c0_i32 = arith.constant 0 : i32
    %c0_i32_0 = arith.constant 0 : i32
    %c0_i32_1 = arith.constant 0 : i32
    return %c0_i32, %c0_i32_0 : i32, i32
  }
  func.func @transform_7(%arg0: i32, %arg1: i32) -> (i32, i32) {
    %c0_i32 = arith.constant 0 : i32
    %c0_i32_0 = arith.constant 0 : i32
    %c0_i32_1 = arith.constant 0 : i32
    return %c0_i32, %c0_i32_0 : i32, i32
  }
  func.func @transform_8(%arg0: i32, %arg1: i32) -> (i32, i32) {
    %c0_i32 = arith.constant 0 : i32
    %c0_i32_0 = arith.constant 0 : i32
    %c0_i32_1 = arith.constant 0 : i32
    return %c0_i32, %c0_i32_0 : i32, i32
  }
  func.func @transform_9(%arg0: i32, %arg1: i32) -> (i32, i32) {
    %c0_i32 = arith.constant 0 : i32
    %c0_i32_0 = arith.constant 0 : i32
    %c0_i32_1 = arith.constant 0 : i32
    return %c0_i32, %c0_i32_0 : i32, i32
  }
  func.func @transform_10(%arg0: i32, %arg1: i32) -> (i32, i32) {
    %c0_i32 = arith.constant 0 : i32
    %c0_i32_0 = arith.constant 0 : i32
    %c0_i32_1 = arith.constant 0 : i32
    return %c0_i32, %c0_i32_0 : i32, i32
  }
  func.func @transform_11(%arg0: i32, %arg1: i32) -> (i32, i32) {
    %c0_i32 = arith.constant 0 : i32
    %c0_i32_0 = arith.constant 0 : i32
    %c0_i32_1 = arith.constant 0 : i32
    return %c0_i32, %c0_i32_0 : i32, i32
  }
  func.func @transform_12(%arg0: i32, %arg1: i32) -> (i32, i32, i32) {
    %c0_i32 = arith.constant 0 : i32
    %c0_i32_0 = arith.constant 0 : i32
    return %arg0, %arg1, %c0_i32 : i32, i32, i32
  }
}

</mosaic_0001>

<bundles_post_ra>
// kernel: tpu_custom_call.1
= control target key start
LH: loop header
LB: loop body
LE: loop exit
PB: predicated region body
PF: predicated region fallthrough
CT: control target
= control target key end

     0   :  { %s5841_s0 = inlined_call_operand.hbm [shape: f32[2,264,128], index: 0, kind: input, shape index: {}]   ;;  %s5842_s1 = inlined_call_operand.hbm [shape: f32[2,264,128], index: 1, kind: input, shape index: {}]   ;;  %s5843_s2 = inlined_call_operand.vmem [shape: f32[2,256,1], index: 2, kind: input, shape index: {}]   ;;  %s5844_s3 = inlined_call_operand.vmem [shape: f32[7,128], index: 3, kind: input, shape index: {}]   ;;  %s5845_s4 = inlined_call_operand.vmem [shape: f32[1,128], index: 4, kind: input, shape index: {}]   ;;  %s5846_s5 = inlined_call_operand.vmem [shape: f32[1,128], index: 5, kind: input, shape index: {}]   ;;  %s5847_s6 = inlined_call_operand.vmem [shape: f32[1,128], index: 6, kind: input, shape index: {}]   ;;  %s5848_s7 = inlined_call_operand.vmem [shape: bf16[128,256], index: 7, kind: input, shape index: {}]   ;;  %s5849_s8 = inlined_call_operand.vmem [shape: f32[1,256], index: 8, kind: input, shape index: {}]   ;;  %s5850_s9 = inlined_call_operand.vmem [shape: bf16[256,128], index: 9, kind: input, shape index: {}]   ;;  %s5851_s10 = inlined_call_operand.vmem [shape: f32[1,128], index: 10, kind: input, shape index: {}]   ;;  %s5852_s11 = inlined_call_operand.vmem [shape: f32[1,128], index: 11, kind: input, shape index: {}]   ;;  %s5853_s12 = inlined_call_operand.hbm [shape: f32[2,256,128], index: 12, kind: output, shape index: {}]  }
   0x1   :  { %5909 = sst [smem:[#allocation73_spill]] %s5841_s0 }
   0x2   :  { %5910 = sst [smem:[#allocation74_spill]] %s5843_s2 }
   0x3   :  { %5911 = sst [smem:[#allocation75_spill]] %s5846_s5 }
   0x4   :  { %5912 = sst [smem:[#allocation76_spill]] %s5847_s6 }
   0x5   :  { %5913 = sst [smem:[#allocation77_spill]] %s5849_s8 }
   0x6   :  { %5914 = sst [smem:[#allocation78_spill]] %s5850_s9 }
   0x7   :  { %5915 = sst [smem:[#allocation79_spill]] %s5851_s10 }
   0x8   :  { %5916 = sst [smem:[#allocation80_spill]] %s5852_s11 }
   0x9   :  { %5917 = sst [smem:[#allocation81_spill]] %s5853_s12 }
   0xa   :  { %17 = vsyncpa [#allocation4], 0 }
   0xb   :  { %19 = vsyncpa [#allocation4 + $0x1], 0 }
   0xc   :  { %20 = vsyncpa [#allocation7], 0 }
   0xd   :  { %22 = vsyncpa [#allocation7 + $0x1], 0 }
   0xe   :  { %23 = vsyncpa [#allocation5], 0 }
   0xf   :  { %25 = vsyncpa [#allocation5 + $0x1], 0  ;;  %s3643_s21 = smov 0   ;;  %s3645_s22 = smov 0  }
  0x10   :  { %s3647_s23 = smov 0   ;;  %s3649_s24 = smov 0  }
  0x11   :  { %s3651_s25 = smov 0   ;;  %s3653_s26 = smov 0  }
  0x12   :  { %s3655_s27 = smov 0   ;;  %s3657_s28 = smov 0  }
  0x13   :  { %s3659_s29 = smov 0   ;;  %s3661_s30 = smov 0  }
  0x14   :  { %s3663_s13 = smov 0  }
  0x15 LB: > { %5918 = sst [smem:[#allocation12_spill]] %s3539_s24  ;;  %s5855_s14 = sadd.s32 4294967295, %s3567_s13   ;;  %s3567_s13 = sphi %s3663_s13, %s31_s13   ;;  %s3563_s30 = sphi %s3661_s30, %s6095_s30   ;;  %s3559_s29 = sphi %s3659_s29, %s6087_s29   ;;  %s3555_s28 = sphi %s3657_s28, %s6094_s28   ;;  %s3551_s27 = sphi %s3655_s27, %s6086_s27   ;;  %s3547_s26 = sphi %s3653_s26, %s6085_s26   ;;  %s3543_s25 = sphi %s3651_s25, %s6093_s25   ;;  %s3539_s24 = sphi %s3649_s24, %s6092_s24   ;;  %s3535_s23 = sphi %s3647_s23, %s6091_s23   ;;  %s3531_s22 = sphi %s3645_s22, %s6090_s22   ;;  %s3527_s21 = sphi %s3643_s21, %s6089_s21  }
  0x16   : > { %5919 = sst [smem:[#allocation13_spill]] %s3547_s26  ;;  %s40_s16 = sadd.s32 1, %s3559_s29 }
  0x17   : > { %5920 = sst [smem:[#allocation14_spill]] %s3551_s27  ;;  %s43_s17 = sadd.s32 1, %s3563_s30 }
  0x18   : > { %5921 = sst [smem:[#allocation15_spill]] %s3555_s28  ;;  %p41_p0 = scmp.ge.s32.totalorder %s40_s16, 2 }
  0x19   : > { %5922 = sst [smem:[#allocation16_spill]] %s3559_s29  ;;  %s52_s18 = sadd.s32 1, %s3547_s26 }
  0x1a   : > { %p59_p1 = scmp.ne.s32.totalorder %s3547_s26, %s3543_s25  ;;  %p60_p2 = scmp.eq.s32.totalorder %s3567_s13, 0 }
  0x1b   : > { %s6097_s16 = smov (%p41_p0, %s40_s16), 0  ;;  %s6099_s17 = smov (!%p41_p0, %s43_s17), %s3563_s30 }
  0x1c   : > { %5923 = sst [smem:[#allocation17_spill]] %s6097_s16  ;;  %s48_s19 = ssub.s32 %s3559_s29, %s6097_s16 }
  0x1d   : > { %p3716_p3 = por %p60_p2, %p59_p1  ;;  %p45_p4 = scmp.ge.s32.totalorder %s6099_s17, 2 }
  0x1e   : > { %p65_p5 = scmp.ne.s32.totalorder %s3543_s25, %s3539_s24  ;;  %p3724_p6 = scmp.eq.s32.totalorder %s5855_s14, 0 }
  0x1f   : > { %s3729_s12 = sshll.u32 %s3559_s29, 4  ;;  %s6101_s17 = smov (%p45_p4, %s6099_s17), 0 }
  0x20   : > { %5926 = sst [smem:[#allocation18_spill]] %s6101_s17  ;;  %p3738_p7 = por %p3724_p6, %p65_p5 }
  0x21   : > { %s3014_s14 = sadd.s32 16, %s3729_s12  ;;  %s47_s10 = ssub.s32 %s3563_s30, %s6101_s17 }
  0x22   : > { %s3015_s29 = sshll.u32 %s6097_s16, 4  ;;  %s49_s2 = sor.u32 %s48_s19, %s47_s10 }
  0x23   : > { %s3016_s28 = sadd.s32 16, %s3015_s29  ;;  %p50_p8 = scmp.eq.s32.totalorder %s49_s2, 0 }
  0x24   : > { %s80_s27 = ssub.s32 %s3014_s14, %s3016_s28  ;;  %s84_s9 = sadd.s32 1, %s3535_s23 }
  0x25   : > { %s81_s8 = sor.u32 %s80_s27, %s47_s10  ;;  %p91_p10 = scmp.ne.s32.totalorder %s3535_s23, %s3531_s22 }
  0x26   : > { %s3748_s6 = scalar_select %p50_p8, %s3547_s26, %s52_s18  }
  0x27   : > { %p82_p9 = scmp.eq.s32.totalorder %s81_s8, 0  ;;  %p97_p11 = scmp.ne.s32.totalorder %s3531_s22, %s3527_s21 }
  0x28   : > { %5928 = sst [smem:[#allocation19_spill]] %s3748_s6  ;;  %s5929_s5 = sadd.s32 4294967295, %s3567_s13  }
  0x29   : > { %p340_p12 = scmp.eq.s32.totalorder %s5929_s5, 3  ;;  %p3761_p13 = por %p91_p10, %p60_p2 }
  0x2a   : > { %s3757_s17 = scalar_select %p82_p9, %s3535_s23, %s84_s9  }
  0x2b   : > { %p3767_p0 = por %p97_p11, %p3724_p6  ;;  %p3774_p4 = por %p340_p12, %p59_p1 }
  0x2c   : > { %5930 = sst [smem:[#allocation20_spill]] %s3757_s17  ;;  %s5934_s8 = sadd.s32 4294967294, %s3567_s13  }
  0x2d   : > { %p346_p8 = scmp.eq.s32.totalorder %s5934_s8, 3  ;;  %p2952_p2 = scmp.ge.s32.totalorder %s3567_s13, 4 }
  0x2f   : > { %p3783_p9 = por %p346_p8, %p65_p5  ;;  %389 = sbr.rel (%p2952_p2) target bundleno = 97 (0x61), region = 52 }
  0x31   : > { %s5935_s5 = scalar_select %p3783_p9, 1, 0 }
  0x33   : > { %5936 = sst [smem:[#allocation21_spill]] %s5935_s5 }
  0x34   : > { %392 = sbr.rel (!%p3716_p3) target bundleno = 80 (0x50), region = 56  ;;  %s393_s9 = sand.u32 (%p3716_p3), 1, %s3547_s26  }
  0x35   : > { %s2953_s21 = sshll.u32 (%p3716_p3), %s393_s9, 7  ;;  %s3791_s27 = scalar_lea.sflag (%p3716_p3), [#allocation4], %s393_s9 }
  0x36   : > { %s397_s28 = scalar_lea.vmem (%p3716_p3), [#allocation3], %s2953_s21  ;;  %s3081_s29 = smul.u32 (%p3716_p3), 33, %s3563_s30 }
  0x37   : > { %s412_s14 = sshll.u32 (%p3716_p3), %s397_s28, 4  ;;  %s5937_s0 = sld [smem:[#allocation73_spill]] (%p3716_p3)  ;;  %s413_s14 = int_to_ptr.vmem [resolvable:$true] %s412_s14 }
  0x38   : > { %s408_s15 = sadd.s32 (%p3716_p3), %s3081_s29, %s3729_s12 }
  0x39   : > { %s2957_s18 = sshll.u32 %s408_s15, 7 }
  0x3d   : > { %s410_s6 = scalar_lea.hbm %s5937_s0, %s2957_s18  ;;  %s3392_s24 = scalar_lea.hbm %s5937_s0, 8448 }
  0x3e   : > { %s3388_s17 = scalar_lea.hbm %s410_s6, 2048 }
  0x3f   : > { %p3389_p1 = scmp.ne.s32.totalorder %s410_s6, %s3388_s17  ;;  %p3394_p3 = scmp.lt.s32.totalorder %s3392_s24, %s3388_s17 }
  0x41   : > { %p3396_p5 = pnand %p3394_p3, %p3389_p1 }
  0x43   : > { %3399 = shalt.err (!%p3396_p5)
}
  0x44   : > { %s3400_s9 = scalar_lea.vmem %s413_s14, 2048  ;;  %s3569_s21 = smov [#allocation3]  }
  0x45   : > { %p3401_p6 = scmp.ne.s32.totalorder %s413_s14, %s3400_s9  ;;  %s3404_s28 = sshll.u32 %s3569_s21, 4  ;;  %s3405_s28 = int_to_ptr.vmem [resolvable:$false] %s3404_s28 }
  0x46   : > { %s3406_s29 = scalar_lea.vmem %s3405_s28, 4096  ;;  %p3407_p10 = scmp.lt.s32.totalorder %s413_s14, %s3405_s28 }
  0x47   : > { %p3408_p11 = scmp.lt.s32.totalorder %s3406_s29, %s3400_s9 }
  0x49   : > { %p3409_p12 = por %p3408_p11, %p3407_p10 }
  0x4b   : > { %p3410_p8 = pnand %p3409_p12, %p3401_p6 }
  0x4d   : > { %3413 = shalt.err (!%p3410_p8)
}
  0x4e   : > { %s3570_s15 = smov 128   ;;  %s3571_s18 = smov 8  }
  0x4f   : > { %418 = dma.hbm_to_vmem [thread:$0]  %s410_s6, 2048, %s413_s14, %s3791_s27, %s3570_s15, %s3570_s15, %s3571_s18  }
  0x50 PF: > { %s422_s24 = sand.u32 1, %s3535_s23   ;;  %s2854_s17 = smul.u32 33, %s3563_s30 }
  0x51   : > { %s2960_s5 = sshll.u32 %s422_s24, 3  ;;  %s423_s26 = scalar_lea.sflag [#allocation7], %s422_s24 }
  0x52   : > { %s2855_s19 = sadd.s32 %s3729_s12, %s2854_s17  ;;  %s426_s20 = scalar_lea.vmem [#allocation6], %s2960_s5 }
  0x53   : > { %s2962_s8 = sshll.u32 %s2855_s19, 7  ;;  %s437_s21 = sshll.u32 %s426_s20, 4  ;;  %s438_s21 = int_to_ptr.vmem [resolvable:$true] %s437_s21 }
  0x54   : > { %s2857_s29 = scalar_lea.hbm %s5842_s1, %s2962_s8  ;;  %s3426_s6 = scalar_lea.vmem %s438_s21, 128 }
  0x55   : > { %s2858_s0 = scalar_lea.hbm %s2857_s29, 2048  ;;  %p3427_p2 = scmp.ne.s32.totalorder %s438_s21, %s3426_s6 }
  0x56   : > { %s3572_s27 = smov [#allocation6]  }
  0x57   : > { %p3428_p1 = pnand %p3427_p2, %p3761_p13  ;;  %s3430_s14 = sshll.u32 %s3572_s27, 4  ;;  %s3431_s14 = int_to_ptr.vmem [resolvable:$false] %s3430_s14 }
  0x58   : > { %s3432_s15 = scalar_lea.vmem %s3431_s14, 256  ;;  %p3433_p5 = scmp.lt.s32.totalorder %s438_s21, %s3431_s14 }
  0x59   : > { %p3429_p3 = pneg %p3428_p1  ;;  %p3434_p6 = scmp.lt.s32.totalorder %s3432_s15, %s3426_s6 }
  0x5b   : > { %p3435_p10 = por %p3434_p6, %p3433_p5 }
  0x5d   : > { %p3436_p11 = pnand %p3435_p10, %p3429_p3 }
  0x5f   : > { %3439 = shalt.err (!%p3436_p11)
}
  0x60   : > { %3082 = dma.hbm_to_vmem [thread:$0]  (%p3761_p13), %s2858_s0, 128, %s438_s21, %s423_s26  }
  0x61 PF: > { %p2963_p12 = scmp.ge.s32.totalorder %s3567_s13, 1  ;;  %p455_p8 = scmp.lt.s32.totalorder %s3567_s13, 5 }
  0x63   : > { %p456_p9 = pnand %p2963_p12, %p455_p8 }
  0x65   : > { %459 = sbr.rel (%p456_p9) target bundleno = 1114 (0x45a), region = 68 }
  0x6a   : > { %s3815_s12 = sand.u32 1, %s3543_s25  }
  0x6b   : > { %s2964_s18 = sshll.u32 %s3815_s12, 7  ;;  %s462_s24 = scalar_lea.sflag [#allocation4], %s3815_s12 }
  0x6c   : > { %s3821_s17 = scalar_lea.vmem [#allocation3], %s2964_s18 }
  0x6d   : > { %3512 = dma.done.wait (%p3738_p7), %s462_s24, 2048  }
  0x6e   : > { %3514 = vsyncadd (%p3738_p7), %s462_s24, 4294965248  ;;  %s470_s0 = sand.u32 1, %s3531_s22  }
  0x6f   : > { %s3828_s26 = sshll.u32 %s470_s0, 3  ;;  %s471_s16 = scalar_lea.sflag [#allocation7], %s470_s0 }
  0x70   : > { %s474_s5 = scalar_lea.vmem [#allocation6], %s3828_s26 }
  0x71   : > { %3516 = dma.done.wait (%p3767_p0), %s471_s16, 128  }
  0x72   : > { %3518 = vsyncadd (%p3767_p0), %s471_s16, 4294967168  ;;  %v600_v0 = vlaneseq  ;;  %v548_v8 = vld [vmem:[%s3821_s17] sm:$0xff]  ;;  %v3850_v9 = vld [vmem:[%s3821_s17 + $0x8] sm:$0xff]  ;;  %s5954_s11 = sld [smem:[#allocation75_spill]]  ;;  %s2797_s24 = scalar_lea.sflag [#allocation5], %s3815_s12 }
  0x73   : > { %v599_v10 = vld [vmem:[%s5844_s3] sm:$0x7f]  ;;  %v620_v13 = vrot.slane %v548_v8, 1  ;;  %v621_v14 = vrot.slane %v3850_v9, 1  ;;  %v692_v16 = vrot.slane %v548_v8, 2  ;;  %v693_v17 = vrot.slane %v3850_v9, 2 }
  0x74   : > { %v3835_v1 = vshrl.u32 %v600_v0, 7  ;;  %v762_v19 = vrot.slane %v548_v8, 3  ;;  %v763_v22 = vrot.slane %v3850_v9, 3  ;;  %v832_v26 = vrot.slane %v548_v8, 4  ;;  %v3891_v32 = vld [vmem:[%s3821_s17 + $0x10] sm:$0xff]  ;;  %v3901_v37 = vld [vmem:[%s3821_s17 + $0x18] sm:$0xff] }
  0x75   : > { %v833_v27 = vrot.slane %v3850_v9, 4  ;;  %v902_v31 = vrot.slane %v548_v8, 5  ;;  %v903_v36 = vrot.slane %v3850_v9, 5  ;;  %v972_v40 = vrot.slane %v548_v8, 6  ;;  %v3933_v62 = vld [vmem:[%s5845_s4] ss:$0 sm:$0xff] }
  0x76   : > { %v5865_v2 = vsub.s32 0, %v3835_v1  ;;  %vm639_vm0 = vcmp.lt.s32.totalorder %v3835_v1, 7  ;;  %v5864_v3 = vsub.s32 1, %v3835_v1  ;;  %vm709_vm1 = vcmp.lt.s32.totalorder %v3835_v1, 6  ;;  %s5955_s8 = sld [smem:[#allocation76_spill]] }
  0x77   : > { %v728_v4 = vsub.s32 2, %v3835_v1  ;;  %vm779_vm2 = vcmp.lt.s32.totalorder %v3835_v1, 5  ;;  %v798_v5 = vsub.s32 3, %v3835_v1  ;;  %vm849_vm3 = vcmp.lt.s32.totalorder %v3835_v1, 4  ;;  %s5956_s9 = sld [smem:[#allocation78_spill]] }
  0x78   : > { %v868_v6 = vsub.s32 4, %v3835_v1  ;;  %vm919_vm4 = vcmp.lt.s32.totalorder %v3835_v1, 3  ;;  %v938_v7 = vsub.s32 5, %v3835_v1  ;;  %vm989_vm5 = vcmp.lt.s32.totalorder %v3835_v1, 2  ;;  %s5957_s6 = sld [smem:[#allocation77_spill]] }
  0x79   : > { %v1008_v11 = vsub.s32 6, %v3835_v1  ;;  %v3859_v12 = vrot.slane %v599_v10, %v5865_v2  ;;  %v3864_v15 = vrot.slane %v599_v10, %v5864_v3  ;;  %v3867_v18 = vrot.slane %v599_v10, %v728_v4  ;;  %v580_v2 = vld [vmem:[%s474_s5] sm:$0xff]  ;;  %s5998_s20 = sld [smem:[#allocation15_spill]] }
  0x7a   : > { %v655_v21 = vsel %vm639_vm0, %v620_v13, %v621_v14  ;;  %v3875_v23 = vrot.slane %v599_v10, %v798_v5  ;;  %v725_v25 = vsel %vm709_vm1, %v692_v16, %v693_v17  ;;  %v3886_v29 = vsel %vm779_vm2, %v762_v19, %v763_v22  ;;  %s6060_s5 = sld [smem:[#allocation79_spill]] }
  0x7b   : > { %v604_v20 = vmul.f32 %v3859_v12, %v548_v8  ;;  %v660_v24 = vmul.f32 %v3864_v15, %v655_v21  ;;  %v730_v28 = vmul.f32 %v3867_v18, %v725_v25  ;;  %5938 = vst [vmem:[#allocation22_spill] sm:$0xff] %v3886_v29  ;;  %v3888_v30 = vrot.slane %v599_v10, %v868_v6  ;;  %s6061_s19 = sld [smem:[#allocation80_spill]] }
  0x7c   : > { %v800_v34 = vmul.f32 %v3875_v23, %v3886_v29  ;;  %v865_v35 = vsel %vm849_vm3, %v832_v26, %v833_v27  ;;  %v3904_v39 = vrot.slane %v599_v10, %v938_v7  ;;  %v973_v41 = vrot.slane %v3850_v9, 6  ;;  %v3955_v26 = vld [vmem:[%s3821_s17 + $0x20] sm:$0xff] }
  0x7d   : > { %v676_v33 = vadd.f32 %v660_v24, %v604_v20  ;;  %v870_v38 = vmul.f32 %v3888_v30, %v865_v35  ;;  %v935_v43 = vsel %vm919_vm4, %v902_v31, %v903_v36  ;;  %v3909_v44 = vrot.slane %v599_v10, %v1008_v11 }
  0x7e   : > { %v606_v45 = vmul.f32 %v3859_v12, %v3891_v32  ;;  %v940_v46 = vmul.f32 %v3904_v39, %v935_v43  ;;  %v1005_v47 = vsel %vm989_vm5, %v972_v40, %v973_v41  ;;  %v622_v48 = vrot.slane %v3891_v32, 1 }
  0x7f   : > { %v746_v42 = vadd.f32 %v730_v28, %v676_v33  ;;  %v623_v49 = vrot.slane %v3901_v37, 1  ;;  %v1010_v51 = vmul.f32 %v3909_v44, %v1005_v47  ;;  %v694_v52 = vrot.slane %v3891_v32, 2  ;;  %p537_p7 = scmp.lt.s32.totalorder %s5998_s20, 1 }
  0x80   : > { %v695_v53 = vrot.slane %v3901_v37, 2  ;;  %v764_v55 = vrot.slane %v3891_v32, 3  ;;  %v765_v56 = vrot.slane %v3901_v37, 3  ;;  %v834_v57 = vrot.slane %v3891_v32, 4 }
  0x81   : > { %v816_v50 = vadd.f32 %v800_v34, %v746_v42  ;;  %v653_v54 = vsel %vm639_vm0, %v622_v48, %v623_v49  ;;  %v835_v61 = vrot.slane %v3901_v37, 4  ;;  %v904_v4 = vrot.slane %v3891_v32, 5  ;;  %s538_s28 = scalar_select %p537_p7, %s5998_s20, 1 }
  0x82   : > { %v662_v59 = vmul.f32 %v3864_v15, %v653_v54  ;;  %v723_v60 = vsel %vm709_vm1, %v694_v52, %v695_v53  ;;  %v3938_v0 = vsel %vm779_vm2, %v764_v55, %v765_v56  ;;  %v905_v5 = vrot.slane %v3901_v37, 5 }
  0x83   : > { %v886_v58 = vadd.f32 %v870_v38, %v816_v50  ;;  %v732_v63 = vmul.f32 %v3867_v18, %v723_v60  ;;  %5939 = vst [vmem:[#allocation23_spill] sm:$0xff] %v3938_v0  ;;  %v802_v8 = vmul.f32 %v3875_v23, %v3938_v0  ;;  %v863_v10 = vsel %vm849_vm3, %v834_v57, %v835_v61 }
  0x84   : > { %v678_v7 = vadd.f32 %v662_v59, %v606_v45  ;;  %v872_v11 = vmul.f32 %v3888_v30, %v863_v10  ;;  %v933_v13 = vsel %vm919_vm4, %v904_v4, %v905_v5  ;;  %v974_v16 = vrot.slane %v3891_v32, 6 }
  0x85   : > { %v956_v6 = vadd.f32 %v940_v46, %v886_v58  ;;  %v975_v19 = vrot.slane %v3901_v37, 6  ;;  %v942_v24 = vmul.f32 %v3904_v39, %v933_v13  ;;  %v605_v25 = vmul.f32 %v3859_v12, %v3850_v9 }
  0x86   : > { %v748_v21 = vadd.f32 %v732_v63, %v678_v7  ;;  %v654_v31 = vsel %vm639_vm0, %v621_v14, %v622_v48  ;;  %v724_v32 = vsel %vm709_vm1, %v693_v17, %v694_v52  ;;  %v3969_v33 = vsel %vm779_vm2, %v763_v22, %v764_v55  ;;  %v553_v7 = vld [vmem:[%s3821_s17 + $0x28] sm:$0xff] }
  0x87   : > { %v1026_v20 = vadd.f32 %v1010_v51, %v956_v6  ;;  %v1003_v28 = vsel %vm989_vm5, %v974_v16, %v975_v19  ;;  %5940 = vst [vmem:[#allocation24_spill] sm:$0xff] %v3969_v33  ;;  %v661_v40 = vmul.f32 %v3864_v15, %v654_v31  ;;  %v731_v42 = vmul.f32 %v3867_v18, %v724_v32 }
  0x88   : > { %v818_v35 = vadd.f32 %v802_v8, %v748_v21  ;;  %v1012_v38 = vmul.f32 %v3909_v44, %v1003_v28  ;;  %v801_v14 = vmul.f32 %v3875_v23, %v3969_v33  ;;  %v864_v17 = vsel %vm849_vm3, %v833_v27, %v834_v57 }
  0x89   : > { %v3972_v34 = vadd.f32 %v3933_v62, %v1026_v20  ;;  %v934_v22 = vsel %vm919_vm4, %v903_v36, %v904_v4  ;;  %v677_v45 = vadd.f32 %v661_v40, %v605_v25  ;;  %v871_v46 = vmul.f32 %v3888_v30, %v864_v17 }
  0x8a   : > { %v888_v43 = vadd.f32 %v872_v11, %v818_v35  ;;  %v941_v47 = vmul.f32 %v3904_v39, %v934_v22  ;;  %v1004_v48 = vsel %vm989_vm5, %v973_v41, %v974_v16  ;;  %v607_v9 = vmul.f32 %v3859_v12, %v3901_v37 }
  0x8b   : > { %1067 = vadd.xlane.f32.xlu0 %v3972_v34  ;;  %v624_v50 = vrot.slane %v3955_v26, 1  ;;  %v696_v27 = vrot.slane %v3955_v26, 2  ;;  %v747_v36 = vadd.f32 %v731_v42, %v677_v45  ;;  %v1011_v52 = vmul.f32 %v3909_v44, %v1004_v48  ;;  %v4045_v48 = vld [vmem:[%s3821_s17 + $0x30] sm:$0xff] }
  0x8c   : > { %v958_v51 = vadd.f32 %v942_v24, %v888_v43  ;;  %v766_v54 = vrot.slane %v3955_v26, 3  ;;  %v836_v57 = vrot.slane %v3955_v26, 4  ;;  %v906_v37 = vrot.slane %v3955_v26, 5 }
  0x8d   : > { %v652_v55 = vsel %vm639_vm0, %v623_v49, %v624_v50  ;;  %v722_v41 = vsel %vm709_vm1, %v695_v53, %v696_v27  ;;  %v817_v59 = vadd.f32 %v801_v14, %v747_v36  ;;  %v976_v6 = vrot.slane %v3955_v26, 6 }
  0x8e   : > { %v1028_v58 = vadd.f32 %v1012_v38, %v958_v51  ;;  %v663_v60 = vmul.f32 %v3864_v15, %v652_v55  ;;  %v733_v63 = vmul.f32 %v3867_v18, %v722_v41  ;;  %v4006_v4 = vsel %vm779_vm2, %v765_v56, %v766_v54 }
  0x8f   : > { %5941 = vst [vmem:[#allocation25_spill] sm:$0xff] %v4006_v4  ;;  %v862_v49 = vsel %vm849_vm3, %v835_v61, %v836_v57  ;;  %v932_v53 = vsel %vm919_vm4, %v905_v5, %v906_v37  ;;  %v887_v10 = vadd.f32 %v871_v46, %v817_v59  ;;  %v803_v13 = vmul.f32 %v3875_v23, %v4006_v4 }
  0x90   : > { %v4015_v8 = vadd.f32 %v3933_v62, %v1028_v58  ;;  %v679_v11 = vadd.f32 %v663_v60, %v607_v9  ;;  %v873_v56 = vmul.f32 %v3888_v30, %v862_v49  ;;  %v943_v16 = vmul.f32 %v3904_v39, %v932_v53 }
  0x91   : > { %v1002_v61 = vsel %vm989_vm5, %v975_v19, %v976_v6  ;;  %v608_v5 = vmul.f32 %v3859_v12, %v3955_v26  ;;  %v957_v20 = vadd.f32 %v941_v47, %v887_v10  ;;  %v625_v25 = vrot.slane %v553_v7, 1 }
  0x92   : > { %1071 = vadd.xlane.f32.xlu1 %v4015_v8  ;;  %v749_v21 = vadd.f32 %v733_v63, %v679_v11  ;;  %v1013_v24 = vmul.f32 %v3909_v44, %v1002_v61  ;;  %v697_v28 = vrot.slane %v553_v7, 2  ;;  %v767_v31 = vrot.slane %v553_v7, 3  ;;  %v4078_v61 = vld [vmem:[%s3821_s17 + $0x38] sm:$0xff] }
  0x93   : > { %v837_v32 = vrot.slane %v553_v7, 4  ;;  %v907_v35 = vrot.slane %v553_v7, 5  ;;  %v1027_v38 = vadd.f32 %v1011_v52, %v957_v20  ;;  %v651_v19 = vsel %vm639_vm0, %v624_v50, %v625_v25 }
  0x94   : > { %v819_v40 = vadd.f32 %v803_v13, %v749_v21  ;;  %v977_v42 = vrot.slane %v553_v7, 6  ;;  %v664_v26 = vmul.f32 %v3864_v15, %v651_v19  ;;  %v721_v14 = vsel %vm709_vm1, %v696_v27, %v697_v28 }
  0x95   : > { %v4034_v17 = vsel %vm779_vm2, %v766_v54, %v767_v31  ;;  %v861_v22 = vsel %vm849_vm3, %v836_v57, %v837_v32  ;;  %v4039_v43 = vadd.f32 %v3933_v62, %v1027_v38  ;;  %v734_v46 = vmul.f32 %v3867_v18, %v721_v14 }
  0x96   : > { %5942 = vst [vmem:[#allocation26_spill] sm:$0xff] %v4034_v17  ;;  %v889_v45 = vadd.f32 %v873_v56, %v819_v40  ;;  %v804_v47 = vmul.f32 %v3875_v23, %v4034_v17  ;;  %v680_v9 = vadd.f32 %v664_v26, %v608_v5  ;;  %v874_v50 = vmul.f32 %v3888_v30, %v861_v22 }
  0x97   : > { %v931_v27 = vsel %vm919_vm4, %v906_v37, %v907_v35  ;;  %v1001_v51 = vsel %vm989_vm5, %v976_v6, %v977_v42  ;;  %1069 = vadd.xlane.f32.xlu0 %v4039_v43  ;;  %v609_v55 = vmul.f32 %v3859_v12, %v553_v7  ;;  %v626_v57 = vrot.slane %v4045_v48, 1 }
  0x98   : > { %v959_v36 = vadd.f32 %v943_v16, %v889_v45  ;;  %v944_v52 = vmul.f32 %v3904_v39, %v931_v27  ;;  %v1014_v54 = vmul.f32 %v3909_v44, %v1001_v51  ;;  %v750_v41 = vadd.f32 %v734_v46, %v680_v9 }
  0x99   : > { %v698_v58 = vrot.slane %v4045_v48, 2  ;;  %v768_v37 = vrot.slane %v4045_v48, 3  ;;  %v838_v60 = vrot.slane %v4045_v48, 4  ;;  %v908_v63 = vrot.slane %v4045_v48, 5 }
  0x9a   : > { %v1029_v59 = vadd.f32 %v1013_v24, %v959_v36  ;;  %v978_v49 = vrot.slane %v4045_v48, 6  ;;  %v820_v53 = vadd.f32 %v804_v47, %v750_v41  ;;  %v650_v6 = vsel %vm639_vm0, %v625_v25, %v626_v57  ;;  %v4109_v36 = vld [vmem:[%s3821_s17 + $0x40] sm:$0xff] }
  0x9b   : > { %v720_v7 = vsel %vm709_vm1, %v697_v28, %v698_v58  ;;  %v4068_v10 = vsel %vm779_vm2, %v767_v31, %v768_v37  ;;  %v665_v13 = vmul.f32 %v3864_v15, %v650_v6  ;;  %v860_v20 = vsel %vm849_vm3, %v837_v32, %v838_v60 }
  0x9c   : > { %5943 = vst [vmem:[#allocation27_spill] sm:$0xff] %v4068_v10  ;;  %v4071_v11 = vadd.f32 %v3933_v62, %v1029_v59  ;;  %v735_v56 = vmul.f32 %v3867_v18, %v720_v7  ;;  %v805_v16 = vmul.f32 %v3875_v23, %v4068_v10  ;;  %v890_v5 = vadd.f32 %v874_v50, %v820_v53 }
  0x9d   : > { %v930_v21 = vsel %vm919_vm4, %v907_v35, %v908_v63  ;;  %v1000_v24 = vsel %vm989_vm5, %v977_v42, %v978_v49  ;;  %v681_v25 = vadd.f32 %v665_v13, %v609_v55  ;;  %v875_v28 = vmul.f32 %v3888_v30, %v860_v20 }
  0x9e   : > { %1073 = vadd.xlane.f32.xlu1 %v4071_v11  ;;  %v945_v31 = vmul.f32 %v3904_v39, %v930_v21  ;;  %v1015_v38 = vmul.f32 %v3909_v44, %v1000_v24  ;;  %v960_v40 = vadd.f32 %v944_v52, %v890_v5  ;;  %v610_v32 = vmul.f32 %v3859_v12, %v4045_v48 }
  0x9f   : > { %v627_v19 = vrot.slane %v4078_v61, 1  ;;  %v699_v35 = vrot.slane %v4078_v61, 2  ;;  %v751_v26 = vadd.f32 %v735_v56, %v681_v25  ;;  %v769_v42 = vrot.slane %v4078_v61, 3 }
  0xa0   : > { %v839_v14 = vrot.slane %v4078_v61, 4  ;;  %v909_v22 = vrot.slane %v4078_v61, 5  ;;  %v1030_v45 = vadd.f32 %v1014_v54, %v960_v40  ;;  %v979_v48 = vrot.slane %v4078_v61, 6 }
  0xa1   : > { %v649_v46 = vsel %vm639_vm0, %v626_v57, %v627_v19  ;;  %v719_v47 = vsel %vm709_vm1, %v698_v58, %v699_v35  ;;  %v821_v9 = vadd.f32 %v805_v16, %v751_v26  ;;  %v4106_v51 = vsel %vm779_vm2, %v768_v37, %v769_v42 }
  0xa2   : > { %v666_v50 = vmul.f32 %v3864_v15, %v649_v46  ;;  %v736_v27 = vmul.f32 %v3867_v18, %v719_v47  ;;  %5944 = vst [vmem:[#allocation28_spill] sm:$0xff] %v4106_v51  ;;  %v4112_v52 = vadd.f32 %v3933_v62, %v1030_v45  ;;  %v806_v54 = vmul.f32 %v3875_v23, %v4106_v51 }
  0xa3   : > { %v859_v55 = vsel %vm849_vm3, %v838_v60, %v839_v14  ;;  %v929_v41 = vsel %vm919_vm4, %v908_v63, %v909_v22  ;;  %v891_v57 = vadd.f32 %v875_v28, %v821_v9  ;;  %v999_v53 = vsel %vm989_vm5, %v978_v49, %v979_v48 }
  0xa4   : > { %v682_v58 = vadd.f32 %v666_v50, %v610_v32  ;;  %v876_v59 = vmul.f32 %v3888_v30, %v859_v55  ;;  %v946_v37 = vmul.f32 %v3904_v39, %v929_v41  ;;  %1075 = vadd.xlane.f32.xlu0 %v4112_v52  ;;  %v611_v6 = vmul.f32 %v3859_v12, %v4078_v61 }
  0xa5   : > { %v628_v7 = vrot.slane %v4109_v36, 1  ;;  %v700_v60 = vrot.slane %v4109_v36, 2  ;;  %v961_v13 = vadd.f32 %v945_v31, %v891_v57  ;;  %v1016_v56 = vmul.f32 %v3909_v44, %v999_v53 }
  0xa6   : > { %v752_v63 = vadd.f32 %v736_v27, %v682_v58  ;;  %v770_v16 = vrot.slane %v4109_v36, 3  ;;  %v840_v20 = vrot.slane %v4109_v36, 4  ;;  %v910_v61 = vrot.slane %v4109_v36, 5 }
  0xa7   : > { %v648_v5 = vsel %vm639_vm0, %v627_v19, %v628_v7  ;;  %v718_v49 = vsel %vm709_vm1, %v699_v35, %v700_v60  ;;  %v1031_v21 = vadd.f32 %v1015_v38, %v961_v13  ;;  %v980_v19 = vrot.slane %v4109_v36, 6  ;;  %v557_v35 = vld [vmem:[%s3821_s17 + $0x48] sm:$0xff] }
  0xa8   : > { %v822_v24 = vadd.f32 %v806_v54, %v752_v63  ;;  %v667_v25 = vmul.f32 %v3864_v15, %v648_v5  ;;  %v737_v28 = vmul.f32 %v3867_v18, %v718_v49  ;;  %v4141_v31 = vsel %vm779_vm2, %v769_v42, %v770_v16 }
  0xa9   : > { %5945 = vst [vmem:[#allocation29_spill] sm:$0xff] %v4141_v31  ;;  %v858_v40 = vsel %vm849_vm3, %v839_v14, %v840_v20  ;;  %v928_v32 = vsel %vm919_vm4, %v909_v22, %v910_v61  ;;  %v4150_v38 = vadd.f32 %v3933_v62, %v1031_v21  ;;  %v807_v46 = vmul.f32 %v3875_v23, %v4141_v31  ;;  %v4180_v21 = vld [vmem:[%s3821_s17 + $0x50] sm:$0xff] }
  0xaa   : > { %v892_v26 = vadd.f32 %v876_v59, %v822_v24  ;;  %v683_v45 = vadd.f32 %v667_v25, %v611_v6  ;;  %v877_v42 = vmul.f32 %v3888_v30, %v858_v40  ;;  %v947_v47 = vmul.f32 %v3904_v39, %v928_v32 }
  0xab   : > { %v998_v14 = vsel %vm989_vm5, %v979_v48, %v980_v19  ;;  %v612_v22 = vmul.f32 %v3859_v12, %v4109_v36  ;;  %1077 = vadd.xlane.f32.xlu1 %v4150_v38  ;;  %v629_v54 = vrot.slane %v557_v35, 1  ;;  %v701_v55 = vrot.slane %v557_v35, 2 }
  0xac   : > { %v962_v9 = vadd.f32 %v946_v37, %v892_v26  ;;  %v753_v50 = vadd.f32 %v737_v28, %v683_v45  ;;  %v1017_v27 = vmul.f32 %v3909_v44, %v998_v14  ;;  %v771_v41 = vrot.slane %v557_v35, 3 }
  0xad   : > { %v841_v57 = vrot.slane %v557_v35, 4  ;;  %v911_v58 = vrot.slane %v557_v35, 5  ;;  %v647_v48 = vsel %vm639_vm0, %v628_v7, %v629_v54  ;;  %v981_v6 = vrot.slane %v557_v35, 6 }
  0xae   : > { %v1032_v59 = vadd.f32 %v1016_v56, %v962_v9  ;;  %v823_v53 = vadd.f32 %v807_v46, %v753_v50  ;;  %v668_v36 = vmul.f32 %v3864_v15, %v647_v48  ;;  %v717_v37 = vsel %vm709_vm1, %v700_v60, %v701_v55 }
  0xaf   : > { %v4169_v13 = vsel %vm779_vm2, %v770_v16, %v771_v41  ;;  %v857_v63 = vsel %vm849_vm3, %v840_v20, %v841_v57  ;;  %v738_v49 = vmul.f32 %v3867_v18, %v717_v37  ;;  %v927_v16 = vsel %vm919_vm4, %v910_v61, %v911_v58 }
  0xb0   : > { %5946 = vst [vmem:[#allocation30_spill] sm:$0xff] %v4169_v13  ;;  %v4174_v5 = vadd.f32 %v3933_v62, %v1032_v59  ;;  %v893_v56 = vadd.f32 %v877_v42, %v823_v53  ;;  %v808_v7 = vmul.f32 %v3875_v23, %v4169_v13  ;;  %v684_v24 = vadd.f32 %v668_v36, %v612_v22  ;;  %v4213_v36 = vld [vmem:[%s3821_s17 + $0x58] sm:$0xff] }
  0xb1   : > { %v878_v60 = vmul.f32 %v3888_v30, %v857_v63  ;;  %v997_v20 = vsel %vm989_vm5, %v980_v19, %v981_v6  ;;  %v948_v28 = vmul.f32 %v3904_v39, %v927_v16  ;;  %v613_v32 = vmul.f32 %v3859_v12, %v557_v35 }
  0xb2   : > { %1079 = vadd.xlane.f32.xlu0 %v4174_v5  ;;  %v963_v25 = vadd.f32 %v947_v47, %v893_v56  ;;  %v1018_v40 = vmul.f32 %v3909_v44, %v997_v20  ;;  %v754_v26 = vadd.f32 %v738_v49, %v684_v24  ;;  %v630_v45 = vrot.slane %v4180_v21, 1 }
  0xb3   : > { %v702_v46 = vrot.slane %v4180_v21, 2  ;;  %v772_v61 = vrot.slane %v4180_v21, 3  ;;  %v842_v19 = vrot.slane %v4180_v21, 4  ;;  %v912_v14 = vrot.slane %v4180_v21, 5 }
  0xb4   : > { %v1033_v42 = vadd.f32 %v1017_v27, %v963_v25  ;;  %v982_v47 = vrot.slane %v4180_v21, 6  ;;  %v824_v22 = vadd.f32 %v808_v7, %v754_v26  ;;  %v646_v9 = vsel %vm639_vm0, %v629_v54, %v630_v45 }
  0xb5   : > { %v716_v35 = vsel %vm709_vm1, %v701_v55, %v702_v46  ;;  %v4203_v50 = vsel %vm779_vm2, %v771_v41, %v772_v61  ;;  %v669_v27 = vmul.f32 %v3864_v15, %v646_v9  ;;  %v856_v55 = vsel %vm849_vm3, %v841_v57, %v842_v19 }
  0xb6   : > { %5947 = vst [vmem:[#allocation31_spill] sm:$0xff] %v4203_v50  ;;  %v4206_v59 = vadd.f32 %v3933_v62, %v1033_v42  ;;  %v739_v53 = vmul.f32 %v3867_v18, %v716_v35  ;;  %v809_v48 = vmul.f32 %v3875_v23, %v4203_v50  ;;  %v894_v54 = vadd.f32 %v878_v60, %v824_v22 }
  0xb7   : > { %v926_v41 = vsel %vm919_vm4, %v911_v58, %v912_v14  ;;  %v996_v37 = vsel %vm989_vm5, %v981_v6, %v982_v47  ;;  %v685_v63 = vadd.f32 %v669_v27, %v613_v32  ;;  %v879_v56 = vmul.f32 %v3888_v30, %v856_v55  ;;  %v4244_v27 = vld [vmem:[%s3821_s17 + $0x60] sm:$0xff] }
  0xb8   : > { %1081 = vadd.xlane.f32.xlu1 %v4206_v59  ;;  %v949_v49 = vmul.f32 %v3904_v39, %v926_v41  ;;  %v1019_v7 = vmul.f32 %v3909_v44, %v996_v37  ;;  %v964_v24 = vadd.f32 %v948_v28, %v894_v54  ;;  %v614_v57 = vmul.f32 %v3859_v12, %v4180_v21 }
  0xb9   : > { %v631_v60 = vrot.slane %v4213_v36, 1  ;;  %v703_v58 = vrot.slane %v4213_v36, 2  ;;  %v755_v16 = vadd.f32 %v739_v53, %v685_v63  ;;  %v773_v6 = vrot.slane %v4213_v36, 3 }
  0xba   : > { %v843_v20 = vrot.slane %v4213_v36, 4  ;;  %v913_v25 = vrot.slane %v4213_v36, 5  ;;  %v1034_v32 = vadd.f32 %v1018_v40, %v964_v24  ;;  %v983_v21 = vrot.slane %v4213_v36, 6 }
  0xbb   : > { %v645_v26 = vsel %vm639_vm0, %v630_v45, %v631_v60  ;;  %v715_v28 = vsel %vm709_vm1, %v702_v46, %v703_v58  ;;  %v825_v42 = vadd.f32 %v809_v48, %v755_v16  ;;  %v4241_v35 = vsel %vm779_vm2, %v772_v61, %v773_v6 }
  0xbc   : > { %v670_v22 = vmul.f32 %v3864_v15, %v645_v26  ;;  %v740_v9 = vmul.f32 %v3867_v18, %v715_v28  ;;  %5948 = vst [vmem:[#allocation32_spill] sm:$0xff] %v4241_v35  ;;  %v4247_v40 = vadd.f32 %v3933_v62, %v1034_v32  ;;  %v810_v45 = vmul.f32 %v3875_v23, %v4241_v35 }
  0xbd   : > { %v855_v46 = vsel %vm849_vm3, %v842_v19, %v843_v20  ;;  %v925_v53 = vsel %vm919_vm4, %v912_v14, %v913_v25  ;;  %v895_v48 = vadd.f32 %v879_v56, %v825_v42  ;;  %v995_v41 = vsel %vm989_vm5, %v982_v47, %v983_v21 }
  0xbe   : > { %v686_v54 = vadd.f32 %v670_v22, %v614_v57  ;;  %v880_v55 = vmul.f32 %v3888_v30, %v855_v46  ;;  %v950_v61 = vmul.f32 %v3904_v39, %v925_v53  ;;  %1083 = vadd.xlane.f32.xlu0 %v4247_v40  ;;  %v615_v37 = vmul.f32 %v3859_v12, %v4213_v36  ;;  %v4284_v46 = vld [vmem:[%s3821_s17 + $0x68] sm:$0xff] }
  0xbf   : > { %v632_v63 = vrot.slane %v4244_v27, 1  ;;  %v704_v19 = vrot.slane %v4244_v27, 2  ;;  %v965_v24 = vadd.f32 %v949_v49, %v895_v48  ;;  %v1020_v56 = vmul.f32 %v3909_v44, %v995_v41 }
  0xc0   : > { %v756_v14 = vadd.f32 %v740_v9, %v686_v54  ;;  %v774_v57 = vrot.slane %v4244_v27, 3  ;;  %v844_v32 = vrot.slane %v4244_v27, 4  ;;  %v914_v36 = vrot.slane %v4244_v27, 5 }
  0xc1   : > { %v644_v16 = vsel %vm639_vm0, %v631_v60, %v632_v63  ;;  %v714_v47 = vsel %vm709_vm1, %v703_v58, %v704_v19  ;;  %v1035_v26 = vadd.f32 %v1019_v7, %v965_v24  ;;  %v984_v9 = vrot.slane %v4244_v27, 6 }
  0xc2   : > { %v826_v28 = vadd.f32 %v810_v45, %v756_v14  ;;  %v671_v49 = vmul.f32 %v3864_v15, %v644_v16  ;;  %v741_v42 = vmul.f32 %v3867_v18, %v714_v47  ;;  %v4276_v22 = vsel %vm779_vm2, %v773_v6, %v774_v57 }
  0xc3   : > { %5949 = vst [vmem:[#allocation33_spill] sm:$0xff] %v4276_v22  ;;  %v854_v60 = vsel %vm849_vm3, %v843_v20, %v844_v32  ;;  %v924_v58 = vsel %vm919_vm4, %v913_v25, %v914_v36  ;;  %v4287_v7 = vadd.f32 %v3933_v62, %v1035_v26  ;;  %v811_v48 = vmul.f32 %v3875_v23, %v4276_v22 }
  0xc4   : > { %v896_v45 = vadd.f32 %v880_v55, %v826_v28  ;;  %v687_v53 = vadd.f32 %v671_v49, %v615_v37  ;;  %v881_v6 = vmul.f32 %v3888_v30, %v854_v60  ;;  %v951_v54 = vmul.f32 %v3904_v39, %v924_v58 }
  0xc5   : > { %v994_v20 = vsel %vm989_vm5, %v983_v21, %v984_v9  ;;  %1085 = vadd.xlane.f32.xlu1 %v4287_v7  ;;  %v616_v24 = vmul.f32 %v3859_v12, %v4244_v27  ;;  %v633_v55 = vrot.slane %v4284_v46, 1  ;;  %v705_v37 = vrot.slane %v4284_v46, 2 }
  0xc6   : > { %v966_v25 = vadd.f32 %v950_v61, %v896_v45  ;;  %v757_v41 = vadd.f32 %v741_v42, %v687_v53  ;;  %v775_v14 = vrot.slane %v4284_v46, 3  ;;  %v845_v16 = vrot.slane %v4284_v46, 4  ;;  %v4321_v53 = vld [vmem:[%s3821_s17 + $0x70] sm:$0xff] }
  0xc7   : > { %v915_v47 = vrot.slane %v4284_v46, 5  ;;  %v643_v61 = vsel %vm639_vm0, %v632_v63, %v633_v55  ;;  %v985_v28 = vrot.slane %v4284_v46, 6  ;;  %v713_v49 = vsel %vm709_vm1, %v704_v19, %v705_v37 }
  0xc8   : > { %v1036_v26 = vadd.f32 %v1020_v56, %v966_v25  ;;  %v827_v21 = vadd.f32 %v811_v48, %v757_v41  ;;  %v672_v27 = vmul.f32 %v3864_v15, %v643_v61  ;;  %v4311_v42 = vsel %vm779_vm2, %v774_v57, %v775_v14 }
  0xc9   : > { %5950 = vst [vmem:[#allocation34_spill] sm:$0xff] %v4311_v42  ;;  %v853_v60 = vsel %vm849_vm3, %v844_v32, %v845_v16  ;;  %v1021_v63 = vmul.f32 %v3909_v44, %v994_v20  ;;  %v742_v45 = vmul.f32 %v3867_v18, %v713_v49  ;;  %v812_v19 = vmul.f32 %v3875_v23, %v4311_v42 }
  0xca   : > { %v4316_v56 = vadd.f32 %v3933_v62, %v1036_v26  ;;  %v897_v58 = vadd.f32 %v881_v6, %v827_v21  ;;  %v688_v48 = vadd.f32 %v672_v27, %v616_v24  ;;  %v882_v57 = vmul.f32 %v3888_v30, %v853_v60 }
  0xcb   : > { %v923_v25 = vsel %vm919_vm4, %v914_v36, %v915_v47  ;;  %v993_v20 = vsel %vm989_vm5, %v984_v9, %v985_v28  ;;  %v617_v41 = vmul.f32 %v3859_v12, %v4284_v46  ;;  %v634_v26 = vrot.slane %v4321_v53, 1 }
  0xcc   : > { %1087 = vadd.xlane.f32.xlu0 %v4316_v56  ;;  %v967_v32 = vadd.f32 %v951_v54, %v897_v58  ;;  %v952_v6 = vmul.f32 %v3904_v39, %v923_v25  ;;  %v758_v24 = vadd.f32 %v742_v45, %v688_v48  ;;  %v706_v21 = vrot.slane %v4321_v53, 2 }
  0xcd   : > { %v776_v61 = vrot.slane %v4321_v53, 3  ;;  %v846_v27 = vrot.slane %v4321_v53, 4  ;;  %v916_v54 = vrot.slane %v4321_v53, 5  ;;  %v986_v49 = vrot.slane %v4321_v53, 6 }
  0xce   : > { %v1037_v36 = vadd.f32 %v1021_v63, %v967_v32  ;;  %v828_v60 = vadd.f32 %v812_v19, %v758_v24  ;;  %v642_v9 = vsel %vm639_vm0, %v633_v55, %v634_v26  ;;  %v712_v46 = vsel %vm709_vm1, %v705_v37, %v706_v21  ;;  %v4355_v19 = vld [vmem:[%s3821_s17 + $0x78] sm:$0xff]  ;;  %s6002_s17 = sld [smem:[#allocation74_spill]] }
  0xcf   : > { %v4346_v58 = vsel %vm779_vm2, %v775_v14, %v776_v61  ;;  %v1022_v63 = vmul.f32 %v3909_v44, %v993_v20  ;;  %v673_v48 = vmul.f32 %v3864_v15, %v642_v9  ;;  %v743_v25 = vmul.f32 %v3867_v18, %v712_v46 }
  0xd0   : > { %5951 = vst [vmem:[#allocation35_spill] sm:$0xff] %v4346_v58  ;;  %v4349_v45 = vadd.f32 %v3933_v62, %v1037_v36  ;;  %v898_v32 = vadd.f32 %v882_v57, %v828_v60  ;;  %v813_v55 = vmul.f32 %v3875_v23, %v4346_v58  ;;  %v852_v37 = vsel %vm849_vm3, %v845_v16, %v846_v27 }
  0xd1   : > { %v922_v14 = vsel %vm919_vm4, %v915_v47, %v916_v54  ;;  %v689_v24 = vadd.f32 %v673_v48, %v617_v41  ;;  %v883_v20 = vmul.f32 %v3888_v30, %v852_v37  ;;  %v992_v9 = vsel %vm989_vm5, %v985_v28, %v986_v49 }
  0xd2   : > { %1089 = vadd.xlane.f32.xlu1 %v4349_v45  ;;  %v953_v36 = vmul.f32 %v3904_v39, %v922_v14  ;;  %v968_v57 = vadd.f32 %v952_v6, %v898_v32  ;;  %v618_v60 = vmul.f32 %v3859_v12, %v4321_v53  ;;  %v635_v16 = vrot.slane %v4355_v19, 1 }
  0xd3   : > { %v707_v46 = vrot.slane %v4355_v19, 2  ;;  %v759_v47 = vadd.f32 %v743_v25, %v689_v24  ;;  %v777_v3 = vrot.slane %v4355_v19, 3  ;;  %v847_v41 = vrot.slane %v4355_v19, 4 }
  0xd4   : > { %v917_v48 = vrot.slane %v4355_v19, 5  ;;  %v1038_v37 = vadd.f32 %v1022_v63, %v968_v57  ;;  %v641_v28 = vsel %vm639_vm0, %v634_v26, %v635_v16  ;;  %v987_v53 = vrot.slane %v4355_v19, 6 }
  0xd5   : > { %v711_v6 = vsel %vm709_vm1, %v706_v21, %v707_v46  ;;  %v829_v32 = vadd.f32 %v813_v55, %v759_v47  ;;  %v674_v14 = vmul.f32 %v3864_v15, %v641_v28  ;;  %v4384_v24 = vsel %vm779_vm2, %v776_v61, %v777_v3 }
  0xd6   : > { %v744_v25 = vmul.f32 %v3867_v18, %v711_v6  ;;  %5952 = vst [vmem:[#allocation36_spill] sm:$0xff] %v4384_v24  ;;  %v4389_v63 = vadd.f32 %v3933_v62, %v1038_v37  ;;  %v1023_v26 = vmul.f32 %v3909_v44, %v992_v9  ;;  %v851_v21 = vsel %vm849_vm3, %v846_v27, %v847_v41 }
  0xd7   : > { %v921_v55 = vsel %vm919_vm4, %v916_v54, %v917_v48  ;;  %v899_v57 = vadd.f32 %v883_v20, %v829_v32  ;;  %v690_v47 = vadd.f32 %v674_v14, %v618_v60  ;;  %v814_v28 = vmul.f32 %v3875_v23, %v4384_v24 }
  0xd8   : > { %v884_v61 = vmul.f32 %v3888_v30, %v851_v21  ;;  %1091 = vadd.xlane.f32.xlu0 %v4389_v63  ;;  %v954_v37 = vmul.f32 %v3904_v39, %v921_v55  ;;  %v991_v9 = vsel %vm989_vm5, %v986_v49, %v987_v53  ;;  %v636_v6 = vrot.slane %v580_v2, 1 }
  0xd9   : > { %v708_v58 = vrot.slane %v580_v2, 2  ;;  %v969_v27 = vadd.f32 %v953_v36, %v899_v57  ;;  %v760_v42 = vadd.f32 %v744_v25, %v690_v47  ;;  %v619_v54 = vmul.f32 %v3859_v12, %v4355_v19 }
  0xda   : > { %v778_v20 = vrot.slane %v580_v2, 3  ;;  %v640_v60 = vsel %vm639_vm0, %v635_v16, %v636_v6  ;;  %v848_v14 = vrot.slane %v580_v2, 4  ;;  %v918_v21 = vrot.slane %v580_v2, 5 }
  0xdb   : > { %v710_v32 = vsel %vm709_vm1, %v707_v46, %v708_v58  ;;  %v1039_v55 = vadd.f32 %v1023_v26, %v969_v27  ;;  %v830_v24 = vadd.f32 %v814_v28, %v760_v42  ;;  %v675_v49 = vmul.f32 %v3864_v15, %v640_v60 }
  0xdc   : > { %v745_v22 = vmul.f32 %v3867_v18, %v710_v32  ;;  %v1024_v36 = vmul.f32 %v3909_v44, %v991_v9  ;;  %v4414_v12 = vsel %vm779_vm2, %v777_v3, %v778_v20  ;;  %v850_v19 = vsel %vm849_vm3, %v847_v41, %v848_v14 }
  0xdd   : > { %5953 = vst [vmem:[#allocation37_spill] sm:$0xff] %v4414_v12  ;;  %v988_v16 = vrot.slane %v580_v2, 6  ;;  %v4419_v58 = vadd.f32 %v3933_v62, %v1039_v55  ;;  %v900_v46 = vadd.f32 %v884_v61, %v830_v24  ;;  %v691_v25 = vadd.f32 %v675_v49, %v619_v54  ;;  %v3193_v55 = vld [vmem:[%s5848_s7 + $0x60] ss:$8 sps:$4 sm:$0xff]  }
  0xde   : > { %v815_v15 = vmul.f32 %v3875_v23, %v4414_v12  ;;  %v920_v18 = vsel %vm919_vm4, %v917_v48, %v918_v21  ;;  %v885_v26 = vmul.f32 %v3888_v30, %v850_v19  ;;  %v3188_v30 = vld [vmem:[%s5848_s7 + $0x74] ss:$8 sps:$4 sm:$0xff]  }
  0xdf   : > { %1093 = vadd.xlane.f32.xlu1 %v4419_v58  ;;  %v970_v42 = vadd.f32 %v954_v37, %v900_v46  ;;  %v761_v3 = vadd.f32 %v745_v22, %v691_v25  ;;  %v990_v2 = vsel %vm989_vm5, %v987_v53, %v988_v16  ;;  %v955_v24 = vmul.f32 %v3904_v39, %v920_v18  ;;  %v3190_v39 = vld [vmem:[%s5848_s7 + $0x70] ss:$8 sps:$4 sm:$0xff]  }
  0xe0   : > { %v1025_v28 = vmul.f32 %v3909_v44, %v990_v2  ;;  %1404 = vmatprep.subr.bf16.mxu0 %v3188_v30  ;;  %v3196_v18 = vld [vmem:[%s5848_s7 + $0x50] ss:$8 sps:$4 sm:$0xff]  }
  0xe1   : > { %v1040_v41 = vadd.f32 %v1024_v36, %v970_v42  ;;  %v831_v57 = vadd.f32 %v815_v15, %v761_v3  ;;  %1405 = vmatpush1.bf16.msra.mxu0 %v3190_v39 }
  0xe3   : > { %v4431_v47 = vadd.f32 %v3933_v62, %v1040_v41  ;;  %v901_v23 = vadd.f32 %v885_v26, %v831_v57 }
  0xe5   : > { %1095 = vadd.xlane.f32.xlu0 %v4431_v47  ;;  %v971_v48 = vadd.f32 %v955_v24, %v901_v23  ;;  %v3199_v23 = vld [vmem:[%s5848_s7 + $0x40] ss:$8 sps:$4 sm:$0xff]  }
  0xe7   : > { %v1041_v61 = vadd.f32 %v1025_v28, %v971_v48 }
  0xe9   : > { %v4436_v22 = vadd.f32 %v3933_v62, %v1041_v61 }
  0xeb   : > { %1097 = vadd.xlane.f32.xlu1 %v4436_v22 }
 0x114   : > { %v1068_v44 = vpop.xlane.xlu0 %1067 }
 0x115   : > { %v1100_v53 = vmul.f32 0.0078125, %v1068_v44 }
 0x117   : > { %v4446_v37 = vsub.f32 %v3972_v34, %v1100_v53 }
 0x119   : > { %v1132_v62 = vmul.f32 %v4446_v37, %v4446_v37 }
 0x11b   : > { %1148 = vadd.xlane.f32.xlu0 %v1132_v62  ;;  %v1072_v9 = vpop.xlane.xlu1 %1071  ;;  %v3202_v62 = vld [vmem:[%s5848_s7 + $0x30] ss:$8 sps:$4 sm:$0xff]  }
 0x11c   : > { %v1102_v6 = vmul.f32 0.0078125, %v1072_v9 }
 0x11e   : > { %v4451_v27 = vsub.f32 %v4015_v8, %v1102_v6  ;;  %v3191_v8 = vld [vmem:[%s5848_s7 + $0x64] ss:$8 sps:$4 sm:$0xff]  }
 0x11f   : > { %1406 = vmatprep.subr.bf16.mxu0 %v3191_v8 }
 0x120   : > { %v1134_v54 = vmul.f32 %v4451_v27, %v4451_v27  ;;  %v1070_v20 = vpop.xlane.xlu0 %1069  ;;  %1407 = vmatpush1.bf16.msra.mxu0 %v3193_v55 }
 0x121   : > { %v1101_v60 = vmul.f32 0.0078125, %v1070_v20 }
 0x122   : > { %1152 = vadd.xlane.f32.xlu0 %v1134_v54 }
 0x123   : > { %v4456_v32 = vsub.f32 %v4039_v43, %v1101_v60 }
 0x125   : > { %v1133_v34 = vmul.f32 %v4456_v32, %v4456_v32 }
 0x127   : > { %v1074_v14 = vpop.xlane.xlu1 %1073  ;;  %1150 = vadd.xlane.f32.xlu1 %v1133_v34 }
 0x128   : > { %v1103_v21 = vmul.f32 0.0078125, %v1074_v14 }
 0x12a   : > { %v4467_v49 = vsub.f32 %v4071_v11, %v1103_v21  ;;  %v3194_v11 = vld [vmem:[%s5848_s7 + $0x54] ss:$8 sps:$4 sm:$0xff]   ;;  %v3205_v21 = vld [vmem:[%s5848_s7 + $0x20] ss:$8 sps:$4 sm:$0xff]  }
 0x12b   : > { %1408 = vmatprep.subr.bf16.mxu0 %v3194_v11 }
 0x12c   : > { %v1135_v43 = vmul.f32 %v4467_v49, %v4467_v49  ;;  %1409 = vmatpush1.bf16.msra.mxu0 %v3196_v18 }
 0x12d   : > { %v1076_v36 = vpop.xlane.xlu0 %1075 }
 0x12e   : > { %1154 = vadd.xlane.f32.xlu1 %v1135_v43  ;;  %v1104_v19 = vmul.f32 0.0078125, %v1076_v36 }
 0x130   : > { %v4472_v16 = vsub.f32 %v4112_v52, %v1104_v19 }
 0x132   : > { %v1136_v46 = vmul.f32 %v4472_v16, %v4472_v16 }
 0x134   : > { %v1078_v25 = vpop.xlane.xlu1 %1077  ;;  %1156 = vadd.xlane.f32.xlu0 %v1136_v46 }
 0x135   : > { %v1105_v15 = vmul.f32 0.0078125, %v1078_v25 }
 0x137   : > { %v4483_v42 = vsub.f32 %v4150_v38, %v1105_v15  ;;  %v3197_v38 = vld [vmem:[%s5848_s7 + $0x44] ss:$8 sps:$4 sm:$0xff]   ;;  %v3208_v15 = vld [vmem:[%s5848_s7 + $0x10] ss:$8 sps:$4 sm:$0xff]  }
 0x138   : > { %1410 = vmatprep.subr.bf16.mxu0 %v3197_v38 }
 0x139   : > { %v1137_v52 = vmul.f32 %v4483_v42, %v4483_v42  ;;  %1411 = vmatpush1.bf16.msra.mxu0 %v3199_v23  ;;  %v3573_v23 = vmov 0  }
 0x13a   : > { %1436 = vmatprep.mubr.bf16.mxu0 %v3573_v23  ;;  %3187 = vset.pattern.permute.xlu1 %v3573_v23 }
 0x13b   : > { %v1080_v3 = vpop.xlane.xlu0 %1079  ;;  %1158 = vadd.xlane.f32.xlu1 %v1137_v52  ;;  %3186 = vset.pattern.permute.xlu0 %v3573_v23 }
 0x13c   : > { %v1106_v26 = vmul.f32 0.0078125, %v1080_v3 }
 0x13e   : > { %v4488_v2 = vsub.f32 %v4174_v5, %v1106_v26 }
 0x140   : > { %v1138_v41 = vmul.f32 %v4488_v2, %v4488_v2 }
 0x141   : > { %v1082_v57 = vpop.xlane.xlu1 %1081 }
 0x142   : > { %v1107_v24 = vmul.f32 0.0078125, %v1082_v57  ;;  %1160 = vadd.xlane.f32.xlu0 %v1138_v41 }
 0x144   : > { %v4499_v28 = vsub.f32 %v4206_v59, %v1107_v24  ;;  %v3200_v59 = vld [vmem:[%s5848_s7 + $0x34] ss:$8 sps:$4 sm:$0xff]   ;;  %v3211_v24 = vld [vmem:[%s5848_s7] ss:$8 sps:$4 sm:$0xff]  }
 0x145   : > { %1412 = vmatprep.subr.bf16.mxu0 %v3200_v59 }
 0x146   : > { %v1139_v5 = vmul.f32 %v4499_v28, %v4499_v28  ;;  %1413 = vmatpush1.bf16.msra.mxu0 %v3202_v62 }
 0x147   : > { %v1084_v48 = vpop.xlane.xlu0 %1083 }
 0x148   : > { %1162 = vadd.xlane.f32.xlu1 %v1139_v5  ;;  %v1108_v61 = vmul.f32 0.0078125, %v1084_v48 }
 0x14a   : > { %v4504_v30 = vsub.f32 %v4247_v40, %v1108_v61 }
 0x14c   : > { %v1140_v39 = vmul.f32 %v4504_v30, %v4504_v30 }
 0x14e   : > { %v1086_v44 = vpop.xlane.xlu1 %1085  ;;  %1164 = vadd.xlane.f32.xlu0 %v1140_v39 }
 0x14f   : > { %v1109_v53 = vmul.f32 0.0078125, %v1086_v44 }
 0x151   : > { %v4515_v9 = vsub.f32 %v4287_v7, %v1109_v53  ;;  %v3203_v7 = vld [vmem:[%s5848_s7 + $0x24] ss:$8 sps:$4 sm:$0xff]  }
 0x152   : > { %1414 = vmatprep.subr.bf16.mxu0 %v3203_v7 }
 0x153   : > { %v1141_v40 = vmul.f32 %v4515_v9, %v4515_v9  ;;  %1415 = vmatpush1.bf16.msra.mxu0 %v3205_v21 }
 0x155   : > { %v1088_v6 = vpop.xlane.xlu0 %1087  ;;  %1166 = vadd.xlane.f32.xlu1 %v1141_v40 }
 0x156   : > { %v1110_v54 = vmul.f32 0.0078125, %v1088_v6 }
 0x158   : > { %v4520_v20 = vsub.f32 %v4316_v56, %v1110_v54 }
 0x15a   : > { %v1142_v60 = vmul.f32 %v4520_v20, %v4520_v20 }
 0x15b   : > { %v1090_v34 = vpop.xlane.xlu1 %1089 }
 0x15c   : > { %v1111_v14 = vmul.f32 0.0078125, %v1090_v34  ;;  %1168 = vadd.xlane.f32.xlu0 %v1142_v60 }
 0x15e   : > { %v4531_v8 = vsub.f32 %v4349_v45, %v1111_v14  ;;  %v3206_v45 = vld [vmem:[%s5848_s7 + $0x14] ss:$8 sps:$4 sm:$0xff]  }
 0x15f   : > { %1416 = vmatprep.subr.bf16.mxu0 %v3206_v45  ;;  %v4581_v45 = vld [vmem:[%s5955_s8] ss:$0 sm:$0xff]  ;;  %s5997_s8 = sld [smem:[#allocation14_spill]] }
 0x160   : > { %v1143_v56 = vmul.f32 %v4531_v8, %v4531_v8  ;;  %1417 = vmatpush1.bf16.msra.mxu0 %v3208_v15 }
 0x161   : > { %v1092_v55 = vpop.xlane.xlu0 %1091 }
 0x162   : > { %1170 = vadd.xlane.f32.xlu1 %v1143_v56  ;;  %v1112_v43 = vmul.f32 0.0078125, %v1092_v55  ;;  %v4574_v56 = vld [vmem:[%s5954_s11] ss:$0 sm:$0xff] }
 0x164   : > { %v4536_v36 = vsub.f32 %v4389_v63, %v1112_v43 }
 0x165   : > { %s5212_s21 = sshll.u32 %s5997_s8, 4  ;;  %s5712_s8 = scalar_lea.vmem [#allocation8], %s2964_s18 }
 0x166   : > { %v1144_v19 = vmul.f32 %v4536_v36, %v4536_v36  ;;  %p539_p13 = scmp.lt.s32.totalorder %s5212_s21, 31  ;;  %s3009_s18 = sshll.u32 %s5998_s20, 5 }
 0x168   : > { %v1094_v46 = vpop.xlane.xlu1 %1093  ;;  %1172 = vadd.xlane.f32.xlu0 %v1144_v19  ;;  %s540_s29 = scalar_select %p539_p13, %s5212_s21, 31 }
 0x169   : > { %v1113_v25 = vmul.f32 0.0078125, %v1094_v46 }
 0x16b   : > { %v4547_v11 = vsub.f32 %v4419_v58, %v1113_v25  ;;  %v3209_v58 = vld [vmem:[%s5848_s7 + $0x4] ss:$8 sps:$4 sm:$0xff]  }
 0x16c   : > { %1418 = vmatprep.subr.bf16.mxu0 %v3209_v58 }
 0x16d   : > { %v1145_v63 = vmul.f32 %v4547_v11, %v4547_v11  ;;  %1419 = vmatpush1.bf16.msra.mxu0 %v3211_v24 }
 0x16e   : > { %v1096_v18 = vpop.xlane.xlu0 %1095 }
 0x16f   : > { %v1114_v52 = vmul.f32 0.0078125, %v1096_v18  ;;  %1174 = vadd.xlane.f32.xlu1 %v1145_v63 }
 0x171   : > { %v4552_v3 = vsub.f32 %v4431_v47, %v1114_v52 }
 0x173   : > { %v1146_v26 = vmul.f32 %v4552_v3, %v4552_v3 }
 0x174   : > { %v1098_v41 = vpop.xlane.xlu1 %1097 }
 0x175   : > { %v1115_v57 = vmul.f32 0.0078125, %v1098_v41  ;;  %1176 = vadd.xlane.f32.xlu0 %v1146_v26 }
 0x177   : > { %v4563_v38 = vsub.f32 %v4436_v22, %v1115_v57 }
 0x179   : > { %v1147_v47 = vmul.f32 %v4563_v38, %v4563_v38 }
 0x17b   : > { %1178 = vadd.xlane.f32.xlu1 %v1147_v47 }
 0x1a4   : > { %v1149_v5 = vpop.xlane.xlu0 %1148 }
 0x1a5   : > { %v1180_v48 = vmul.f32 0.0078125, %v1149_v5 }
 0x1a7   : > { %v1196_v61 = vadd.f32 1e-05, %v1180_v48 }
 0x1a9   : > { %3228 = vrsqrt.f32 %v1196_v61 }
 0x1ab   : > { %v1153_v39 = vpop.xlane.xlu0 %1152 }
 0x1ac   : > { %v1182_v22 = vmul.f32 0.0078125, %v1153_v39 }
 0x1ae   : > { %v1198_v62 = vadd.f32 1e-05, %v1182_v22 }
 0x1b0   : > { %v1151_v44 = vpop.xlane.xlu1 %1150 }
 0x1b1   : > { %v1181_v53 = vmul.f32 0.0078125, %v1151_v44 }
 0x1b3   : > { %v1197_v59 = vadd.f32 1e-05, %v1181_v53 }
 0x1b5   : > { %3230 = vrsqrt.f32 %v1197_v59 }
 0x1b6   : > { %3232 = vrsqrt.f32 %v1198_v62  ;;  %v3229_v60 = vpop.eup %3228 }
 0x1b7   : > { %v1155_v40 = vpop.xlane.xlu1 %1154  ;;  %v1228_v7 = vmul.f32 %v3229_v60, %v4446_v37 }
 0x1b8   : > { %v1183_v6 = vmul.f32 0.0078125, %v1155_v40 }
 0x1b9   : > { %v1250_v19 = vmul.f32 %v4574_v56, %v1228_v7 }
 0x1ba   : > { %v1199_v54 = vadd.f32 1e-05, %v1183_v6 }
 0x1bb   : > { %v1272_v18 = vadd.f32 %v4581_v45, %v1250_v19 }
 0x1bc   : > { %3234 = vrsqrt.f32 %v1199_v54 }
 0x1bd   : > { %v1157_v34 = vpop.xlane.xlu0 %1156 }
 0x1be   : > { %v1184_v14 = vmul.f32 0.0078125, %v1157_v34 }
 0x1c0   : > { %v1200_v21 = vadd.f32 1e-05, %v1184_v14 }
 0x1c2   : > { %v3231_v55 = vpop.eup %3230  ;;  %3236 = vrsqrt.f32 %v1200_v21 }
 0x1c3   : > { %v1229_v43 = vmul.f32 %v3231_v55, %v4456_v32  ;;  %v3233_v46 = vpop.eup %3232 }
 0x1c4   : > { %v1159_v25 = vpop.xlane.xlu1 %1158  ;;  %v1230_v26 = vmul.f32 %v3233_v46, %v4451_v27 }
 0x1c5   : > { %v1185_v37 = vmul.f32 0.0078125, %v1159_v25  ;;  %v1251_v15 = vmul.f32 %v4574_v56, %v1229_v43 }
 0x1c6   : > { %v1252_v47 = vmul.f32 %v4574_v56, %v1230_v26 }
 0x1c7   : > { %v1201_v63 = vadd.f32 1e-05, %v1185_v37  ;;  %v1273_v52 = vadd.f32 %v4581_v45, %v1251_v15 }
 0x1c8   : > { %v1274_v27 = vadd.f32 %v4581_v45, %v1252_v47 }
 0x1c9   : > { %v3235_v32 = vpop.eup %3234  ;;  %3238 = vrsqrt.f32 %v1201_v63  ;;  %v1288_v41 = vpack.c.bf16 %v1273_v52, %v1272_v18 }
 0x1ca   : > { %v1231_v57 = vmul.f32 %v3235_v32, %v4467_v49 }
 0x1cb   : > { %v1161_v58 = vpop.xlane.xlu0 %1160  ;;  %1437 = vmatmul.mubr.bf16.vlgmr.msra.gmra.mxu0 %v1288_v41 }
 0x1cc   : > { %v1186_v24 = vmul.f32 0.0078125, %v1161_v58  ;;  %v1253_v5 = vmul.f32 %v4574_v56, %v1231_v57  ;;  %1446 = vmatprep.mubr.bf16.mxu0 %v3573_v23 }
 0x1ce   : > { %v1202_v48 = vadd.f32 1e-05, %v1186_v24  ;;  %v1275_v61 = vadd.f32 %v4581_v45, %v1253_v5 }
 0x1cf   : > { %v3237_v39 = vpop.eup %3236 }
 0x1d0   : > { %3240 = vrsqrt.f32 %v1202_v48  ;;  %v1289_v53 = vpack.c.bf16 %v1275_v61, %v1274_v27  ;;  %v1232_v59 = vmul.f32 %v3237_v39, %v4472_v16 }
 0x1d1   : > { %v1163_v22 = vpop.xlane.xlu1 %1162 }
 0x1d2   : > { %v1187_v44 = vmul.f32 0.0078125, %v1163_v22  ;;  %v1254_v54 = vmul.f32 %v4574_v56, %v1232_v59 }
 0x1d3   : > { %1447 = vmatmul.mubr.bf16.gmra.mxu0 %v1289_v53 }
 0x1d4   : > { %v1203_v49 = vadd.f32 1e-05, %v1187_v44  ;;  %1456 = vmatprep.mubr.bf16.mxu0 %v3573_v23  ;;  %v1276_v7 = vadd.f32 %v4581_v45, %v1254_v54 }
 0x1d6   : > { %3242 = vrsqrt.f32 %v1203_v49  ;;  %v3239_v62 = vpop.eup %3238 }
 0x1d7   : > { %v1165_v40 = vpop.xlane.xlu0 %1164  ;;  %v1233_v6 = vmul.f32 %v3239_v62, %v4483_v42 }
 0x1d8   : > { %v1188_v60 = vmul.f32 0.0078125, %v1165_v40 }
 0x1d9   : > { %v1255_v34 = vmul.f32 %v4574_v56, %v1233_v6 }
 0x1da   : > { %v1204_v14 = vadd.f32 1e-05, %v1188_v60 }
 0x1db   : > { %v1277_v21 = vadd.f32 %v4581_v45, %v1255_v34 }
 0x1dc   : > { %3244 = vrsqrt.f32 %v1204_v14 }
 0x1dd   : > { %v3241_v55 = vpop.eup %3240  ;;  %v1290_v16 = vpack.c.bf16 %v1277_v21, %v1276_v7 }
 0x1de   : > { %v1167_v43 = vpop.xlane.xlu1 %1166  ;;  %v1234_v46 = vmul.f32 %v3241_v55, %v4488_v2 }
 0x1df   : > { %v1189_v19 = vmul.f32 0.0078125, %v1167_v43  ;;  %1457 = vmatmul.mubr.bf16.gmra.mxu0 %v1290_v16 }
 0x1e0   : > { %1466 = vmatprep.mubr.bf16.mxu0 %v3573_v23  ;;  %v1256_v15 = vmul.f32 %v4574_v56, %v1234_v46 }
 0x1e1   : > { %v1205_v42 = vadd.f32 1e-05, %v1189_v19 }
 0x1e2   : > { %v1278_v32 = vadd.f32 %v4581_v45, %v1256_v15 }
 0x1e3   : > { %v3243_v25 = vpop.eup %3242  ;;  %3246 = vrsqrt.f32 %v1205_v42 }
 0x1e4   : > { %v1235_v37 = vmul.f32 %v3243_v25, %v4499_v28 }
 0x1e5   : > { %v1169_v63 = vpop.xlane.xlu0 %1168 }
 0x1e6   : > { %v1190_v18 = vmul.f32 0.0078125, %v1169_v63  ;;  %v1257_v52 = vmul.f32 %v4574_v56, %v1235_v37 }
 0x1e8   : > { %v1206_v26 = vadd.f32 1e-05, %v1190_v18  ;;  %v1279_v41 = vadd.f32 %v4581_v45, %v1257_v52 }
 0x1e9   : > { %v3245_v57 = vpop.eup %3244 }
 0x1ea   : > { %3248 = vrsqrt.f32 %v1206_v26  ;;  %v1291_v2 = vpack.c.bf16 %v1279_v41, %v1278_v32  ;;  %v1236_v47 = vmul.f32 %v3245_v57, %v4504_v30 }
 0x1eb   : > { %v1171_v58 = vpop.xlane.xlu1 %1170 }
 0x1ec   : > { %v1191_v24 = vmul.f32 0.0078125, %v1171_v58  ;;  %1467 = vmatmul.mubr.bf16.gmra.mxu0 %v1291_v2  ;;  %v1258_v27 = vmul.f32 %v4574_v56, %v1236_v47 }
 0x1ed   : > { %1476 = vmatprep.mubr.bf16.mxu0 %v3573_v23 }
 0x1ee   : > { %v1207_v28 = vadd.f32 1e-05, %v1191_v24  ;;  %v1280_v53 = vadd.f32 %v4581_v45, %v1258_v27  ;;  %v3220_v27 = vld [vmem:[%s5956_s9 + $0x58] sm:$0xff]  }
 0x1f0   : > { %3250 = vrsqrt.f32 %v1207_v28  ;;  %v3247_v5 = vpop.eup %3246 }
 0x1f1   : > { %v1173_v48 = vpop.xlane.xlu0 %1172  ;;  %v1237_v61 = vmul.f32 %v3247_v5, %v4515_v9  ;;  %v3212_v5 = vld [vmem:[%s5956_s9 + $0x78] sm:$0xff]  }
 0x1f2   : > { %v1192_v39 = vmul.f32 0.0078125, %v1173_v48  ;;  %3017 = vmatprep.subr.bf16.mxu1 %v3212_v5  ;;  %v3218_v48 = vld [vmem:[%s5956_s9 + $0x60] sm:$0xff]  }
 0x1f3   : > { %v1259_v22 = vmul.f32 %v4574_v56, %v1237_v61  ;;  %v3219_v61 = vld [vmem:[%s5956_s9 + $0x20] sm:$0xff]  }
 0x1f4   : > { %v1208_v44 = vadd.f32 1e-05, %v1192_v39  ;;  %v3221_v39 = vld [vmem:[%s5956_s9 + $0x18] sm:$0xff]   ;;  %v3226_v5 = vld [vmem:[%s5956_s9 + $0x40] sm:$0xff]  }
 0x1f5   : > { %v1281_v49 = vadd.f32 %v4581_v45, %v1259_v22 }
 0x1f6   : > { %3252 = vrsqrt.f32 %v1208_v44  ;;  %v1312_v44 = vld [vmem:[%s5957_s6] sm:$0x3]  ;;  %s2968_s6 = sshll.u32 %s538_s28, 5  ;;  %s2809_s28 = sadd.s32 %s3009_s18, %s5212_s21 }
 0x1f7   : > { %v3249_v59 = vpop.eup %3248  ;;  %v1292_v62 = vpack.c.bf16 %v1281_v49, %v1280_v53  ;;  %v3222_v49 = vld [vmem:[%s5956_s9 + $0x50] sm:$0xff]   ;;  %s542_s27 = sadd.s32 %s2968_s6, %s540_s29  ;;  %s3010_s20 = sshll.u32 %s2809_s28, 7 }
 0x1f8   : > { %v1175_v40 = vpop.xlane.xlu1 %1174  ;;  %v1238_v6 = vmul.f32 %v3249_v59, %v4520_v20  ;;  %v5958_v59 = vsub.s32 0, %v3835_v1  ;;  %s2969_s14 = sshll.u32 %s542_s27, 3  ;;  %s2812_s29 = sshll.u32 %s5712_s8, 4  ;;  %s5778_s29 = int_to_ptr.vmem [resolvable:$true] %s2812_s29 }
 0x1f9   : > { %v1193_v30 = vmul.f32 0.0078125, %v1175_v40  ;;  %1477 = vmatmul.mubr.bf16.gmra.mxu0 %v1292_v62  ;;  %v3223_v40 = vld [vmem:[%s5956_s9 + $0x10] sm:$0xff]   ;;  %s5264_s0 = scalar_lea.vmem %s6002_s17, %s2969_s14  ;;  %s6077_s27 = sld [smem:[#allocation81_spill]] }
 0x1fa   : > { %1486 = vmatprep.mubr.bf16.mxu0 %v3573_v23  ;;  %v1260_v34 = vmul.f32 %v4574_v56, %v1238_v6  ;;  %v4673_v62 = vrot.slane %v1312_v44, %v5958_v59  ;;  %s3441_s17 = scalar_lea.vmem %s5778_s29, 2048 }
 0x1fb   : > { %v1209_v9 = vadd.f32 1e-05, %v1193_v30  ;;  %p3442_p0 = scmp.ne.s32.totalorder %s5778_s29, %s3441_s17 }
 0x1fc   : > { %v1282_v16 = vadd.f32 %v4581_v45, %v1260_v34 }
 0x1fd   : > { %v3251_v54 = vpop.eup %3250  ;;  %3254 = vrsqrt.f32 %v1209_v9  ;;  %p3443_p9 = pnand %p3442_p0, %p3774_p4 }
 0x1fe   : > { %v1239_v60 = vmul.f32 %v3251_v54, %v4531_v8  ;;  %v1177_v14 = vpop.xlane.xlu0 %1176 }
 0x1ff   : > { %v1194_v7 = vmul.f32 0.0078125, %v1177_v14  ;;  %v3224_v14 = vld [vmem:[%s5956_s9 + $0x48] sm:$0xff]   ;;  %s6078_s14 = smov %s6077_s27  ;;  %s5774_s15 = scalar_lea.hbm %s6077_s27, %s3010_s20 }
 0x200   : > { %v1261_v21 = vmul.f32 %v4574_v56, %v1239_v60  ;;  %p3444_p2 = pneg %p3443_p9 }
 0x201   : > { %v1210_v55 = vadd.f32 1e-05, %v1194_v7 }
 0x202   : > { %v1283_v43 = vadd.f32 %v4581_v45, %v1261_v21 }
 0x203   : > { %3256 = vrsqrt.f32 %v1210_v55  ;;  %v3253_v19 = vpop.eup %3252  ;;  %v3225_v55 = vld [vmem:[%s5956_s9 + $0x8] sm:$0xff]  }
 0x204   : > { %v1293_v20 = vpack.c.bf16 %v1283_v43, %v1282_v16  ;;  %v1179_v46 = vpop.xlane.xlu1 %1178  ;;  %v1240_v25 = vmul.f32 %v3253_v19, %v4536_v36  ;;  %v5959_v16 = vsub.s32 1, %v3835_v1 }
 0x205   : > { %v1195_v42 = vmul.f32 0.0078125, %v1179_v46 }
 0x206   : > { %1487 = vmatmul.mubr.bf16.gmra.mxu0 %v1293_v20  ;;  %v1262_v63 = vmul.f32 %v4574_v56, %v1240_v25  ;;  %v4696_v43 = vrot.slane %v1312_v44, %v5959_v16 }
 0x207   : > { %1496 = vmatprep.mubr.bf16.mxu0 %v3573_v23  ;;  %v1211_v8 = vadd.f32 1e-05, %v1195_v42 }
 0x208   : > { %v1284_v52 = vadd.f32 %v4581_v45, %v1262_v63 }
 0x209   : > { %3258 = vrsqrt.f32 %v1211_v8 }
 0x20a   : > { %v3255_v37 = vpop.eup %3254 }
 0x20b   : > { %v1241_v15 = vmul.f32 %v3255_v37, %v4547_v11 }
 0x20d   : > { %v1263_v18 = vmul.f32 %v4574_v56, %v1241_v15 }
 0x20f   : > { %v1285_v26 = vadd.f32 %v4581_v45, %v1263_v18 }
 0x210   : > { %v3257_v32 = vpop.eup %3256 }
 0x211   : > { %v1294_v41 = vpack.c.bf16 %v1285_v26, %v1284_v52  ;;  %v1242_v2 = vmul.f32 %v3257_v32, %v4552_v3  ;;  %v3213_v3 = vld [vmem:[%s5956_s9 + $0x38] sm:$0xff]  }
 0x212   : > { %3018 = vmatpush3.bf16.msra.mxu1 %v3213_v3 }
 0x213   : > { %1497 = vmatmul.mubr.bf16.gmra.mxu0 %v1294_v41  ;;  %v1264_v11 = vmul.f32 %v4574_v56, %v1242_v2 }
 0x214   : > { %1506 = vmatprep.mubr.bf16.mxu0 %v3573_v23  ;;  %v3215_v23 = vld [vmem:[%s5956_s9 + $0x30] sm:$0xff]  }
 0x215   : > { %v1286_v24 = vadd.f32 %v4581_v45, %v1264_v11 }
 0x216   : > { %v3259_v36 = vpop.eup %3258 }
 0x217   : > { %v1243_v57 = vmul.f32 %v3259_v36, %v4563_v38  ;;  %v3214_v38 = vld [vmem:[%s5956_s9 + $0x70] sm:$0xff]  }
 0x218   : > { %3019 = vmatprep.subr.bf16.mxu1 %v3214_v38 }
 0x219   : > { %v1265_v58 = vmul.f32 %v4574_v56, %v1243_v57  ;;  %3020 = vmatpush3.bf16.msra.mxu1 %v3215_v23  ;;  %v3216_v56 = vld [vmem:[%s5956_s9 + $0x68] sm:$0xff]   ;;  %v3227_v23 = vld [vmem:[%s5956_s9] sm:$0xff]  }
 0x21a   : > { %3021 = vmatprep.subr.bf16.mxu1 %v3216_v56 }
 0x21b   : > { %v1287_v28 = vadd.f32 %v4581_v45, %v1265_v58  ;;  %v3217_v45 = vld [vmem:[%s5956_s9 + $0x28] sm:$0xff]  }
 0x21d   : > { %v1295_v47 = vpack.c.bf16 %v1287_v28, %v1286_v24  ;;  %3022 = vmatpush3.bf16.msra.mxu1 %v3217_v45 }
 0x21e   : > { %3023 = vmatprep.subr.bf16.mxu1 %v3218_v48 }
 0x21f   : > { %1507 = vmatmul.mubr.bf16.gmra.mxu0 %v1295_v47 }
 0x221   : > { %3024 = vmatpush3.bf16.msra.mxu1 %v3219_v61 }
 0x222   : > { %3025 = vmatprep.subr.bf16.mxu1 %v3220_v27 }
 0x225   : > { %3026 = vmatpush3.bf16.msra.mxu1 %v3221_v39 }
 0x226   : > { %3027 = vmatprep.subr.bf16.mxu1 %v3222_v49 }
 0x229   : > { %3028 = vmatpush3.bf16.msra.mxu1 %v3223_v40 }
 0x22a   : > { %3029 = vmatprep.subr.bf16.mxu1 %v3224_v14 }
 0x22d   : > { %3030 = vmatpush3.bf16.msra.mxu1 %v3225_v55 }
 0x22e   : > { %3031 = vmatprep.subr.bf16.mxu1 %v3226_v5 }
 0x231   : > { %3032 = vmatpush3.bf16.msra.mxu1 %v3227_v23 }
 0x28b   : > { %v1438_v22 = vpop.f32.mrf.mxu0 }
 0x28c   : > { %v4679_v6 = vadd.f32 %v1438_v22, %v4673_v62 }
 0x28d   : > { %v1440_v53 = vpop.f32.mrf.mxu0 }
 0x28e   : > { %v4682_v54 = vmul.f32 0.70710677, %v4679_v6  ;;  %v1441_v57 = vadd.f32 %v1440_v53, %v4696_v43 }
 0x28f   : > { %v1442_v30 = vpop.f32.mrf.mxu0 }
 0x290   : > { %v1645_v34 = vand.u32 2147483647, %v4682_v54  ;;  %v4689_v7 = vadd.f32 %v1442_v30, %v4673_v62  ;;  %v1550_v48 = vmul.f32 0.70710677, %v1441_v57  ;;  %vm1581_vm6 = vcmp.ge.f32.partialorder %v4682_v54, 0.0 }
 0x291   : > { %v1444_v9 = vpop.f32.mrf.mxu0 }
 0x292   : > { %v1677_v20 = vmul.f32 0.3275911, %v1645_v34  ;;  %v4699_v19 = vmul.f32 0.70710677, %v4689_v7  ;;  %v4751_v56 = vadd.f32 %v1444_v9, %v4696_v43  ;;  %v2093_v53 = vsub.f32 0.0, %v1645_v34 }
 0x293   : > { %v1448_v60 = vpop.f32.mrf.mxu0  ;;  %v1646_v30 = vand.u32 2147483647, %v1550_v48  ;;  %vm1582_vm7 = vcmp.ge.f32.partialorder %v1550_v48, 0.0 }
 0x294   : > { %v4702_v46 = vadd.f32 %v1448_v60, %v4673_v62  ;;  %v1709_v25 = vadd.f32 1.0, %v1677_v20  ;;  %v4708_v37 = vand.u32 2147483647, %v4699_v19  ;;  %v4764_v49 = vmul.f32 0.70710677, %v4751_v56 }
 0x295   : > { %v1450_v21 = vpop.f32.mrf.mxu0  ;;  %v2125_v55 = vmul.f32 %v2093_v53, %v1645_v34  ;;  %vm1583_vm8 = vcmp.ge.f32.partialorder %v4699_v19, 0.0  ;;  %v4820_v48 = vmul.f32 0.5, %v4751_v56 }
 0x296   : > { %v4705_v42 = vadd.f32 %v1450_v21, %v4696_v43  ;;  %v4711_v1 = vmul.f32 0.70710677, %v4702_v46  ;;  %3260 = vrcp.f32 %v1709_v25  ;;  %v1679_v52 = vmul.f32 0.3275911, %v4708_v37  ;;  %5960 = vst [vmem:[#allocation38_spill] sm:$0xff] %v4764_v49 }
 0x297   : > { %v1452_v8 = vpop.f32.mrf.mxu0  ;;  %v1648_v20 = vand.u32 2147483647, %v4764_v49  ;;  %v2094_v25 = vsub.f32 0.0, %v1646_v30  ;;  %v2157_v34 = vmul.f32 1.442695, %v2125_v55  ;;  %5963 = vst [vmem:[#allocation41_spill] sm:$0xff] %v4820_v48 }
 0x298   : > { %v4714_v15 = vmul.f32 0.70710677, %v4705_v42  ;;  %v4717_v18 = vadd.f32 %v1452_v8, %v4673_v62  ;;  %v4721_v26 = vand.u32 2147483647, %v4711_v1  ;;  %v1711_v11 = vadd.f32 1.0, %v1679_v52 }
 0x299   : > { %v1454_v63 = vpop.f32.mrf.mxu0  ;;  %v2096_v5 = vsub.f32 0.0, %v1648_v20  ;;  %vm1585_vm9 = vcmp.ge.f32.partialorder %v4711_v1, 0.0 }
 0x29a   : > { %v4724_v32 = vand.u32 2147483647, %v4714_v15  ;;  %v4727_v2 = vmul.f32 0.70710677, %v4717_v18  ;;  %v4730_v36 = vadd.f32 %v1454_v63, %v4696_v43  ;;  %v1681_v58 = vmul.f32 0.3275911, %v4721_v26 }
 0x29b   : > { %3262 = vrcp.f32 %v1711_v11  ;;  %vm1586_vm10 = vcmp.ge.f32.partialorder %v4714_v15, 0.0  ;;  %v4865_v31 = vmul.f32 0.5, %v4717_v18 }
 0x29c   : > { %v1682_v24 = vmul.f32 0.3275911, %v4724_v32  ;;  %v4742_v3 = vand.u32 2147483647, %v4727_v2  ;;  %v4745_v38 = vmul.f32 0.70710677, %v4730_v36 }
 0x29d   : > { %v1713_v61 = vadd.f32 1.0, %v1681_v58  ;;  %v4785_v58 = vmul.f32 0.5, %v4679_v6  ;;  %v5871_v6 = vmov -1.0   ;;  %vm1587_vm11 = vcmp.ge.f32.partialorder %v4727_v2, 0.0 }
 0x29e   : > { %v1714_v39 = vadd.f32 1.0, %v1682_v24  ;;  %v1683_v22 = vmul.f32 0.3275911, %v4742_v3  ;;  %v4761_v44 = vand.u32 2147483647, %v4745_v38  ;;  %v2095_v24 = vsub.f32 0.0, %v4708_v37 }
 0x29f   : > { %v1458_v41 = vpop.f32.mrf.mxu0  ;;  %3264 = vrcp.f32 %v1713_v61  ;;  %v4790_v61 = vmul.f32 0.5, %v1441_v57  ;;  %v4798_v54 = vsel %vm1581_vm6, 1.0, %v5871_v6  ;;  %vm1588_vm12 = vcmp.ge.f32.partialorder %v4745_v38, 0.0 }
 0x2a0   : > { %v4736_v28 = vadd.f32 %v1458_v41, %v4673_v62  ;;  %3266 = vrcp.f32 %v1714_v39  ;;  %v1715_v60 = vadd.f32 1.0, %v1683_v22  ;;  %v1684_v14 = vmul.f32 0.3275911, %v4761_v44 }
 0x2a1   : > { %v1460_v47 = vpop.f32.mrf.mxu0  ;;  %v1678_v41 = vmul.f32 0.3275911, %v1646_v30  ;;  %5961 = vst [vmem:[#allocation39_spill] sm:$0xff] %v4790_v61  ;;  %v2126_v39 = vmul.f32 %v2094_v25, %v1646_v30  ;;  %v2127_v57 = vmul.f32 %v2095_v24, %v4708_v37  ;;  %v1680_v30 = vmul.f32 0.3275911, %v1648_v20 }
 0x2a2   : > { %v4754_v45 = vadd.f32 %v1460_v47, %v4696_v43  ;;  %v4757_v27 = vmul.f32 0.70710677, %v4736_v28  ;;  %3268 = vrcp.f32 %v1715_v60  ;;  %v1716_v11 = vadd.f32 1.0, %v1684_v14 }
 0x2a3   : > { %v4769_v40 = vpop.eup %3260  ;;  %v1462_v21 = vpop.f32.mrf.mxu0  ;;  %v1710_v14 = vadd.f32 1.0, %v1678_v41  ;;  %v2159_v41 = vmul.f32 1.442695, %v2126_v39  ;;  %v4817_v37 = vsel %vm1583_vm8, 1.0, %v5871_v6  ;;  %v2161_v24 = vmul.f32 1.442695, %v2127_v57 }
 0x2a4   : > { %v4767_v59 = vmul.f32 0.70710677, %v4754_v45  ;;  %v4772_v9 = vand.u32 2147483647, %v4757_v27  ;;  %v1805_v16 = vmul.f32 1.0614054, %v4769_v40  ;;  %v4782_v52 = vadd.f32 %v1462_v21, %v4673_v62 }
 0x2a5   : > { %v4801_v21 = vmul.f32 0.5, %v4689_v7  ;;  %3270 = vrcp.f32 %v1716_v11  ;;  %v1464_v55 = vpop.f32.mrf.mxu0  ;;  %vm1589_vm13 = vcmp.ge.f32.partialorder %v4757_v27, 0.0  ;;  %v4902_v33 = vmul.f32 0.5, %v4736_v28 }
 0x2a6   : > { %v4778_v8 = vand.u32 2147483647, %v4767_v59  ;;  %v1685_v63 = vmul.f32 0.3275911, %v4772_v9  ;;  %v1837_v47 = vadd.f32 -1.4531521, %v1805_v16  ;;  %3272 = vpow2.f32 %v2157_v34 }
 0x2a7   : > { %v4793_v53 = vmul.f32 0.70710677, %v4782_v52  ;;  %v4807_v16 = vsel %vm1582_vm7, 1.0, %v5871_v6  ;;  %v4823_v34 = vadd.f32 %v1464_v55, %v4696_v43  ;;  %v4833_v6 = vmul.f32 0.5, %v4702_v46  ;;  %5968 = vst [vmem:[#allocation45_spill] sm:$0xff] %v4902_v33 }
 0x2a8   : > { %v1686_v23 = vmul.f32 0.3275911, %v4778_v8  ;;  %v1717_v22 = vadd.f32 1.0, %v1685_v63  ;;  %v4795_v60 = vpop.eup %3262  ;;  %5962 = vst [vmem:[#allocation40_spill] sm:$0xff] %v4807_v16  ;;  %v1869_v25 = vmul.f32 %v4769_v40, %v1837_v47  ;;  %v2128_v63 = vmul.f32 %v2096_v5, %v1648_v20 }
 0x2a9   : > { %v1807_v7 = vmul.f32 1.0614054, %v4795_v60  ;;  %v4812_v11 = vand.u32 2147483647, %v4793_v53  ;;  %v1712_v47 = vadd.f32 1.0, %v1680_v30  ;;  %v2097_v5 = vsub.f32 0.0, %v4721_v26 }
 0x2aa   : > { %v1718_v12 = vadd.f32 1.0, %v1686_v23  ;;  %3274 = vrcp.f32 %v1717_v22  ;;  %v1901_v23 = vadd.f32 1.4214138, %v1869_v25  ;;  %v2163_v39 = vmul.f32 1.442695, %v2128_v63 }
 0x2ab   : > { %3276 = vrcp.f32 %v1710_v14  ;;  %v2098_v22 = vsub.f32 0.0, %v4724_v32  ;;  %v1839_v14 = vadd.f32 -1.4531521, %v1807_v7  ;;  %v1687_v55 = vmul.f32 0.3275911, %v4812_v11 }
 0x2ac   : > { %v4814_v19 = vpop.eup %3264  ;;  %3278 = vrcp.f32 %v1718_v12  ;;  %v4838_v30 = vmul.f32 0.70710677, %v4823_v34  ;;  %v2129_v12 = vmul.f32 %v2097_v5, %v4721_v26  ;;  %v4844_v63 = vmul.f32 0.5, %v4705_v42  ;;  %v1468_v18 = vpop.f32.mrf.mxu0 }
 0x2ad   : > { %v4825_v20 = vpop.eup %3266  ;;  %3280 = vpow2.f32 %v2159_v41  ;;  %v1809_v56 = vmul.f32 1.0614054, %v4814_v19  ;;  %v2099_v41 = vsub.f32 0.0, %v4742_v3  ;;  %v1933_v46 = vmul.f32 %v4769_v40, %v1901_v23 }
 0x2ae   : > { %v1810_v57 = vmul.f32 1.0614054, %v4825_v20  ;;  %3282 = vpow2.f32 %v2161_v24  ;;  %v5964_v7 = vmov -1.0   ;;  %v2130_v35 = vmul.f32 %v2098_v22, %v4724_v32 }
 0x2af   : > { %v4840_v25 = vpop.eup %3268  ;;  %3284 = vrcp.f32 %v1712_v47  ;;  %v4851_v15 = vsel %vm1585_vm9, 1.0, %v5964_v7  ;;  %v1871_v50 = vmul.f32 %v4795_v60, %v1839_v14  ;;  %v1841_v24 = vadd.f32 -1.4531521, %v1809_v56 }
 0x2b0   : > { %v4856_v26 = vsel %vm1586_vm10, 1.0, %v5964_v7  ;;  %v1719_v42 = vadd.f32 1.0, %v1687_v55  ;;  %3286 = vpow2.f32 %v2163_v39  ;;  %v1842_v5 = vadd.f32 -1.4531521, %v1810_v57 }
 0x2b1   : > { %v1811_v13 = vmul.f32 1.0614054, %v4840_v25  ;;  %v4860_v47 = vand.u32 2147483647, %v4838_v30  ;;  %v2165_v1 = vmul.f32 1.442695, %v2129_v12  ;;  %v2131_v32 = vmul.f32 %v2099_v41, %v4742_v3 }
 0x2b2   : > { %v4862_v23 = vpop.eup %3270  ;;  %v2100_v22 = vsub.f32 0.0, %v4761_v44  ;;  %v1965_v14 = vadd.f32 -0.28449672, %v1933_v46  ;;  %v2167_v56 = vmul.f32 1.442695, %v2130_v35  ;;  %v4871_v39 = vmul.f32 0.5, %v4730_v36 }
 0x2b3   : > { %v4873_v55 = vpop.eup %3272  ;;  %v1903_v57 = vadd.f32 1.4214138, %v1871_v50  ;;  %v1873_v51 = vmul.f32 %v4814_v19, %v1841_v24  ;;  %3288 = vrcp.f32 %v1719_v42  ;;  %v1874_v3 = vmul.f32 %v4825_v20, %v1842_v5 }
 0x2b4   : > { %5965 = vst [vmem:[#allocation42_spill] sm:$0xff] %v4871_v39  ;;  %v1843_v41 = vadd.f32 -1.4531521, %v1811_v13  ;;  %v1812_v35 = vmul.f32 1.0614054, %v4862_v23  ;;  %3290 = vpow2.f32 %v2165_v1  ;;  %v4885_v50 = vsel %vm1587_vm11, 1.0, %v5964_v7 }
 0x2b5   : > { %v1688_v2 = vmul.f32 0.3275911, %v4860_v47  ;;  %v2169_v46 = vmul.f32 1.442695, %v2131_v32  ;;  %v2132_v38 = vmul.f32 %v2100_v22, %v4761_v44  ;;  %v1997_v24 = vmul.f32 %v4769_v40, %v1965_v14  ;;  %v1470_v32 = vpop.f32.mrf.mxu0 }
 0x2b6   : > { %3292 = vpow2.f32 %v2167_v56  ;;  %v4890_v42 = vsel %vm1588_vm12, 1.0, %v5964_v7  ;;  %v1935_v5 = vmul.f32 %v4795_v60, %v1903_v57  ;;  %v1905_v10 = vadd.f32 1.4214138, %v1873_v51 }
 0x2b7   : > { %v4877_v12 = vpop.eup %3274  ;;  %v2101_v17 = vsub.f32 0.0, %v4772_v9  ;;  %v1906_v44 = vadd.f32 1.4214138, %v1874_v3  ;;  %v1875_v22 = vmul.f32 %v4840_v25, %v1843_v41  ;;  %v1844_v14 = vadd.f32 -1.4531521, %v1812_v35 }
 0x2b8   : > { %v4882_v36 = vpop.eup %3276  ;;  %v1813_v1 = vmul.f32 1.0614054, %v4877_v12  ;;  %v1720_v56 = vadd.f32 1.0, %v1688_v2  ;;  %3294 = vpow2.f32 %v2169_v46  ;;  %v2171_v0 = vmul.f32 1.442695, %v2132_v38 }
 0x2b9   : > { %5966 = vst [vmem:[#allocation43_spill] sm:$0xff] %v4882_v36  ;;  %v4893_v13 = vpop.eup %3278  ;;  %v4905_v57 = vadd.f32 %v1468_v18, %v4673_v62  ;;  %v2029_v29 = vadd.f32 0.2548296, %v1997_v24  ;;  %v4912_v48 = vsel %vm1589_vm13, 1.0, %v5964_v7  ;;  %v4916_v41 = vadd.f32 %v1470_v32, %v4696_v43 }
 0x2ba   : > { %v4898_v4 = vpop.eup %3280  ;;  %v1814_v3 = vmul.f32 1.0614054, %v4893_v13  ;;  %v1967_v28 = vadd.f32 -0.28449672, %v1935_v5  ;;  %v1937_v2 = vmul.f32 %v4814_v19, %v1905_v10  ;;  %v1845_v18 = vadd.f32 -1.4531521, %v1813_v1  ;;  %v1472_v10 = vpop.f32.mrf.mxu0 }
 0x2bb   : > { %5967 = vst [vmem:[#allocation44_spill] sm:$0xff] %v4898_v4  ;;  %v4907_v51 = vpop.eup %3282  ;;  %v2133_v46 = vmul.f32 %v2101_v17, %v4772_v9  ;;  %v1938_v38 = vmul.f32 %v4825_v20, %v1906_v44  ;;  %v1907_v24 = vadd.f32 1.4214138, %v1875_v22  ;;  %v1876_v27 = vmul.f32 %v4862_v23, %v1844_v14 }
 0x2bc   : > { %v4918_v35 = vpop.eup %3284  ;;  %3296 = vrcp.f32 %v1720_v56  ;;  %v4927_v32 = vmul.f32 0.5, %v4754_v45  ;;  %v2102_v16 = vsub.f32 0.0, %v4778_v8  ;;  %v4931_v5 = vmul.f32 0.70710677, %v4905_v57 }
 0x2bd   : > { %5969 = vst [vmem:[#allocation46_spill] sm:$0xff] %v4918_v35  ;;  %v4924_v61 = vpop.eup %3286  ;;  %3298 = vpow2.f32 %v2171_v0  ;;  %v2061_v17 = vmul.f32 %v4769_v40, %v2029_v29  ;;  %vm1590_vm14 = vcmp.ge.f32.partialorder %v4767_v59, 0.0  ;;  %v1846_v9 = vadd.f32 -1.4531521, %v1814_v3 }
 0x2be   : > { %5970 = vst [vmem:[#allocation47_spill] sm:$0xff] %v4924_v61  ;;  %5971 = vst [vmem:[#allocation48_spill] sm:$0xff] %v4927_v32  ;;  %v4936_v1 = vmul.f32 0.70710677, %v4916_v41  ;;  %v1999_v44 = vmul.f32 %v4795_v60, %v1967_v28  ;;  %v1969_v0 = vadd.f32 -0.28449672, %v1937_v2  ;;  %v1877_v45 = vmul.f32 %v4877_v12, %v1845_v18 }
 0x2bf   : > { %v4941_v22 = vmul.f32 0.5, %v4782_v52  ;;  %v1970_v56 = vadd.f32 -0.28449672, %v1938_v38  ;;  %v1939_v61 = vmul.f32 %v4840_v25, %v1907_v24  ;;  %v1908_v29 = vadd.f32 1.4214138, %v1876_v27  ;;  %v1474_v52 = vpop.f32.mrf.mxu0 }
 0x2c0   : > { %v4943_v14 = vpop.eup %3288  ;;  %v2173_v40 = vmul.f32 1.442695, %v2133_v46  ;;  %v4947_v59 = vsel %vm1590_vm14, 1.0, %v5964_v7  ;;  %v2134_v3 = vmul.f32 %v2102_v16, %v4778_v8  ;;  %v4951_v28 = vand.u32 2147483647, %v4931_v5 }
 0x2c1   : > { %5972 = vst [vmem:[#allocation49_spill] sm:$0xff] %v4941_v22  ;;  %5973 = vst [vmem:[#allocation50_spill] sm:$0xff] %v4947_v59  ;;  %v4954_v2 = vadd.f32 %v1472_v10, %v4673_v62  ;;  %v3291_v18 = vpop.eup %3290  ;;  %v2221_v4 = vmul.f32 %v4873_v55, %v2061_v17  ;;  %v1878_v38 = vmul.f32 %v4893_v13, %v1846_v9  ;;  %vm1591_vm15 = vcmp.ge.f32.partialorder %v4793_v53, 0.0 }
 0x2c2   : > { %v4960_v46 = vand.u32 2147483647, %v4936_v1  ;;  %v2031_v27 = vadd.f32 0.2548296, %v1999_v44  ;;  %v2001_v8 = vmul.f32 %v4814_v19, %v1969_v0  ;;  %v1909_v16 = vadd.f32 1.4214138, %v1877_v45  ;;  %v1478_v44 = vpop.f32.mrf.mxu0 }
 0x2c3   : > { %5974 = vst [vmem:[#allocation51_spill] sm:$0xff] %v4954_v2  ;;  %v3293_v24 = vpop.eup %3292  ;;  %v1815_v49 = vmul.f32 1.0614054, %v4943_v14  ;;  %v2002_v10 = vmul.f32 %v4825_v20, %v1970_v56  ;;  %v1971_v35 = vadd.f32 -0.28449672, %v1939_v61  ;;  %v1940_v36 = vmul.f32 %v4862_v23, %v1908_v29 }
 0x2c4   : > { %3300 = vpow2.f32 %v2173_v40  ;;  %v2175_v55 = vmul.f32 1.442695, %v2134_v3  ;;  %v1689_v17 = vmul.f32 0.3275911, %v4951_v28  ;;  %v4968_v9 = vmul.f32 0.70710677, %v4954_v2 }
 0x2c5   : > { %v4971_v22 = vadd.f32 %v1474_v52, %v4696_v43  ;;  %v3295_v0 = vpop.eup %3294  ;;  %v2253_v45 = vsub.f32 1.0, %v2221_v4  ;;  %v1910_v32 = vadd.f32 1.4214138, %v1878_v38  ;;  %v4976_v61 = vsel %vm1591_vm15, 1.0, %v5964_v7 }
 0x2c6   : > { %5975 = vst [vmem:[#allocation52_spill] sm:$0xff] %v4968_v9  ;;  %5977 = vst [vmem:[#allocation54_spill] sm:$0xff] %v4976_v61  ;;  %v1690_v56 = vmul.f32 0.3275911, %v4960_v46  ;;  %v2063_v29 = vmul.f32 %v4795_v60, %v2031_v27  ;;  %v2033_v40 = vadd.f32 0.2548296, %v2001_v8  ;;  %v1941_v3 = vmul.f32 %v4877_v12, %v1909_v16 }
 0x2c7   : > { %5976 = vst [vmem:[#allocation53_spill] sm:$0xff] %v4971_v22  ;;  %v1847_v33 = vadd.f32 -1.4531521, %v1815_v49  ;;  %v2034_v2 = vadd.f32 0.2548296, %v2002_v10  ;;  %v2003_v52 = vmul.f32 %v4840_v25, %v1971_v35  ;;  %v4983_v4 = vadd.f32 %v1478_v44, %v4673_v62  ;;  %v1480_v44 = vpop.f32.mrf.mxu0 }
 0x2c8   : > { %v1972_v39 = vadd.f32 -0.28449672, %v1940_v36  ;;  %3302 = vpow2.f32 %v2175_v55  ;;  %v1721_v53 = vadd.f32 1.0, %v1689_v17  ;;  %v4988_v61 = vand.u32 2147483647, %v4968_v9 }
 0x2c9   : > { %5978 = vst [vmem:[#allocation55_spill] sm:$0xff] %v4983_v4  ;;  %v4985_v38 = vpop.eup %3296  ;;  %v4991_v60 = vmul.f32 0.70710677, %v4971_v22  ;;  %v2285_v49 = vmul.f32 %v2253_v45, %v4798_v54  ;;  %v1942_v35 = vmul.f32 %v4893_v13, %v1910_v32  ;;  %v2103_v36 = vsub.f32 0.0, %v4812_v11 }
 0x2ca   : > { %v4993_v27 = vpop.eup %3298  ;;  %v1722_v8 = vadd.f32 1.0, %v1690_v56  ;;  %v2223_v16 = vmul.f32 %v4907_v51, %v2063_v29  ;;  %v2065_v10 = vmul.f32 %v4814_v19, %v2033_v40  ;;  %v1973_v55 = vadd.f32 -0.28449672, %v1941_v3 }
 0x2cb   : > { %v1879_v17 = vmul.f32 %v4943_v14, %v1847_v33  ;;  %v2066_v22 = vmul.f32 %v4825_v20, %v2034_v2  ;;  %v2035_v9 = vadd.f32 0.2548296, %v2003_v52  ;;  %v1816_v59 = vmul.f32 1.0614054, %v4985_v38 }
 0x2cc   : > { %v5004_v54 = vmul.f32 0.70710677, %v4983_v4  ;;  %v2004_v32 = vmul.f32 %v4862_v23, %v1972_v39  ;;  %3304 = vrcp.f32 %v1721_v53  ;;  %v1691_v45 = vmul.f32 0.3275911, %v4988_v61 }
 0x2cd   : > { %v5009_v51 = vand.u32 2147483647, %v4991_v60  ;;  %v1974_v19 = vadd.f32 -0.28449672, %v1942_v35  ;;  %v2135_v33 = vmul.f32 %v2103_v36, %v4812_v11  ;;  %3306 = vrcp.f32 %v1722_v8 }
 0x2ce   : > { %v5013_v20 = vadd.f32 %v1480_v44, %v4696_v43  ;;  %v2255_v2 = vsub.f32 1.0, %v2223_v16  ;;  %v2225_v56 = vmul.f32 %v3291_v18, %v2065_v10  ;;  %v2005_v29 = vmul.f32 %v4877_v12, %v1973_v55 }
 0x2cf   : > { %v1911_v40 = vadd.f32 1.4214138, %v1879_v17  ;;  %v2226_v3 = vmul.f32 %v3293_v24, %v2066_v22  ;;  %v2067_v39 = vmul.f32 %v4840_v25, %v2035_v9  ;;  %v1848_v52 = vadd.f32 -1.4531521, %v1816_v59 }
 0x2d0   : > { %v5018_v53 = vand.u32 2147483647, %v5004_v54  ;;  %v2036_v35 = vadd.f32 0.2548296, %v2004_v32  ;;  %v5021_v11 = vmul.f32 0.5, %v4823_v34  ;;  %v1723_v36 = vadd.f32 1.0, %v1691_v45  ;;  %v1482_v32 = vpop.f32.mrf.mxu0 }
 0x2d1   : > { %v3301_v4 = vpop.eup %3300  ;;  %v1692_v8 = vmul.f32 0.3275911, %v5009_v51  ;;  %v2317_v16 = vadd.f32 1.0, %v2285_v49  ;;  %v2006_v18 = vmul.f32 %v4893_v13, %v1974_v19  ;;  %v2177_v10 = vmul.f32 1.442695, %v2135_v33 }
 0x2d2   : > { %5979 = vst [vmem:[#allocation56_spill] sm:$0xff] %v5021_v11  ;;  %v5026_v22 = vmul.f32 0.70710677, %v5013_v20  ;;  %v2287_v25 = vmul.f32 %v2255_v2, %v4817_v37  ;;  %v2257_v59 = vsub.f32 1.0, %v2225_v56  ;;  %v2037_v24 = vadd.f32 0.2548296, %v2005_v29 }
 0x2d3   : > { %v1943_v9 = vmul.f32 %v4943_v14, %v1911_v40  ;;  %v2258_v55 = vsub.f32 1.0, %v2226_v3  ;;  %v2227_v17 = vmul.f32 %v3295_v0, %v2067_v39  ;;  %v1880_v34 = vmul.f32 %v4985_v38, %v1848_v52 }
 0x2d4   : > { %v1693_v44 = vmul.f32 0.3275911, %v5018_v53  ;;  %v2068_v49 = vmul.f32 %v4862_v23, %v2036_v35  ;;  %v2104_v45 = vsub.f32 0.0, %v4860_v47  ;;  %3308 = vrcp.f32 %v1723_v36 }
 0x2d5   : > { %v1724_v19 = vadd.f32 1.0, %v1692_v8  ;;  %v3303_v33 = vpop.eup %3302  ;;  %v2038_v11 = vadd.f32 0.2548296, %v2006_v18  ;;  %3310 = vpow2.f32 %v2177_v10  ;;  %vm1592_vm0 = vcmp.ge.f32.partialorder %v4838_v30, 0.0 }
 0x2d6   : > { %v5036_v37 = vand.u32 2147483647, %v5026_v22  ;;  %v2289_v0 = vmul.f32 %v2257_v59, %v4851_v15  ;;  %v2069_v2 = vmul.f32 %v4877_v12, %v2037_v24  ;;  %v1975_v56 = vadd.f32 -0.28449672, %v1943_v9 }
 0x2d7   : > { %v5041_v29 = vadd.f32 %v1482_v32, %v4673_v62  ;;  %v2290_v23 = vmul.f32 %v2258_v55, %v4856_v26  ;;  %v2259_v40 = vsub.f32 1.0, %v2227_v17  ;;  %v1912_v3 = vadd.f32 1.4214138, %v1880_v34  ;;  %v1484_v55 = vpop.f32.mrf.mxu0 }
 0x2d8   : > { %v1725_v39 = vadd.f32 1.0, %v1693_v44  ;;  %v2319_v52 = vadd.f32 1.0, %v2287_v25  ;;  %v2228_v35 = vmul.f32 %v4993_v27, %v2068_v49  ;;  %v2136_v36 = vmul.f32 %v2104_v45, %v4860_v47 }
 0x2d9   : > { %3312 = vrcp.f32 %v1724_v19  ;;  %v5046_v8 = vpop.eup %3304  ;;  %v5049_v15 = vmul.f32 %v2317_v16, %v4785_v58  ;;  %v2070_v12 = vmul.f32 %v4893_v13, %v2038_v11  ;;  %v5055_v26 = vsel %vm1592_vm0, 1.0, %v5964_v7 }
 0x2da   : > { %v1694_v18 = vmul.f32 0.3275911, %v5036_v37  ;;  %v5058_v10 = vpop.eup %3306  ;;  %v2321_v27 = vadd.f32 1.0, %v2289_v0  ;;  %v2229_v25 = vmul.f32 %v3301_v4, %v2069_v2  ;;  %v2007_v47 = vmul.f32 %v4943_v14, %v1975_v56 }
 0x2db   : > { %v5062_v59 = vmul.f32 0.70710677, %v5041_v29  ;;  %v2322_v58 = vadd.f32 1.0, %v2290_v23  ;;  %v2291_v16 = vmul.f32 %v2259_v40, %v4885_v50  ;;  %v1944_v13 = vmul.f32 %v4985_v38, %v1912_v3 }
 0x2dc   : > { %3314 = vrcp.f32 %v1725_v39  ;;  %v5067_v30 = vmul.f32 %v2319_v52, %v4801_v21  ;;  %v2260_v11 = vsub.f32 1.0, %v2228_v35  ;;  %v2179_v24 = vmul.f32 1.442695, %v2136_v36 }
 0x2dd   : > { %v1817_v9 = vmul.f32 1.0614054, %v5046_v8  ;;  %v2230_v4 = vmul.f32 %v3303_v33, %v2070_v12  ;;  %v5071_v17 = vmul.f32 0.5, %v4905_v57  ;;  %v1818_v34 = vmul.f32 1.0614054, %v5058_v10 }
 0x2de   : > { %5980 = vst [vmem:[#allocation57_spill] sm:$0xff] %v5067_v30  ;;  %v1726_v44 = vadd.f32 1.0, %v1694_v18  ;;  %v5075_v50 = vmul.f32 %v2321_v27, %v4833_v6  ;;  %v2261_v32 = vsub.f32 1.0, %v2229_v25  ;;  %v2039_v49 = vadd.f32 0.2548296, %v2007_v47  ;;  %v5983_v47 = vld [vmem:[#allocation50_spill] sm:$0xff] }
 0x2df   : > { %v5078_v21 = vand.u32 2147483647, %v5062_v59  ;;  %v5081_v45 = vmul.f32 %v2322_v58, %v4844_v63  ;;  %v2323_v19 = vadd.f32 1.0, %v2291_v16  ;;  %v1976_v0 = vadd.f32 -0.28449672, %v1944_v13 }
 0x2e0   : > { %5981 = vst [vmem:[#allocation58_spill] sm:$0xff] %v5075_v50  ;;  %v5084_v33 = vadd.f32 %v1484_v55, %v4696_v43  ;;  %v2292_v57 = vmul.f32 %v2260_v11, %v4890_v42  ;;  %3316 = vpow2.f32 %v2179_v24  ;;  %vm1593_vm1 = vcmp.ge.f32.partialorder %v4931_v5, 0.0  ;;  %v2677_v50 = vld [vmem:[%s5264_s0 + $0x48] sm:$0xff] }
 0x2e1   : > { %v1849_v6 = vadd.f32 -1.4531521, %v1817_v9  ;;  %v5088_v2 = vpop.eup %3308  ;;  %v2262_v56 = vsub.f32 1.0, %v2230_v4  ;;  %v2105_v23 = vsub.f32 0.0, %v4951_v28  ;;  %v1850_v40 = vadd.f32 -1.4531521, %v1818_v34 }
 0x2e2   : > { %3318 = vrcp.f32 %v1726_v44  ;;  %v3311_v63 = vpop.eup %3310  ;;  %v2293_v3 = vmul.f32 %v2261_v32, %v4912_v48  ;;  %v2071_v39 = vmul.f32 %v4943_v14, %v2039_v49  ;;  %v2106_v52 = vsub.f32 0.0, %v4960_v46  ;;  %v5984_v44 = vld [vmem:[#allocation42_spill] sm:$0xff] }
 0x2e3   : > { %v1695_v42 = vmul.f32 0.3275911, %v5078_v21  ;;  %v5096_v35 = vmul.f32 %v2323_v19, %v4865_v31  ;;  %v2008_v36 = vmul.f32 %v4985_v38, %v1976_v0  ;;  %v5100_v12 = vmul.f32 0.5, %v4916_v41 }
 0x2e4   : > { %v5103_v18 = vmul.f32 0.70710677, %v5084_v33  ;;  %v2324_v27 = vadd.f32 1.0, %v2292_v57  ;;  %v1881_v48 = vmul.f32 %v5046_v8, %v1849_v6  ;;  %vm1594_vm2 = vcmp.ge.f32.partialorder %v4936_v1, 0.0  ;;  %v5985_v6 = vld [vmem:[#allocation51_spill] sm:$0xff] }
 0x2e5   : > { %5982 = vst [vmem:[#allocation59_spill] sm:$0xff] %v5096_v35  ;;  %v1819_v14 = vmul.f32 1.0614054, %v5088_v2  ;;  %v2294_v31 = vmul.f32 %v2262_v56, %v5983_v47  ;;  %v5114_v58 = vsel %vm1593_vm1, 1.0, %v5964_v7  ;;  %v2137_v41 = vmul.f32 %v2105_v23, %v4951_v28  ;;  %v5986_v23 = vld [vmem:[#allocation45_spill] sm:$0xff]  ;;  %v2671_v35 = vld [vmem:[%s5264_s0 + $0x18] sm:$0xff] }
 0x2e6   : > { %v5108_v25 = vpop.eup %3312  ;;  %v1882_v16 = vmul.f32 %v5058_v10, %v1850_v40  ;;  %v2325_v13 = vadd.f32 1.0, %v2293_v3  ;;  %v2231_v11 = vmul.f32 %v3311_v63, %v2071_v39  ;;  %v2138_v24 = vmul.f32 %v2106_v52, %v4960_v46  ;;  %v5988_v52 = vld [vmem:[#allocation52_spill] sm:$0xff] }
 0x2e7   : > { %v1727_v1 = vadd.f32 1.0, %v1695_v42  ;;  %v2040_v9 = vadd.f32 0.2548296, %v2008_v36  ;;  %v5120_v55 = vsel %vm1594_vm2, 1.0, %v5964_v7  ;;  %v2107_v4 = vsub.f32 0.0, %v4988_v61 }
 0x2e8   : > { %v5124_v34 = vand.u32 2147483647, %v5103_v18  ;;  %v5129_v28 = vmul.f32 %v2324_v27, %v5984_v44  ;;  %v1913_v32 = vadd.f32 1.4214138, %v1881_v48  ;;  %v1851_v49 = vadd.f32 -1.4531521, %v1819_v14 }
 0x2e9   : > { %v5126_v5 = vpop.eup %3314  ;;  %v1820_v19 = vmul.f32 1.0614054, %v5108_v25  ;;  %v2326_v46 = vadd.f32 1.0, %v2294_v31  ;;  %v2181_v0 = vmul.f32 1.442695, %v2137_v41  ;;  %v5133_v56 = vmul.f32 0.5, %v5985_v6  ;;  %v1488_v31 = vpop.f32.mrf.mxu0 }
 0x2ea   : > { %v1914_v57 = vadd.f32 1.4214138, %v1882_v16  ;;  %v5136_v40 = vmul.f32 %v2325_v13, %v5986_v23  ;;  %v2263_v63 = vsub.f32 1.0, %v2231_v11  ;;  %v2183_v3 = vmul.f32 1.442695, %v2138_v24  ;;  %v5989_v16 = vld [vmem:[#allocation48_spill] sm:$0xff] }
 0x2eb   : > { %3320 = vrcp.f32 %v1727_v1  ;;  %v2072_v39 = vmul.f32 %v4985_v38, %v2040_v9  ;;  %vm1595_vm3 = vcmp.ge.f32.partialorder %v5988_v52, 0.0  ;;  %v1821_v42 = vmul.f32 1.0614054, %v5126_v5  ;;  %v5991_v11 = vld [vmem:[#allocation53_spill] sm:$0xff]  ;;  %v5992_v9 = vld [vmem:[#allocation54_spill] sm:$0xff]  ;;  %v1490_v23 = vpop.f32.mrf.mxu0 }
 0x2ec   : > { %5987 = vst [vmem:[#allocation50_spill] sm:$0xff] %v5136_v40  ;;  %v1696_v36 = vmul.f32 0.3275911, %v5124_v34  ;;  %v1945_v27 = vmul.f32 %v5046_v8, %v1913_v32  ;;  %v1883_v48 = vmul.f32 %v5088_v2, %v1851_v49  ;;  %v2139_v14 = vmul.f32 %v2107_v4, %v4988_v61 }
 0x2ed   : > { %v1852_v47 = vadd.f32 -1.4531521, %v1820_v19  ;;  %v3317_v41 = vpop.eup %3316  ;;  %v5146_v13 = vmul.f32 %v2326_v46, %v5989_v16  ;;  %3322 = vpow2.f32 %v2181_v0  ;;  %v1946_v38 = vmul.f32 %v5058_v10, %v1914_v57 }
 0x2ee   : > { %v5150_v24 = vmul.f32 0.5, %v5991_v11  ;;  %v2295_v44 = vmul.f32 %v2263_v63, %v5992_v9  ;;  %3324 = vpow2.f32 %v2183_v3  ;;  %v5158_v61 = vsel %vm1595_vm3, 1.0, %v5964_v7  ;;  %v5993_v3 = vld [vmem:[#allocation55_spill] sm:$0xff] }
 0x2ef   : > { %5990 = vst [vmem:[#allocation42_spill] sm:$0xff] %v5146_v13  ;;  %v5152_v1 = vpop.eup %3318  ;;  %v2108_v4 = vsub.f32 0.0, %v5009_v51  ;;  %v2232_v32 = vmul.f32 %v3317_v41, %v2072_v39  ;;  %vm1596_vm4 = vcmp.ge.f32.partialorder %v4991_v60, 0.0  ;;  %v1853_v49 = vadd.f32 -1.4531521, %v1821_v42 }
 0x2f0   : > { %v1728_v19 = vadd.f32 1.0, %v1696_v36  ;;  %v1977_v46 = vadd.f32 -0.28449672, %v1945_v27  ;;  %v1915_v0 = vadd.f32 1.4214138, %v1883_v48  ;;  %v1884_v6 = vmul.f32 %v5108_v25, %v1852_v47 }
 0x2f1   : > { %v2185_v57 = vmul.f32 1.442695, %v2139_v14  ;;  %v1978_v63 = vadd.f32 -0.28449672, %v1946_v38  ;;  %v5164_v16 = vmul.f32 0.5, %v5993_v3  ;;  %v2109_v52 = vsub.f32 0.0, %v5018_v53  ;;  %v5180_v38 = vpop.f32.mrf.mxu0 }
 0x2f2   : > { %v1822_v11 = vmul.f32 1.0614054, %v5152_v1  ;;  %v2327_v9 = vadd.f32 1.0, %v2295_v44  ;;  %v5169_v39 = vsel %vm1596_vm4, 1.0, %v5964_v7  ;;  %v2140_v60 = vmul.f32 %v2108_v4, %v5009_v51 }
 0x2f3   : > { %vm1597_vm5 = vcmp.ge.f32.partialorder %v5004_v54, 0.0  ;;  %v2264_v42 = vsub.f32 1.0, %v2232_v32  ;;  %v1885_v36 = vmul.f32 %v5126_v5, %v1853_v49  ;;  %3326 = vrcp.f32 %v1728_v19  ;;  %v5994_v32 = vld [vmem:[#allocation49_spill] sm:$0xff] }
 0x2f4   : > { %v5175_v27 = vadd.f32 %v1488_v31, %v4673_v62  ;;  %v2009_v48 = vmul.f32 %v5046_v8, %v1977_v46  ;;  %v1947_v14 = vmul.f32 %v5088_v2, %v1915_v0  ;;  %v1916_v47 = vadd.f32 1.4214138, %v1884_v6 }
 0x2f5   : > { %v2110_v41 = vsub.f32 0.0, %v5036_v37  ;;  %v2010_v51 = vmul.f32 %v5058_v10, %v1978_v63  ;;  %3328 = vpow2.f32 %v2185_v57  ;;  %v2141_v44 = vmul.f32 %v2109_v52, %v5018_v53 }
 0x2f6   : > { %v1854_v4 = vadd.f32 -1.4531521, %v1822_v11  ;;  %v5185_v49 = vmul.f32 %v2327_v9, %v5994_v32  ;;  %v2187_v31 = vmul.f32 1.442695, %v2140_v60  ;;  %v5190_v19 = vsel %vm1597_vm5, 1.0, %v5964_v7  ;;  %v1494_v11 = vpop.f32.mrf.mxu0 }
 0x2f7   : > { %v5193_v46 = vmul.f32 0.5, %v5013_v20  ;;  %v2296_v6 = vmul.f32 %v2264_v42, %v5055_v26  ;;  %v1917_v57 = vadd.f32 1.4214138, %v1885_v36  ;;  %v5199_v53 = vmul.f32 0.5, %v5041_v29 }
 0x2f8   : > { %5995 = vst [vmem:[#allocation51_spill] sm:$0xff] %v5185_v49  ;;  %v5195_v0 = vpop.eup %3320  ;;  %v5202_v63 = vmul.f32 0.70710677, %v5175_v27  ;;  %v2041_v3 = vadd.f32 0.2548296, %v2009_v48  ;;  %v1948_v52 = vmul.f32 %v5108_v25, %v1916_v47  ;;  %v2142_v20 = vmul.f32 %v2110_v41, %v5036_v37 }
 0x2f9   : > { %5996 = vst [vmem:[#allocation45_spill] sm:$0xff] %v5199_v53  ;;  %v1979_v54 = vadd.f32 -0.28449672, %v1947_v14  ;;  %v2042_v9 = vadd.f32 0.2548296, %v2010_v51  ;;  %v1886_v26 = vmul.f32 %v5152_v1, %v1854_v4  ;;  %v2111_v42 = vsub.f32 0.0, %v5078_v21 }
 0x2fa   : > { %v2189_v60 = vmul.f32 1.442695, %v2141_v44  ;;  %v3323_v29 = vpop.eup %3322  ;;  %3330 = vpow2.f32 %v2187_v31  ;;  %vm1598_vm6 = vcmp.ge.f32.partialorder %v5026_v22, 0.0  ;;  %vm1599_vm7 = vcmp.ge.f32.partialorder %v5062_v59, 0.0  ;;  %v5225_v31 = vpop.f32.mrf.mxu0 }
 0x2fb   : > { %v1823_v36 = vmul.f32 1.0614054, %v5195_v0  ;;  %v3325_v37 = vpop.eup %3324  ;;  %v2328_v48 = vadd.f32 1.0, %v2296_v6  ;;  %v1949_v14 = vmul.f32 %v5126_v5, %v1917_v57  ;;  %v5217_v47 = vand.u32 2147483647, %v5202_v63 }
 0x2fc   : > { %v5220_v41 = vadd.f32 %v1490_v23, %v4696_v43  ;;  %v2073_v51 = vmul.f32 %v5046_v8, %v2041_v3  ;;  %v2011_v44 = vmul.f32 %v5088_v2, %v1979_v54  ;;  %v1980_v4 = vadd.f32 -0.28449672, %v1948_v52 }
 0x2fd   : > { %v2191_v32 = vmul.f32 1.442695, %v2142_v20  ;;  %v2074_v6 = vmul.f32 %v5058_v10, %v2042_v9  ;;  %v5232_v57 = vsel %vm1598_vm6, 1.0, %v5964_v7  ;;  %v1918_v53 = vadd.f32 1.4214138, %v1886_v26  ;;  %v6000_v10 = vld [vmem:[#allocation56_spill] sm:$0xff] }
 0x2fe   : > { %v2143_v23 = vmul.f32 %v2111_v42, %v5078_v21  ;;  %3332 = vpow2.f32 %v2189_v60  ;;  %v5239_v8 = vsel %vm1599_vm7, 1.0, %v5964_v7  ;;  %v1855_v3 = vadd.f32 -1.4531521, %v1823_v36 }
 0x2ff   : > { %v5242_v54 = vmul.f32 0.5, %v5084_v33  ;;  %v5245_v52 = vmul.f32 %v2328_v48, %v6000_v10  ;;  %v1981_v22 = vadd.f32 -0.28449672, %v1949_v14  ;;  %v1697_v20 = vmul.f32 0.3275911, %v5217_v47  ;;  %v5254_v33 = vpop.f32.mrf.mxu0 }
 0x300   : > { %v5249_v21 = vmul.f32 0.70710677, %v5220_v41  ;;  %v5251_v9 = vpop.eup %3326  ;;  %v2233_v59 = vmul.f32 %v3323_v29, %v2073_v51  ;;  %v2043_v60 = vadd.f32 0.2548296, %v2011_v44  ;;  %v2012_v26 = vmul.f32 %v5108_v25, %v1980_v4 }
 0x301   : > { %5999 = vst [vmem:[#allocation52_spill] sm:$0xff] %v5242_v54  ;;  %6001 = vst [vmem:[#allocation48_spill] sm:$0xff] %v5245_v52  ;;  %3334 = vpow2.f32 %v2191_v32  ;;  %v2234_v42 = vmul.f32 %v3325_v37, %v2074_v6  ;;  %v1950_v36 = vmul.f32 %v5152_v1, %v1918_v53  ;;  %v2193_v48 = vmul.f32 1.442695, %v2143_v23 }
 0x302   : > { %v5259_v14 = vadd.f32 %v5180_v38, %v4673_v62  ;;  %v3329_v29 = vpop.eup %3328  ;;  %v1887_v51 = vmul.f32 %v5195_v0, %v1855_v3  ;;  %v2112_v44 = vsub.f32 0.0, %v5124_v34  ;;  %v5269_v37 = vmul.f32 0.5, %v5175_v27  ;;  %v2669_v38 = vld [vmem:[%s5264_s0 + $0x8] sm:$0xff]  ;;  %v5282_v27 = vpop.f32.mrf.mxu0 }
 0x303   : > { %v5272_v53 = vadd.f32 %v1494_v11, %v4696_v43  ;;  %v2013_v4 = vmul.f32 %v5126_v5, %v1981_v22  ;;  %v1824_v32 = vmul.f32 1.0614054, %v5251_v9  ;;  %v1729_v6 = vadd.f32 1.0, %v1697_v20  ;;  %2691 = vperm.xlu1 %3187, %v2669_v38   ;;  %v2670_v11 = vld [vmem:[%s5264_s0 + $0x10] sm:$0xff] }
 0x304   : > { %6003 = vst [vmem:[#allocation53_spill] sm:$0xff] %v5269_v37  ;;  %v5278_v23 = vand.u32 2147483647, %v5249_v21  ;;  %v2265_v3 = vsub.f32 1.0, %v2233_v59  ;;  %v2075_v10 = vmul.f32 %v5088_v2, %v2043_v60  ;;  %v2044_v54 = vadd.f32 0.2548296, %v2012_v26 }
 0x305   : > { %vm1600_vm8 = vcmp.ge.f32.partialorder %v5103_v18, 0.0  ;;  %v2266_v37 = vsub.f32 1.0, %v2234_v42  ;;  %v1982_v49 = vadd.f32 -0.28449672, %v1950_v36  ;;  %3336 = vpow2.f32 %v2193_v48  ;;  %v2668_v59 = vld [vmem:[%s5264_s0] sm:$0xff] }
 0x306   : > { %v5286_v22 = vmul.f32 0.70710677, %v5259_v14  ;;  %v1919_v20 = vadd.f32 1.4214138, %v1887_v51  ;;  %v2144_v40 = vmul.f32 %v2112_v44, %v5124_v34  ;;  %vm1601_vm9 = vcmp.ge.f32.partialorder %v5202_v63, 0.0  ;;  %2686 = vperm.xlu0 %3186, %v2668_v59   ;;  %v1504_v44 = vpop.f32.mrf.mxu0  ;;  %v2679_v59 = vld [vmem:[%s5264_s0 + $0x58] sm:$0xff] }
 0x307   : > { %v5291_v2 = vmul.f32 0.70710677, %v5272_v53  ;;  %v3331_v60 = vpop.eup %3330  ;;  %v2045_v26 = vadd.f32 0.2548296, %v2013_v4  ;;  %v1856_v38 = vadd.f32 -1.4531521, %v1824_v32  ;;  %3338 = vrcp.f32 %v1729_v6  ;;  %2696 = vperm.xlu1 %3187, %v2670_v11  }
 0x308   : > { %v1698_v42 = vmul.f32 0.3275911, %v5278_v23  ;;  %v2297_v36 = vmul.f32 %v2265_v3, %v5114_v58  ;;  %v2235_v48 = vmul.f32 %v3329_v29, %v2075_v10  ;;  %v2076_v34 = vmul.f32 %v5108_v25, %v2044_v54 }
 0x309   : > { %v2113_v51 = vsub.f32 0.0, %v5217_v47  ;;  %v2298_v52 = vmul.f32 %v2266_v37, %v5120_v55  ;;  %v5304_v4 = vsel %vm1600_vm8, 1.0, %v5964_v7  ;;  %v5309_v32 = vsel %vm1601_vm9, 1.0, %v5964_v7 }
 0x30a   : > { %6004 = vst [vmem:[#allocation54_spill] sm:$0xff] %v5309_v32  ;;  %v5312_v58 = vand.u32 2147483647, %v5286_v22  ;;  %v2014_v25 = vmul.f32 %v5152_v1, %v1982_v49  ;;  %v1951_v54 = vmul.f32 %v5195_v0, %v1919_v20  ;;  %v2195_v55 = vmul.f32 1.442695, %v2144_v40  ;;  %2731 = vperm.xlu0 %3186, %v2677_v50   ;;  %v2672_v40 = vld [vmem:[%s5264_s0 + $0x20] sm:$0xff] }
 0x30b   : > { %v5317_v29 = vand.u32 2147483647, %v5291_v2  ;;  %v3333_v18 = vpop.eup %3332  ;;  %v2077_v37 = vmul.f32 %v5126_v5, %v2045_v26  ;;  %v1888_v63 = vmul.f32 %v5251_v9, %v1856_v38  ;;  %v1730_v6 = vadd.f32 1.0, %v1698_v42  ;;  %2701 = vperm.xlu1 %3187, %v2671_v35  }
 0x30c   : > { %v5322_v3 = vadd.f32 %v1504_v44, %v4696_v43  ;;  %v2329_v10 = vadd.f32 1.0, %v2297_v36  ;;  %v2267_v49 = vsub.f32 1.0, %v2235_v48  ;;  %v2236_v11 = vmul.f32 %v3331_v60, %v2076_v34  ;;  %v5336_v60 = vpop.f32.mrf.mxu0  ;;  %v2673_v48 = vld [vmem:[%s5264_s0 + $0x28] sm:$0xff] }
 0x30d   : > { %v2145_v20 = vmul.f32 %v2113_v51, %v5217_v47  ;;  %v2330_v13 = vadd.f32 1.0, %v2298_v52  ;;  %v5328_v30 = vmul.f32 0.5, %v5220_v41  ;;  %v1699_v5 = vmul.f32 0.3275911, %v5312_v58  ;;  %v2681_v34 = vld [vmem:[%s5264_s0 + $0x68] sm:$0xff] }
 0x30e   : > { %6005 = vst [vmem:[#allocation55_spill] sm:$0xff] %v5322_v3  ;;  %v3335_v32 = vpop.eup %3334  ;;  %v5333_v26 = vadd.f32 %v5254_v33, %v4696_v43  ;;  %v2046_v50 = vadd.f32 0.2548296, %v2014_v25  ;;  %v1983_v35 = vadd.f32 -0.28449672, %v1951_v54  ;;  %3340 = vpow2.f32 %v2195_v55  ;;  %2741 = vperm.xlu0 %3186, %v2679_v59  }
 0x30f   : > { %6006 = vst [vmem:[#allocation49_spill] sm:$0xff] %v5328_v30  ;;  %v1700_v47 = vmul.f32 0.3275911, %v5317_v29  ;;  %v2237_v38 = vmul.f32 %v3333_v18, %v2077_v37  ;;  %v1920_v52 = vadd.f32 1.4214138, %v1888_v63  ;;  %3342 = vrcp.f32 %v1730_v6  ;;  %2706 = vperm.xlu1 %3187, %v2672_v40   ;;  %v2683_v40 = vld [vmem:[%s5264_s0 + $0x78] sm:$0xff] }
 0x310   : > { %6007 = vst [vmem:[#allocation56_spill] sm:$0xff] %v5333_v26  ;;  %v5339_v41 = vmul.f32 0.70710677, %v5322_v3  ;;  %v2299_v33 = vmul.f32 %v2267_v49, %v5158_v61  ;;  %v2268_v42 = vsub.f32 1.0, %v2236_v11  ;;  %v2197_v36 = vmul.f32 1.442695, %v2145_v20 }
 0x311   : > { %vm1602_vm10 = vcmp.ge.f32.partialorder %v5249_v21, 0.0  ;;  %v5346_v51 = vmul.f32 %v2329_v10, %v5071_v17  ;;  %v5349_v44 = vmul.f32 %v2330_v13, %v5100_v12  ;;  %v1731_v25 = vadd.f32 1.0, %v1699_v5  ;;  %v1510_v17 = vpop.f32.mrf.mxu0  ;;  %v2674_v20 = vld [vmem:[%s5264_s0 + $0x30] sm:$0xff] }
 0x312   : > { %v5352_v54 = vmul.f32 0.70710677, %v5333_v26  ;;  %v5354_v55 = vpop.eup %3336  ;;  %v2078_v61 = vmul.f32 %v5152_v1, %v2046_v50  ;;  %v2015_v18 = vmul.f32 %v5195_v0, %v1983_v35  ;;  %v2114_v21 = vsub.f32 0.0, %v5278_v23  ;;  %2751 = vperm.xlu0 %3186, %v2681_v34  }
 0x313   : > { %v1732_v37 = vadd.f32 1.0, %v1700_v47  ;;  %v2269_v63 = vsub.f32 1.0, %v2237_v38  ;;  %v1952_v12 = vmul.f32 %v5251_v9, %v1920_v52  ;;  %v5361_v13 = vsel %vm1602_vm10, 1.0, %v5964_v7  ;;  %2711 = vperm.xlu1 %3187, %v2673_v48  }
 0x314   : > { %v5364_v6 = vand.u32 2147483647, %v5339_v41  ;;  %v5366_v1 = vpop.eup %3338  ;;  %v2331_v10 = vadd.f32 1.0, %v2299_v33  ;;  %v2300_v49 = vmul.f32 %v2268_v42, %v5169_v39  ;;  %3344 = vpow2.f32 %v2197_v36 }
 0x315   : > { %v5371_v11 = vadd.f32 %v5282_v27, %v4673_v62  ;;  %3346 = vrcp.f32 %v1731_v25  ;;  %v5377_v59 = vadd.f32 %v5225_v31, %v4673_v62  ;;  %v5380_v5 = vand.u32 2147483647, %v5352_v54  ;;  %v1512_v25 = vpop.f32.mrf.mxu0 }
 0x316   : > { %v5383_v50 = vadd.f32 %v1510_v17, %v4696_v43  ;;  %v2238_v39 = vmul.f32 %v3335_v32, %v2078_v61  ;;  %v2047_v35 = vadd.f32 0.2548296, %v2015_v18  ;;  %v2146_v47 = vmul.f32 %v2114_v21, %v5278_v23  ;;  %2761 = vperm.xlu0 %3186, %v2683_v40   ;;  %v2675_v23 = vld [vmem:[%s5264_s0 + $0x38] sm:$0xff] }
 0x317   : > { %6008 = vst [vmem:[#allocation60_spill] sm:$0xff] %v5371_v11  ;;  %6009 = vst [vmem:[#allocation61_spill] sm:$0xff] %v5377_v59  ;;  %3348 = vrcp.f32 %v1732_v37  ;;  %v2301_v27 = vmul.f32 %v2269_v63, %v5190_v19  ;;  %v1984_v38 = vadd.f32 -0.28449672, %v1952_v12  ;;  %v1825_v52 = vmul.f32 1.0614054, %v5366_v1  ;;  %2716 = vperm.xlu1 %3187, %v2674_v20  }
 0x318   : > { %6010 = vst [vmem:[#allocation62_spill] sm:$0xff] %v5383_v50  ;;  %v1704_v31 = vmul.f32 0.3275911, %v5364_v6  ;;  %v2332_v33 = vadd.f32 1.0, %v2300_v49  ;;  %v5390_v42 = vmul.f32 0.5, %v5259_v14  ;;  %vm1603_vm11 = vcmp.ge.f32.partialorder %v5286_v22, 0.0 }
 0x319   : > { %v5394_v32 = vmul.f32 0.70710677, %v5371_v11  ;;  %v5398_v36 = vmul.f32 %v2331_v10, %v5133_v56  ;;  %v5401_v19 = vmul.f32 0.70710677, %v5377_v59  ;;  %v1702_v48 = vmul.f32 0.3275911, %v5380_v5 }
 0x31a   : > { %6011 = vst [vmem:[#allocation63_spill] sm:$0xff] %v5390_v42  ;;  %v5405_v34 = vmul.f32 0.70710677, %v5383_v50  ;;  %v2270_v14 = vsub.f32 1.0, %v2238_v39  ;;  %v2079_v61 = vmul.f32 %v5195_v0, %v2047_v35  ;;  %v2199_v18 = vmul.f32 1.442695, %v2146_v47 }
 0x31b   : > { %6012 = vst [vmem:[#allocation64_spill] sm:$0xff] %v5394_v32  ;;  %6013 = vst [vmem:[#allocation65_spill] sm:$0xff] %v5401_v19  ;;  %v2115_v21 = vsub.f32 0.0, %v5312_v58  ;;  %v5409_v37 = vpop.eup %3340  ;;  %v2333_v56 = vadd.f32 1.0, %v2301_v27  ;;  %v2016_v17 = vmul.f32 %v5251_v9, %v1984_v38  ;;  %v1857_v63 = vadd.f32 -1.4531521, %v1825_v52  ;;  %2721 = vperm.xlu1 %3187, %v2675_v23  }
 0x31c   : > { %6014 = vst [vmem:[#allocation66_spill] sm:$0xff] %v5405_v34  ;;  %v1736_v12 = vadd.f32 1.0, %v1704_v31  ;;  %v5412_v10 = vpop.eup %3342  ;;  %v5417_v49 = vsel %vm1603_vm11, 1.0, %v5964_v7  ;;  %v5420_v0 = vmul.f32 0.5, %v5272_v53  ;;  %v5423_v20 = vand.u32 2147483647, %v5394_v32 }
 0x31d   : > { %6015 = vst [vmem:[#allocation67_spill] sm:$0xff] %v5417_v49  ;;  %v5426_v40 = vadd.f32 %v1512_v25, %v4673_v62  ;;  %v2676_v39 = vld [vmem:[%s5264_s0 + $0x40] sm:$0xff]  ;;  %vm1604_vm12 = vcmp.ge.f32.partialorder %v5291_v2, 0.0  ;;  %v5431_v35 = vand.u32 2147483647, %v5401_v19  ;;  %v1734_v47 = vadd.f32 1.0, %v1702_v48 }
 0x31e   : > { %v5434_v22 = vand.u32 2147483647, %v5405_v34  ;;  %v2302_v53 = vmul.f32 %v2270_v14, %v5232_v57  ;;  %v5438_v27 = vmul.f32 %v5354_v55, %v2079_v61  ;;  %v2147_v38 = vmul.f32 %v2115_v21, %v5312_v58  ;;  %v6021_v50 = vld [vmem:[#allocation46_spill] sm:$0xff] }
 0x31f   : > { %6016 = vst [vmem:[#allocation68_spill] sm:$0xff] %v5426_v40  ;;  %v5443_v52 = vadd.f32 %v5336_v60, %v4673_v62  ;;  %v2048_v2 = vadd.f32 0.2548296, %v2016_v17  ;;  %v1889_v31 = vmul.f32 %v5366_v1, %v1857_v63  ;;  %v1826_v23 = vmul.f32 1.0614054, %v5412_v10  ;;  %2726 = vperm.xlu1 %3187, %v2676_v39   ;;  %v2678_v62 = vld [vmem:[%s5264_s0 + $0x50] sm:$0xff] }
 0x320   : > { %3350 = vrcp.f32 %v1736_v12  ;;  %v5448_v48 = vmul.f32 %v2332_v33, %v5150_v24  ;;  %v5451_v57 = vsel %vm1604_vm12, 1.0, %v5964_v7  ;;  %v1703_v55 = vmul.f32 0.3275911, %v5423_v20  ;;  %v6020_v63 = vld [vmem:[#allocation43_spill] sm:$0xff] }
 0x321   : > { %6017 = vst [vmem:[#allocation69_spill] sm:$0xff] %v5443_v52  ;;  %v5455_v58 = vmul.f32 0.70710677, %v5426_v40  ;;  %v5458_v60 = vpop.eup %3344  ;;  %v2116_v25 = vsub.f32 0.0, %v5317_v29  ;;  %v1701_v14 = vmul.f32 0.3275911, %v5431_v35  ;;  %3352 = vrcp.f32 %v1734_v47 }
 0x322   : > { %v1706_v61 = vmul.f32 0.3275911, %v5434_v22  ;;  %v5463_v24 = vpop.eup %3346  ;;  %v2334_v33 = vadd.f32 1.0, %v2302_v53  ;;  %v2271_v21 = vsub.f32 1.0, %v5438_v27  ;;  %v5467_v17 = vmul.f32 0.70710677, %v5443_v52  ;;  %v1514_v27 = vpop.f32.mrf.mxu0 }
 0x323   : > { %6018 = vst [vmem:[#allocation70_spill] sm:$0xff] %v5455_v58  ;;  %v1806_v12 = vmul.f32 1.0614054, %v6020_v63  ;;  %v1921_v40 = vadd.f32 1.4214138, %v1889_v31  ;;  %3354 = vpow2.f32 %v2199_v18  ;;  %2736 = vperm.xlu1 %3187, %v2678_v62   ;;  %v2080_v11 = vmul.f32 %v5251_v9, %v2048_v2  ;;  %v2680_v52 = vld [vmem:[%s5264_s0 + $0x60] sm:$0xff] }
 0x324   : > { %6019 = vst [vmem:[#allocation71_spill] sm:$0xff] %v5467_v17  ;;  %v5470_v39 = vpop.eup %3348  ;;  %v2201_v59 = vmul.f32 1.442695, %v2147_v38  ;;  %v1808_v47 = vmul.f32 1.0614054, %v6021_v50  ;;  %v1735_v26 = vadd.f32 1.0, %v1703_v55  ;;  %v5479_v18 = vmul.f32 %v2333_v56, %v5164_v16 }
 0x325   : > { %v1858_v42 = vadd.f32 -1.4531521, %v1826_v23  ;;  %v5475_v53 = vand.u32 2147483647, %v5455_v58  ;;  %v1733_v34 = vadd.f32 1.0, %v1701_v14  ;;  %v1738_v3 = vadd.f32 1.0, %v1706_v61 }
 0x326   : > { %v1838_v32 = vadd.f32 -1.4531521, %v1806_v12  ;;  %v1840_v19 = vadd.f32 -1.4531521, %v1808_v47  ;;  %6022 = vst [vmem:[#allocation43_spill] sm:$0xff] %v5479_v18  ;;  %v2148_v2 = vmul.f32 %v2116_v25, %v5317_v29  ;;  %v5490_v62 = vadd.f32 %v1514_v27, %v4696_v43  ;;  %v2682_v61 = vld [vmem:[%s5264_s0 + $0x70] sm:$0xff] }
 0x327   : > { %v1827_v38 = vmul.f32 1.0614054, %v5463_v24  ;;  %v1828_v31 = vmul.f32 1.0614054, %v5470_v39  ;;  %v5484_v9 = vand.u32 2147483647, %v5467_v17  ;;  %2746 = vperm.xlu1 %3187, %v2680_v52   ;;  %v1953_v16 = vmul.f32 %v5366_v1, %v1921_v40 }
 0x328   : > { %v1870_v23 = vmul.f32 %v6020_v63, %v1838_v32  ;;  %v1872_v55 = vmul.f32 %v6021_v50, %v1840_v19  ;;  %6023 = vst [vmem:[#allocation46_spill] sm:$0xff] %v5490_v62  ;;  %v1890_v56 = vmul.f32 %v5412_v10, %v1858_v42  ;;  %3356 = vrcp.f32 %v1735_v26  ;;  %v6025_v27 = vld [vmem:[#allocation38_spill] sm:$0xff]  ;;  %s3575_s0 = smov [#allocation8]  }
 0x329   : > { %v1707_v14 = vmul.f32 0.3275911, %v5475_v53  ;;  %v2240_v12 = vmul.f32 %v5409_v37, %v2080_v11  ;;  %3358 = vrcp.f32 %v1738_v3  ;;  %v1859_v32 = vadd.f32 -1.4531521, %v1827_v38  ;;  %s3445_s26 = sshll.u32 %s3575_s0, 4  ;;  %s3446_s26 = int_to_ptr.vmem [resolvable:$false] %s3445_s26 }
 0x32a   : > { %v1902_v29 = vadd.f32 1.4214138, %v1870_v23  ;;  %v1904_v25 = vadd.f32 1.4214138, %v1872_v55  ;;  %v1860_v47 = vadd.f32 -1.4531521, %v1828_v31  ;;  %3360 = vrcp.f32 %v1733_v34  ;;  %p3448_p1 = scmp.lt.s32.totalorder %s5778_s29, %s3446_s26 }
 0x32b   : > { %v1705_v43 = vmul.f32 0.3275911, %v5484_v9  ;;  %v5499_v19 = vmul.f32 %v2334_v33, %v5193_v46  ;;  %v5504_v42 = vmul.f32 0.70710677, %v5490_v62  ;;  %2756 = vperm.xlu1 %3187, %v2682_v61   ;;  %v5509_v3 = vmul.f32 %v2271_v21, %v5239_v8  ;;  %s3447_s16 = scalar_lea.vmem %s3446_s26, 4096 }
 0x32c   : > { %v1934_v40 = vmul.f32 %v6020_v63, %v1902_v29  ;;  %v1936_v26 = vmul.f32 %v6021_v50, %v1904_v25  ;;  %v1985_v37 = vadd.f32 -0.28449672, %v1953_v16  ;;  %v1922_v34 = vadd.f32 1.4214138, %v1890_v56  ;;  %p3449_p3 = scmp.lt.s32.totalorder %s3447_s16, %s3441_s17 }
 0x32d   : > { %6024 = vst [vmem:[#allocation72_spill] sm:$0xff] %v5504_v42  ;;  %v5506_v11 = vpop.eup %3350  ;;  %v1739_v52 = vadd.f32 1.0, %v1707_v14  ;;  %vm1584_vm13 = vcmp.ge.f32.partialorder %v6025_v27, 0.0  ;;  %3362 = vpow2.f32 %v2201_v59  ;;  %v2117_v46 = vsub.f32 0.0, %v5431_v35 }
 0x32e   : > { %v1966_v33 = vadd.f32 -0.28449672, %v1934_v40  ;;  %v1968_v38 = vadd.f32 -0.28449672, %v1936_v26  ;;  %v5513_v31 = vpop.eup %3352  ;;  %v2272_v23 = vsub.f32 1.0, %v2240_v12  ;;  %v1891_v55 = vmul.f32 %v5463_v24, %v1859_v32  ;;  %p3450_p5 = por %p3449_p3, %p3448_p1 }
 0x32f   : > { %v1892_v61 = vmul.f32 %v5470_v39, %v1860_v47  ;;  %v1737_v29 = vadd.f32 1.0, %v1705_v43  ;;  %v1832_v8 = vmul.f32 1.0614054, %v5506_v11  ;;  %v5521_v59 = vand.u32 2147483647, %v5504_v42 }
 0x330   : > { %v1998_v21 = vmul.f32 %v6020_v63, %v1966_v33  ;;  %v2000_v16 = vmul.f32 %v6021_v50, %v1968_v38  ;;  %v5523_v56 = vpop.eup %3354  ;;  %v2017_v14 = vmul.f32 %v5366_v1, %v1985_v37  ;;  %v1954_v12 = vmul.f32 %v5412_v10, %v1922_v34  ;;  %p3451_p6 = pnand %p3450_p5, %p3444_p2 }
 0x331   : > { %v2203_v25 = vmul.f32 1.442695, %v2148_v2  ;;  %3364 = vrcp.f32 %v1739_v52  ;;  %v2149_v32 = vmul.f32 %v2117_v46, %v5431_v35  ;;  %v1830_v47 = vmul.f32 1.0614054, %v5513_v31 }
 0x332   : > { %v2030_v43 = vadd.f32 0.2548296, %v1998_v21  ;;  %v2032_v40 = vadd.f32 0.2548296, %v2000_v16  ;;  %v2304_v26 = vmul.f32 %v2272_v23, %v5304_v4  ;;  %v1923_v33 = vadd.f32 1.4214138, %v1891_v55 }
 0x333   : > { %3366 = vrcp.f32 %v1737_v29  ;;  %v1708_v38 = vmul.f32 0.3275911, %v5521_v59  ;;  %v1924_v17 = vadd.f32 1.4214138, %v1892_v61  ;;  %v1864_v62 = vadd.f32 -1.4531521, %v1832_v8 }
 0x334   : > { %v2062_v37 = vmul.f32 %v6020_v63, %v2030_v43  ;;  %v2064_v34 = vmul.f32 %v6021_v50, %v2032_v40  ;;  %v2049_v2 = vadd.f32 0.2548296, %v2017_v14  ;;  %v1986_v52 = vadd.f32 -0.28449672, %v1954_v12  ;;  %v6026_v4 = vld [vmem:[#allocation44_spill] sm:$0xff]  ;;  %v6027_v55 = vld [vmem:[#allocation47_spill] sm:$0xff] }
 0x335   : > { %3368 = vpow2.f32 %v2203_v25  ;;  %v1740_v35 = vadd.f32 1.0, %v1708_v38  ;;  %v5533_v46 = vpop.eup %3356  ;;  %v5535_v21 = vmul.f32 1.442695, %v2149_v32  ;;  %v1862_v16 = vadd.f32 -1.4531521, %v1830_v47 }
 0x336   : > { %v2222_v23 = vmul.f32 %v6026_v4, %v2062_v37  ;;  %v2224_v29 = vmul.f32 %v6027_v55, %v2064_v34  ;;  %v5539_v58 = vpop.eup %3358  ;;  %v5541_v61 = vadd.f32 1.0, %v2304_v26  ;;  %v1955_v63 = vmul.f32 %v5463_v24, %v1923_v33  ;;  %v6028_v37 = vld [vmem:[#allocation40_spill] sm:$0xff] }
 0x337   : > { %v2118_v50 = vsub.f32 0.0, %v5380_v5  ;;  %3370 = vrcp.f32 %v1740_v35  ;;  %v5545_v8 = vpop.eup %3360  ;;  %v1956_v14 = vmul.f32 %v5470_v39, %v1924_v17  ;;  %v1896_v12 = vmul.f32 %v5506_v11, %v1864_v62 }
 0x338   : > { %v2254_v25 = vsub.f32 1.0, %v2222_v23  ;;  %v2256_v32 = vsub.f32 1.0, %v2224_v29  ;;  %v2018_v47 = vmul.f32 %v5412_v10, %v1986_v52  ;;  %v1831_v43 = vmul.f32 1.0614054, %v5533_v46 }
 0x339   : > { %v2120_v40 = vsub.f32 0.0, %v5364_v6  ;;  %v1616_v26 = vsel %vm1584_vm13, 1.0, %v5964_v7  ;;  %v1894_v33 = vmul.f32 %v5513_v31, %v1862_v16  ;;  %v1834_v38 = vmul.f32 1.0614054, %v5539_v58 }
 0x33a   : > { %v2286_v17 = vmul.f32 %v2254_v25, %v6028_v37  ;;  %v2288_v34 = vmul.f32 %v2256_v32, %v1616_v26  ;;  %v5558_v62 = vpop.eup %3362  ;;  %v1987_v35 = vadd.f32 -0.28449672, %v1955_v63  ;;  %v1829_v52 = vmul.f32 1.0614054, %v5545_v8  ;;  %v6029_v37 = vld [vmem:[#allocation39_spill] sm:$0xff] }
 0x33b   : > { %v2150_v4 = vmul.f32 %v2118_v50, %v5380_v5  ;;  %v2119_v23 = vsub.f32 0.0, %v5423_v20  ;;  %v1988_v55 = vadd.f32 -0.28449672, %v1956_v14  ;;  %v1928_v29 = vadd.f32 1.4214138, %v1896_v12  ;;  %v6030_v5 = vld [vmem:[#allocation41_spill] sm:$0xff] }
 0x33c   : > { %v2318_v27 = vadd.f32 1.0, %v2286_v17  ;;  %v2320_v18 = vadd.f32 1.0, %v2288_v34  ;;  %v5564_v16 = vmul.f32 %v5366_v1, %v2049_v2  ;;  %v2050_v42 = vadd.f32 0.2548296, %v2018_v47 }
 0x33d   : > { %v1863_v30 = vadd.f32 -1.4531521, %v1831_v43  ;;  %v2152_v25 = vmul.f32 %v2120_v40, %v5364_v6  ;;  %v1926_v63 = vadd.f32 1.4214138, %v1894_v33  ;;  %v1866_v26 = vadd.f32 -1.4531521, %v1834_v38 }
 0x33e   : > { %v5567_v32 = vpop.eup %3364  ;;  %v2350_v49 = vmul.f32 %v2318_v27, %v6029_v37  ;;  %v2352_v50 = vmul.f32 %v2320_v18, %v6030_v5  ;;  %v2019_v14 = vmul.f32 %v5463_v24, %v1987_v35  ;;  %v1861_v12 = vadd.f32 -1.4531521, %v1829_v52  ;;  %v6031_v38 = vld [vmem:[#allocation57_spill] sm:$0xff] }
 0x33f   : > { %v2207_v17 = vmul.f32 1.442695, %v2150_v4  ;;  %v2151_v34 = vmul.f32 %v2119_v23, %v5423_v20  ;;  %v2020_v2 = vmul.f32 %v5470_v39, %v1988_v55  ;;  %v1960_v6 = vmul.f32 %v5506_v11, %v1928_v29 }
 0x340   : > { %v5573_v1 = vpop.eup %3366  ;;  %v2382_v47 = vpack.c.bf16 %v2352_v50, %v2350_v49  ;;  %v2384_v43 = vpack.c.bf16 %v5129_v28, %v5081_v45  ;;  %v2082_v40 = vmul.f32 %v5412_v10, %v2050_v42  ;;  %v1895_v18 = vmul.f32 %v5533_v46, %v1863_v30 }
 0x341   : > { %v1835_v33 = vmul.f32 1.0614054, %v5567_v32  ;;  %v2381_v35 = vpack.c.bf16 %v6031_v38, %v5049_v15  ;;  %v1958_v52 = vmul.f32 %v5513_v31, %v1926_v63  ;;  %v2211_v4 = vmul.f32 1.442695, %v2152_v25 }
 0x342   : > { %v3369_v20 = vpop.eup %3368  ;;  %v1898_v23 = vmul.f32 %v5539_v58, %v1866_v26  ;;  %2564 = vmatprep.mubr.bf16.mxu1 %v2382_v47  ;;  %v2124_v49 = vsub.f32 0.0, %v5521_v59  ;;  %v2051_v55 = vadd.f32 0.2548296, %v2019_v14  ;;  %v1893_v45 = vmul.f32 %v5545_v8, %v1861_v12  ;;  %v6033_v47 = vld [vmem:[#allocation48_spill] sm:$0xff] }
 0x343   : > { %v2209_v28 = vmul.f32 1.442695, %v2151_v34  ;;  %v1833_v30 = vmul.f32 1.0614054, %v5573_v1  ;;  %2565 = vmatmul.mubr.bf16.vlgmr.msra.gmra.mxu1 %v2381_v35  ;;  %v2052_v42 = vadd.f32 0.2548296, %v2020_v2  ;;  %3372 = vpow2.f32 %v5535_v21 }
 0x344   : > { %v5589_v10 = vpop.eup %3370  ;;  %v1992_v15 = vadd.f32 -0.28449672, %v1960_v6  ;;  %v2122_v29 = vsub.f32 0.0, %v5434_v22  ;;  %2572 = vmatprep.mubr.bf16.mxu1 %v2384_v43  ;;  %3374 = vpow2.f32 %v2207_v17  ;;  %v1927_v27 = vadd.f32 1.4214138, %v1895_v18  ;;  %v6032_v6 = vld [vmem:[#allocation42_spill] sm:$0xff] }
 0x345   : > { %v1867_v25 = vadd.f32 -1.4531521, %v1835_v33  ;;  %v1836_v63 = vmul.f32 1.0614054, %v5589_v10  ;;  %v1990_v26 = vadd.f32 -0.28449672, %v1958_v52  ;;  %3376 = vpow2.f32 %v2211_v4 }
 0x346   : > { %v1930_v37 = vadd.f32 1.4214138, %v1898_v23  ;;  %v2156_v5 = vmul.f32 %v2124_v49, %v5521_v59  ;;  %v5596_v50 = vmul.f32 %v5523_v56, %v2082_v40  ;;  %v1925_v14 = vadd.f32 1.4214138, %v1893_v45  ;;  %v6034_v56 = vld [vmem:[#allocation58_spill] sm:$0xff]  ;;  %v6035_v40 = vld [vmem:[#allocation59_spill] sm:$0xff] }
 0x347   : > { %v1865_v12 = vadd.f32 -1.4531521, %v1833_v30  ;;  %v1868_v21 = vadd.f32 -1.4531521, %v1836_v63  ;;  %v2084_v34 = vmul.f32 %v5470_v39, %v2052_v42  ;;  %v2024_v2 = vmul.f32 %v5506_v11, %v1992_v15 }
 0x348   : > { %v2154_v17 = vmul.f32 %v2122_v29, %v5434_v22  ;;  %v2386_v43 = vpack.c.bf16 %v6033_v47, %v6032_v6  ;;  %v1959_v18 = vmul.f32 %v5533_v46, %v1927_v27  ;;  %v1899_v33 = vmul.f32 %v5567_v32, %v1867_v25  ;;  %v6036_v6 = vld [vmem:[#allocation50_spill] sm:$0xff]  ;;  %v6037_v47 = vld [vmem:[#allocation51_spill] sm:$0xff] }
 0x349   : > { %v1900_v59 = vmul.f32 %v5589_v10, %v1868_v21  ;;  %v2383_v38 = vpack.c.bf16 %v6035_v40, %v6034_v56  ;;  %v2022_v35 = vmul.f32 %v5513_v31, %v1990_v26  ;;  %v2121_v39 = vsub.f32 0.0, %v5484_v9 }
 0x34a   : > { %v1962_v52 = vmul.f32 %v5539_v58, %v1930_v37  ;;  %v2219_v4 = vmul.f32 1.442695, %v2156_v5  ;;  %v1957_v22 = vmul.f32 %v5545_v8, %v1925_v14  ;;  %v1897_v23 = vmul.f32 %v5573_v1, %v1865_v12 }
 0x34b   : > { %v2123_v49 = vsub.f32 0.0, %v5475_v53  ;;  %v1932_v45 = vadd.f32 1.4214138, %v1900_v59  ;;  %2573 = vmatmul.mubr.bf16.gmra.mxu1 %v2383_v38  ;;  %v2244_v30 = vmul.f32 %v3369_v20, %v2084_v34  ;;  %3378 = vpow2.f32 %v2209_v28 }
 0x34c   : > { %v2056_v42 = vadd.f32 0.2548296, %v2024_v2  ;;  %v2215_v15 = vmul.f32 1.442695, %v2154_v17  ;;  %2580 = vmatprep.mubr.bf16.mxu1 %v2386_v43  ;;  %v2083_v29 = vmul.f32 %v5463_v24, %v2051_v55  ;;  %v1991_v27 = vadd.f32 -0.28449672, %v1959_v18 }
 0x34d   : > { %v1931_v25 = vadd.f32 1.4214138, %v1899_v33  ;;  %v1964_v63 = vmul.f32 %v5589_v10, %v1932_v45  ;;  %v2054_v26 = vadd.f32 0.2548296, %v2022_v35  ;;  %v2153_v37 = vmul.f32 %v2121_v39, %v5484_v9  ;;  %v6038_v35 = vld [vmem:[#allocation52_spill] sm:$0xff] }
 0x34e   : > { %v1994_v5 = vadd.f32 -0.28449672, %v1962_v52  ;;  %3380 = vpow2.f32 %v2219_v4  ;;  %v1989_v14 = vadd.f32 -0.28449672, %v1957_v22  ;;  %v1929_v12 = vadd.f32 1.4214138, %v1897_v23 }
 0x34f   : > { %v2155_v21 = vmul.f32 %v2123_v49, %v5475_v53  ;;  %v1996_v20 = vadd.f32 -0.28449672, %v1964_v63  ;;  %v2276_v28 = vsub.f32 1.0, %v2244_v30  ;;  %v2088_v34 = vmul.f32 %v5506_v11, %v2056_v42 }
 0x350   : > { %3382 = vpow2.f32 %v2215_v15  ;;  %v2388_v24 = vpack.c.bf16 %v5448_v48, %v5349_v44  ;;  %v5621_v55 = vpop.eup %3372  ;;  %v2023_v2 = vmul.f32 %v5533_v46, %v1991_v27  ;;  %v1963_v9 = vmul.f32 %v5567_v32, %v1931_v25 }
 0x351   : > { %v2028_v17 = vmul.f32 %v5589_v10, %v1996_v20  ;;  %v2385_v43 = vpack.c.bf16 %v6037_v47, %v6036_v6  ;;  %v3375_v53 = vpop.eup %3374  ;;  %v2335_v18 = vadd.f32 1.0, %v5509_v3  ;;  %v2274_v11 = vsub.f32 1.0, %v5596_v50 }
 0x352   : > { %v2086_v33 = vmul.f32 %v5513_v31, %v2054_v26  ;;  %v2026_v44 = vmul.f32 %v5539_v58, %v1994_v5  ;;  %v3377_v48 = vpop.eup %3376  ;;  %v2243_v59 = vmul.f32 %v5558_v62, %v2083_v29  ;;  %v2021_v56 = vmul.f32 %v5545_v8, %v1989_v14 }
 0x353   : > { %v1961_v40 = vmul.f32 %v5573_v1, %v1929_v12  ;;  %v2217_v38 = vmul.f32 1.442695, %v2155_v21  ;;  %2581 = vmatmul.mubr.bf16.gmra.mxu1 %v2385_v43  ;;  %v2368_v39 = vmul.f32 %v5541_v61, %v6038_v35  ;;  %v2308_v3 = vmul.f32 %v2276_v28, %v5451_v57  ;;  %v6039_v12 = vld [vmem:[#allocation45_spill] sm:$0xff]  ;;  %v6043_v43 = vld [vmem:[#allocation54_spill] sm:$0xff] }
 0x354   : > { %v2248_v52 = vmul.f32 %v3377_v48, %v2088_v34  ;;  %v2060_v50 = vadd.f32 0.2548296, %v2028_v17  ;;  %2588 = vmatprep.mubr.bf16.mxu1 %v2388_v24  ;;  %v2241_v31 = vmul.f32 %v5458_v60, %v5564_v16  ;;  %v2055_v4 = vadd.f32 0.2548296, %v2023_v2  ;;  %v6041_v2 = vld [vmem:[#allocation49_spill] sm:$0xff] }
 0x355   : > { %v2213_v22 = vmul.f32 1.442695, %v2153_v37  ;;  %v1995_v62 = vadd.f32 -0.28449672, %v1963_v9  ;;  %v2306_v23 = vmul.f32 %v2274_v11, %v5361_v13  ;;  %v2246_v49 = vmul.f32 %v3375_v53, %v2086_v33  ;;  %v6042_v17 = vld [vmem:[#allocation65_spill] sm:$0xff] }
 0x356   : > { %vm1608_vm14 = vcmp.ge.f32.partialorder %v5339_v41, 0.0  ;;  %v2058_v45 = vadd.f32 0.2548296, %v2026_v44  ;;  %v2275_v30 = vsub.f32 1.0, %v2243_v59  ;;  %v2053_v42 = vadd.f32 0.2548296, %v2021_v56 }
 0x357   : > { %v1993_v61 = vadd.f32 -0.28449672, %v1961_v40  ;;  %3384 = vpow2.f32 %v2217_v38  ;;  %v2340_v57 = vadd.f32 1.0, %v2308_v3  ;;  %v2280_v15 = vsub.f32 1.0, %v2248_v52  ;;  %v6045_v44 = vld [vmem:[#allocation72_spill] sm:$0xff]  ;;  %v6046_v38 = vld [vmem:[#allocation43_spill] sm:$0xff] }
 0x358   : > { %v2092_v29 = vmul.f32 %v5589_v10, %v2060_v50  ;;  %v2390_v27 = vpack.c.bf16 %v2368_v39, %v5499_v19  ;;  %v3379_v60 = vpop.eup %3378  ;;  %v2087_v16 = vmul.f32 %v5533_v46, %v2055_v4  ;;  %3386 = vpow2.f32 %v2213_v22  ;;  %v6047_v3 = vld [vmem:[#allocation55_spill] sm:$0xff]  ;;  %v6048_v50 = vld [vmem:[#allocation66_spill] sm:$0xff] }
 0x359   : > { %v2027_v13 = vmul.f32 %v5567_v32, %v1995_v62  ;;  %v2387_v25 = vpack.c.bf16 %v5398_v36, %v5346_v51  ;;  %v2338_v63 = vadd.f32 1.0, %v2306_v23  ;;  %vm1606_vm15 = vcmp.ge.f32.partialorder %v5352_v54, 0.0 }
 0x35a   : > { %v2278_v26 = vsub.f32 1.0, %v2246_v49  ;;  %v2090_v37 = vmul.f32 %v5539_v58, %v2058_v45  ;;  %v2273_v14 = vsub.f32 1.0, %v2241_v31  ;;  %v2085_v10 = vmul.f32 %v5545_v8, %v2053_v42  ;;  %v6040_v58 = vld [vmem:[#allocation67_spill] sm:$0xff]  ;;  %v6049_v49 = vld [vmem:[#allocation56_spill] sm:$0xff] }
 0x35b   : > { %v3381_v5 = vpop.eup %3380  ;;  %v1640_v19 = vsel %vm1608_vm14, 1.0, %v5964_v7  ;;  %v2025_v46 = vmul.f32 %v5573_v1, %v1993_v61  ;;  %2589 = vmatmul.mubr.bf16.gmra.mxu1 %v2387_v25  ;;  %v2367_v21 = vmul.f32 %v2335_v18, %v6039_v12  ;;  %v2372_v51 = vmul.f32 %v2340_v57, %v5420_v0  ;;  %v6044_v18 = vld [vmem:[#allocation64_spill] sm:$0xff]  ;;  %v6050_v61 = vld [vmem:[#allocation63_spill] sm:$0xff]  ;;  %v6051_v25 = vld [vmem:[#allocation53_spill] sm:$0xff] }
 0x35c   : > { %v2312_v36 = vmul.f32 %v2280_v15, %v1640_v19  ;;  %v2252_v20 = vmul.f32 %v3381_v5, %v2092_v29  ;;  %2596 = vmatprep.mubr.bf16.mxu1 %v2390_v27  ;;  %v2307_v34 = vmul.f32 %v2275_v30, %v6040_v58  ;;  %v1638_v8 = vsel %vm1606_vm15, 1.0, %v5964_v7  ;;  %v6052_v19 = vld [vmem:[#allocation70_spill] sm:$0xff] }
 0x35d   : > { %v3383_v28 = vpop.eup %3382  ;;  %v2247_v24 = vmul.f32 %v3379_v60, %v2087_v16  ;;  %v2059_v41 = vadd.f32 0.2548296, %v2027_v13  ;;  %v2370_v9 = vmul.f32 %v2338_v63, %v6041_v2  ;;  %vm1605_vm0 = vcmp.ge.f32.partialorder %v6042_v17, 0.0  ;;  %v6057_v17 = vld [vmem:[#allocation61_spill] sm:$0xff] }
 0x35e   : > { %v2310_v6 = vmul.f32 %v2278_v26, %v1638_v8  ;;  %v2250_v47 = vmul.f32 %v3383_v28, %v2090_v37  ;;  %v2305_v0 = vmul.f32 %v2273_v14, %v6043_v43  ;;  %v2245_v53 = vmul.f32 %v5621_v55, %v2085_v10  ;;  %v6054_v28 = vld [vmem:[#allocation60_spill] sm:$0xff] }
 0x35f   : > { %vm1607_vm1 = vcmp.ge.f32.partialorder %v6044_v18, 0.0  ;;  %v2057_v11 = vadd.f32 0.2548296, %v2025_v46  ;;  %v2344_v33 = vadd.f32 1.0, %v2312_v36  ;;  %vm1612_vm2 = vcmp.ge.f32.partialorder %v6045_v44, 0.0 }
 0x360   : > { %v2284_v54 = vsub.f32 1.0, %v2252_v20  ;;  %v2392_v48 = vpack.c.bf16 %v2372_v51, %v2370_v9  ;;  %v2339_v59 = vadd.f32 1.0, %v2307_v34  ;;  %v2279_v56 = vsub.f32 1.0, %v2247_v24  ;;  %v6053_v51 = vld [vmem:[#allocation46_spill] sm:$0xff]  ;;  %v6055_v34 = vld [vmem:[#allocation71_spill] sm:$0xff] }
 0x361   : > { %v2091_v40 = vmul.f32 %v5567_v32, %v2059_v41  ;;  %v2389_v35 = vpack.c.bf16 %v2367_v21, %v6046_v38  ;;  %v2342_v39 = vadd.f32 1.0, %v2310_v6  ;;  %v1544_v52 = vmul.f32 0.5, %v6047_v3  ;;  %v6056_v24 = vld [vmem:[#allocation62_spill] sm:$0xff] }
 0x362   : > { %vm1610_vm3 = vcmp.ge.f32.partialorder %v6048_v50, 0.0  ;;  %v2282_v55 = vsub.f32 1.0, %v2250_v47  ;;  %v2337_v31 = vadd.f32 1.0, %v2305_v0  ;;  %v2277_v4 = vsub.f32 1.0, %v2245_v53 }
 0x363   : > { %v2089_v22 = vmul.f32 %v5573_v1, %v2057_v11  ;;  %v1644_v62 = vsel %vm1612_vm2, 1.0, %v5964_v7  ;;  %2597 = vmatmul.mubr.bf16.gmra.mxu1 %v2389_v35  ;;  %v1542_v45 = vmul.f32 0.5, %v6049_v49  ;;  %v1639_v32 = vsel %vm1607_vm1, 1.0, %v5964_v7 }
 0x364   : > { %v3385_v23 = vpop.eup %3384  ;;  %v2376_v30 = vmul.f32 %v2344_v33, %v1544_v52  ;;  %v2316_v42 = vmul.f32 %v2284_v54, %v1644_v62  ;;  %2604 = vmatprep.mubr.bf16.mxu1 %v2392_v48  ;;  %v2371_v57 = vmul.f32 %v2339_v59, %v6050_v61  ;;  %v2311_v15 = vmul.f32 %v2279_v56, %v1639_v32  ;;  %v6058_v59 = vld [vmem:[#allocation68_spill] sm:$0xff] }
 0x365   : > { %v1642_v29 = vsel %vm1610_vm3, 1.0, %v5964_v7  ;;  %v2251_v27 = vmul.f32 %v3385_v23, %v2091_v40  ;;  %v3387_v1 = vpop.eup %3386  ;;  %v1637_v60 = vsel %vm1605_vm0, 1.0, %v5964_v7  ;;  %v2374_v16 = vmul.f32 %v2342_v39, %v1542_v45  ;;  %v6059_v40 = vld [vmem:[#allocation69_spill] sm:$0xff] }
 0x366   : > { %v2314_v13 = vmul.f32 %v2282_v55, %v1642_v29  ;;  %v2369_v63 = vmul.f32 %v2337_v31, %v6051_v25  ;;  %v2309_v26 = vmul.f32 %v2277_v4, %v1637_v60  ;;  %v2249_v37 = vmul.f32 %v3387_v1, %v2089_v22  ;;  %v5701_v22 = vld [vmem:[%s6061_s19] ss:$0 sm:$0xff] }
 0x367   : > { %v2348_v5 = vadd.f32 1.0, %v2316_v42  ;;  %v2394_v14 = vpack.c.bf16 %v2376_v30, %v2374_v16  ;;  %v2343_v10 = vadd.f32 1.0, %v2311_v15  ;;  %vm1611_vm4 = vcmp.ge.f32.partialorder %v6052_v19, 0.0  ;;  %v6063_v25 = vld [vmem:[#allocation24_spill] sm:$0xff] }
 0x368   : > { %v2283_v46 = vsub.f32 1.0, %v2251_v27  ;;  %v2391_v12 = vpack.c.bf16 %v2371_v57, %v2369_v63  ;;  %v2346_v21 = vadd.f32 1.0, %v2314_v13  ;;  %v1548_v36 = vmul.f32 0.5, %v6053_v51  ;;  %v6062_v57 = vld [vmem:[#allocation22_spill] sm:$0xff] }
 0x369   : > { %v2341_v20 = vadd.f32 1.0, %v2309_v26  ;;  %v1543_v58 = vmul.f32 0.5, %v6054_v28  ;;  %vm1609_vm5 = vcmp.ge.f32.partialorder %v6055_v34, 0.0  ;;  %v2281_v8 = vsub.f32 1.0, %v2249_v37 }
 0x36a   : > { %v1546_v41 = vmul.f32 0.5, %v6056_v24  ;;  %v1643_v2 = vsel %vm1611_vm4, 1.0, %v5964_v7  ;;  %v2380_v9 = vmul.f32 %v2348_v5, %v1548_v36  ;;  %v1541_v6 = vmul.f32 0.5, %v6057_v17 }
 0x36b   : > { %2605 = vmatmul.mubr.bf16.gmra.mxu1 %v2391_v12  ;;  %v2375_v47 = vmul.f32 %v2343_v10, %v1543_v58  ;;  %v2315_v43 = vmul.f32 %v2283_v46, %v1643_v2  ;;  %v1641_v0 = vsel %vm1609_vm5, 1.0, %v5964_v7  ;;  %v1547_v56 = vmul.f32 0.5, %v6058_v59  ;;  %v5696_v7 = vld [vmem:[%s6060_s5] ss:$0 sm:$0xff]  ;;  %v6064_v46 = vld [vmem:[#allocation23_spill] sm:$0xff] }
 0x36c   : > { %2612 = vmatprep.mubr.bf16.mxu1 %v2394_v14  ;;  %v2378_v53 = vmul.f32 %v2346_v21, %v1546_v41  ;;  %v2373_v18 = vmul.f32 %v2341_v20, %v1541_v6  ;;  %v2313_v11 = vmul.f32 %v2281_v8, %v1641_v0  ;;  %v1545_v38 = vmul.f32 0.5, %v6059_v40  ;;  %v6065_v8 = vld [vmem:[#allocation25_spill] sm:$0xff]  ;;  %v6066_v0 = vld [vmem:[#allocation26_spill] sm:$0xff]  ;;  %v6067_v59 = vld [vmem:[#allocation27_spill] sm:$0xff] }
 0x36d   : > { %v2347_v44 = vadd.f32 1.0, %v2315_v43 }
 0x36e   : > { %v2396_v33 = vpack.c.bf16 %v2380_v9, %v2378_v53  ;;  %v2393_v54 = vpack.c.bf16 %v2375_v47, %v2373_v18  ;;  %v2345_v48 = vadd.f32 1.0, %v2313_v11 }
 0x36f   : > { %v2379_v35 = vmul.f32 %v2347_v44, %v1547_v56 }
 0x370   : > { %v2377_v39 = vmul.f32 %v2345_v48, %v1545_v38 }
 0x372   : > { %v2395_v3 = vpack.c.bf16 %v2379_v35, %v2377_v39 }
 0x373   : > { %2613 = vmatmul.mubr.bf16.gmra.mxu1 %v2393_v54 }
 0x374   : > { %2620 = vmatprep.mubr.bf16.mxu1 %v2396_v33 }
 0x37b   : > { %2621 = vmatmul.mubr.bf16.gmra.mxu1 %v2395_v3 }
 0x37e   : > { %v2692_v52 = vpop.permute.xlu1 %2691 }
 0x381   : > { %v2687_v42 = vpop.permute.xlu0 %2686 }
 0x382   : > { %v2697_v23 = vpop.permute.xlu1 %2696 }
 0x386   : > { %v2702_v16 = vpop.permute.xlu1 %2701 }
 0x38a   : > { %v2707_v51 = vpop.permute.xlu1 %2706 }
 0x38e   : > { %v2712_v47 = vpop.permute.xlu1 %2711 }
 0x392   : > { %v2717_v38 = vpop.permute.xlu1 %2716 }
 0x403   : > { %v3033_v50 = vpop.f32.mrf.mxu1 }
 0x405   : > { %v3034_v55 = vpop.f32.mrf.mxu1 }
 0x406   : > { %v3035_v31 = vadd.f32 %v3034_v55, %v3033_v50  ;;  %v6068_v55 = vld [vmem:[#allocation28_spill] sm:$0xff] }
 0x407   : > { %v3036_v4 = vpop.f32.mrf.mxu1 }
 0x408   : > { %v2567_v62 = vadd.f32 %v3035_v31, %v5696_v7 }
 0x409   : > { %v3037_v49 = vpop.f32.mrf.mxu1 }
 0x40a   : > { %v3038_v45 = vadd.f32 %v3037_v49, %v3036_v4  ;;  %v2636_v32 = vmul.f32 %v5701_v22, %v2567_v62 }
 0x40b   : > { %v3039_v30 = vpop.f32.mrf.mxu1 }
 0x40c   : > { %v2570_v61 = vadd.f32 %v3038_v45, %v5696_v7  ;;  %v2652_v15 = vadd.f32 %v2636_v32, %v6062_v57  ;;  %v2722_v32 = vpop.permute.xlu1 %2721 }
 0x40d   : > { %v3040_v29 = vpop.f32.mrf.mxu1 }
 0x40e   : > { %v2637_v27 = vmul.f32 %v5701_v22, %v2570_v61  ;;  %v3041_v1 = vadd.f32 %v3040_v29, %v3039_v30  ;;  %v2764_v60 = vmul.f32 %v2687_v42, %v2652_v15  ;;  %v6069_v42 = vld [vmem:[#allocation29_spill] sm:$0xff] }
 0x40f   : > { %v3042_v13 = vpop.f32.mrf.mxu1 }
 0x410   : > { %v2653_v63 = vadd.f32 %v2637_v27, %v6063_v25  ;;  %v2575_v26 = vadd.f32 %v3041_v1, %v5696_v7  ;;  %2780 = vst [vmem:[%s5712_s8] sm:$0xff] %v2764_v60 }
 0x411   : > { %v3043_v37 = vpop.f32.mrf.mxu1 }
 0x412   : > { %v2765_v5 = vmul.f32 %v2692_v52, %v2653_v63  ;;  %v2638_v14 = vmul.f32 %v5701_v22, %v2575_v26  ;;  %v3044_v10 = vadd.f32 %v3043_v37, %v3042_v13  ;;  %v2727_v63 = vpop.permute.xlu1 %2726 }
 0x413   : > { %v3045_v19 = vpop.f32.mrf.mxu1 }
 0x414   : > { %2781 = vst [vmem:[%s5712_s8 + $0x8] sm:$0xff] %v2765_v5  ;;  %v2654_v12 = vadd.f32 %v2638_v14, %v6064_v46  ;;  %v2578_v21 = vadd.f32 %v3044_v10, %v5696_v7  ;;  %v6071_v46 = vld [vmem:[#allocation31_spill] sm:$0xff] }
 0x415   : > { %v3046_v36 = vpop.f32.mrf.mxu1 }
 0x416   : > { %v2766_v20 = vmul.f32 %v2697_v23, %v2654_v12  ;;  %v2639_v28 = vmul.f32 %v5701_v22, %v2578_v21  ;;  %v3047_v58 = vadd.f32 %v3046_v36, %v3045_v19  ;;  %v2732_v21 = vpop.permute.xlu0 %2731 }
 0x417   : > { %v3048_v34 = vpop.f32.mrf.mxu1 }
 0x418   : > { %2782 = vst [vmem:[%s5712_s8 + $0x10] sm:$0xff] %v2766_v20  ;;  %v2655_v24 = vadd.f32 %v2639_v28, %v6065_v8  ;;  %v2583_v41 = vadd.f32 %v3047_v58, %v5696_v7 }
 0x419   : > { %v3049_v2 = vpop.f32.mrf.mxu1 }
 0x41a   : > { %v2767_v9 = vmul.f32 %v2702_v16, %v2655_v24  ;;  %v2640_v17 = vmul.f32 %v5701_v22, %v2583_v41  ;;  %v3050_v6 = vadd.f32 %v3049_v2, %v3048_v34  ;;  %v6070_v16 = vld [vmem:[#allocation30_spill] sm:$0xff]  ;;  %v6072_v34 = vld [vmem:[#allocation32_spill] sm:$0xff]  ;;  %v2737_v41 = vpop.permute.xlu1 %2736 }
 0x41b   : > { %v3051_v43 = vpop.f32.mrf.mxu1 }
 0x41c   : > { %2783 = vst [vmem:[%s5712_s8 + $0x18] sm:$0xff] %v2767_v9  ;;  %v2656_v53 = vadd.f32 %v2640_v17, %v6066_v0  ;;  %v2586_v18 = vadd.f32 %v3050_v6, %v5696_v7 }
 0x41d   : > { %v3052_v11 = vpop.f32.mrf.mxu1 }
 0x41e   : > { %v2768_v33 = vmul.f32 %v2707_v51, %v2656_v53  ;;  %v2641_v44 = vmul.f32 %v5701_v22, %v2586_v18  ;;  %v3053_v54 = vadd.f32 %v3052_v11, %v3051_v43  ;;  %v6073_v43 = vld [vmem:[#allocation33_spill] sm:$0xff]  ;;  %v2742_v18 = vpop.permute.xlu0 %2741 }
 0x41f   : > { %v3054_v48 = vpop.f32.mrf.mxu1 }
 0x420   : > { %2784 = vst [vmem:[%s5712_s8 + $0x20] sm:$0xff] %v2768_v33  ;;  %v2657_v56 = vadd.f32 %v2641_v44, %v6067_v59  ;;  %v2591_v40 = vadd.f32 %v3053_v54, %v5696_v7  ;;  %v6074_v59 = vld [vmem:[#allocation34_spill] sm:$0xff] }
 0x421   : > { %v3055_v35 = vpop.f32.mrf.mxu1 }
 0x422   : > { %v2769_v39 = vmul.f32 %v2712_v47, %v2657_v56  ;;  %v2642_v3 = vmul.f32 %v5701_v22, %v2591_v40  ;;  %v3056_v52 = vadd.f32 %v3055_v35, %v3054_v48 }
 0x423   : > { %v3057_v50 = vpop.f32.mrf.mxu1 }
 0x424   : > { %2785 = vst [vmem:[%s5712_s8 + $0x28] sm:$0xff] %v2769_v39  ;;  %v2658_v31 = vadd.f32 %v2642_v3, %v6068_v55  ;;  %v2594_v4 = vadd.f32 %v3056_v52, %v5696_v7  ;;  %v6075_v55 = vld [vmem:[#allocation35_spill] sm:$0xff] }
 0x425   : > { %v3058_v62 = vpop.f32.mrf.mxu1 }
 0x426   : > { %v2770_v23 = vmul.f32 %v2717_v38, %v2658_v31  ;;  %v2643_v49 = vmul.f32 %v5701_v22, %v2594_v4  ;;  %v3059_v45 = vadd.f32 %v3058_v62, %v3057_v50  ;;  %v2747_v38 = vpop.permute.xlu1 %2746  ;;  %v2752_v62 = vpop.permute.xlu0 %2751 }
 0x427   : > { %v3060_v30 = vpop.f32.mrf.mxu1 }
 0x428   : > { %2786 = vst [vmem:[%s5712_s8 + $0x30] sm:$0xff] %v2770_v23  ;;  %v2659_v61 = vadd.f32 %v2643_v49, %v6069_v42  ;;  %v2599_v57 = vadd.f32 %v3059_v45, %v5696_v7 }
 0x429   : > { %v3061_v15 = vpop.f32.mrf.mxu1 }
 0x42a   : > { %v2771_v29 = vmul.f32 %v2722_v32, %v2659_v61  ;;  %v2644_v27 = vmul.f32 %v5701_v22, %v2599_v57  ;;  %v3062_v1 = vadd.f32 %v3061_v15, %v3060_v30  ;;  %v6076_v30 = vld [vmem:[#allocation36_spill] sm:$0xff]  ;;  %v2757_v57 = vpop.permute.xlu1 %2756 }
 0x42b   : > { %v3063_v60 = vpop.f32.mrf.mxu1 }
 0x42c   : > { %2787 = vst [vmem:[%s5712_s8 + $0x38] sm:$0xff] %v2771_v29  ;;  %v2660_v13 = vadd.f32 %v2644_v27, %v6070_v16  ;;  %v2602_v25 = vadd.f32 %v3062_v1, %v5696_v7  ;;  %v6079_v27 = vld [vmem:[#allocation37_spill] sm:$0xff] }
 0x42d   : > { %v3064_v26 = vpop.f32.mrf.mxu1 }
 0x42e   : > { %v2772_v37 = vmul.f32 %v2727_v63, %v2660_v13  ;;  %v3065_v5 = vadd.f32 %v3064_v26, %v3063_v60  ;;  %v2645_v14 = vmul.f32 %v5701_v22, %v2602_v25  ;;  %v2762_v60 = vpop.permute.xlu0 %2761 }
 0x42f   : > { %v3066_v10 = vpop.f32.mrf.mxu1 }
 0x430   : > { %2788 = vst [vmem:[%s5712_s8 + $0x40] sm:$0xff] %v2772_v37  ;;  %v2607_v19 = vadd.f32 %v3065_v5, %v5696_v7  ;;  %v2661_v12 = vadd.f32 %v2645_v14, %v6071_v46 }
 0x431   : > { %v3067_v51 = vpop.f32.mrf.mxu1 }
 0x432   : > { %v2646_v36 = vmul.f32 %v5701_v22, %v2607_v19  ;;  %v2773_v20 = vmul.f32 %v2732_v21, %v2661_v12  ;;  %v3068_v28 = vadd.f32 %v3067_v51, %v3066_v10 }
 0x433   : > { %v3069_v58 = vpop.f32.mrf.mxu1 }
 0x434   : > { %v2662_v8 = vadd.f32 %v2646_v36, %v6072_v34  ;;  %2789 = vst [vmem:[%s5712_s8 + $0x48] sm:$0xff] %v2773_v20  ;;  %v2610_v24 = vadd.f32 %v3068_v28, %v5696_v7 }
 0x435   : > { %v3070_v2 = vpop.f32.mrf.mxu1 }
 0x436   : > { %v2774_v9 = vmul.f32 %v2737_v41, %v2662_v8  ;;  %v2647_v17 = vmul.f32 %v5701_v22, %v2610_v24  ;;  %v3071_v6 = vadd.f32 %v3070_v2, %v3069_v58 }
 0x437   : > { %v3072_v47 = vpop.f32.mrf.mxu1 }
 0x438   : > { %2790 = vst [vmem:[%s5712_s8 + $0x50] sm:$0xff] %v2774_v9  ;;  %v2663_v0 = vadd.f32 %v2647_v17, %v6073_v43  ;;  %v2615_v53 = vadd.f32 %v3071_v6, %v5696_v7 }
 0x439   : > { %v3073_v11 = vpop.f32.mrf.mxu1 }
 0x43a   : > { %v2775_v33 = vmul.f32 %v2742_v18, %v2663_v0  ;;  %v2648_v44 = vmul.f32 %v5701_v22, %v2615_v53  ;;  %v3074_v54 = vadd.f32 %v3073_v11, %v3072_v47 }
 0x43b   : > { %v3075_v48 = vpop.f32.mrf.mxu1 }
 0x43c   : > { %2791 = vst [vmem:[%s5712_s8 + $0x58] sm:$0xff] %v2775_v33  ;;  %v2664_v56 = vadd.f32 %v2648_v44, %v6074_v59  ;;  %v2618_v40 = vadd.f32 %v3074_v54, %v5696_v7 }
 0x43d   : > { %v3076_v35 = vpop.f32.mrf.mxu1 }
 0x43e   : > { %v2776_v39 = vmul.f32 %v2747_v38, %v2664_v56  ;;  %v2649_v3 = vmul.f32 %v5701_v22, %v2618_v40  ;;  %v3077_v52 = vadd.f32 %v3076_v35, %v3075_v48 }
 0x43f   : > { %v3078_v50 = vpop.f32.mrf.mxu1 }
 0x440   : > { %2792 = vst [vmem:[%s5712_s8 + $0x60] sm:$0xff] %v2776_v39  ;;  %v2665_v31 = vadd.f32 %v2649_v3, %v6075_v55  ;;  %v2623_v4 = vadd.f32 %v3077_v52, %v5696_v7 }
 0x441   : > { %v3079_v23 = vpop.f32.mrf.mxu1 }
 0x442   : > { %v2777_v49 = vmul.f32 %v2752_v62, %v2665_v31  ;;  %v2650_v45 = vmul.f32 %v5701_v22, %v2623_v4  ;;  %v3080_v32 = vadd.f32 %v3079_v23, %v3078_v50 }
 0x444   : > { %2793 = vst [vmem:[%s5712_s8 + $0x68] sm:$0xff] %v2777_v49  ;;  %v2666_v42 = vadd.f32 %v2650_v45, %v6076_v30  ;;  %v2626_v61 = vadd.f32 %v3080_v32, %v5696_v7 }
 0x446   : > { %v2778_v15 = vmul.f32 %v2757_v57, %v2666_v42  ;;  %v2651_v29 = vmul.f32 %v5701_v22, %v2626_v61 }
 0x448   : > { %2794 = vst [vmem:[%s5712_s8 + $0x70] sm:$0xff] %v2778_v15  ;;  %v2667_v1 = vadd.f32 %v2651_v29, %v6079_v27 }
 0x44a   : > { %v2779_v7 = vmul.f32 %v2762_v60, %v2667_v1 }
 0x44c   : > { %2795 = vst [vmem:[%s5712_s8 + $0x78] sm:$0xff] %v2779_v7 }
 0x44d   : > { %3454 = shalt.err (!%p3451_p6)
}
 0x44e   : > { %s3455_s5 = scalar_lea.hbm %s5774_s15, 2048  ;;  %s3459_s19 = scalar_lea.hbm %s6078_s14, 8192 }
 0x44f   : > { %p3456_p10 = scmp.ne.s32.totalorder %s5774_s15, %s3455_s5  ;;  %p3460_p8 = scmp.lt.s32.totalorder %s5774_s15, %s6078_s14 }
 0x450   : > { %p3461_p7 = scmp.lt.s32.totalorder %s3459_s19, %s3455_s5 }
 0x451   : > { %p3457_p11 = pnand %p3456_p10, %p3774_p4 }
 0x452   : > { %p3462_p13 = por %p3461_p7, %p3460_p8 }
 0x453   : > { %p3458_p12 = pneg %p3457_p11 }
 0x455   : > { %p3463_p0 = pnand %p3462_p13, %p3458_p12 }
 0x457   : > { %3466 = shalt.err (!%p3463_p0)
}
 0x458   : > { %s3576_s28 = smov 128   ;;  %s3577_s20 = smov 8  }
 0x459   : > { %3085 = dma.vmem_to_hbm [thread:$0]  (%p3774_p4), %s5778_s29, 2048, %s5774_s15, %s2797_s24, %s3576_s28, %s3576_s28, %s3577_s20  }
 0x45a PF: > { %s6080_s6 = sld [smem:[#allocation12_spill]]  ;;  %p3091_p9 = scmp.ge.s32.totalorder %s3567_s13, 2 }
 0x45b   : > { %s6081_s21 = sld [smem:[#allocation21_spill]] }
 0x460   : > { %s2827_s27 = sand.u32 1, %s6080_s6  }
 0x461   : > { %p6082_p2 = scmp.ne.s32.totalorder %s6081_s21, 0  ;;  %s2828_s17 = scalar_lea.sflag [#allocation5], %s2827_s27 }
 0x463   : > { %p3088_p1 = pnand %p3091_p9, %p6082_p2 }
 0x465   : > { %p3089_p3 = pneg %p3088_p1 }
 0x467   : > { %3520 = dma.done.wait (%p3089_p3), %s2828_s17, 2048  }
 0x468   : > { %3522 = vsyncadd (%p3089_p3), %s2828_s17, 4294965248  ;;  %s31_s13 = sadd.s32 1, %s3567_s13   ;;  %s6083_s10 = sld [smem:[#allocation20_spill]] }
 0x469   : > { %p28_p5 = scmp.ge.s32.totalorder %s31_s13, 6   ;;  %s6084_s12 = sld [smem:[#allocation13_spill]] }
 0x46a   : > { %s6085_s26 = sld [smem:[#allocation19_spill]]  ;;  %s6089_s21 = smov %s3531_s22 }
 0x46b   : > { %s6086_s27 = sld [smem:[#allocation16_spill]]  ;;  %s6090_s22 = smov %s3535_s23 }
 0x46c   : > { %s6087_s29 = sld [smem:[#allocation17_spill]]  ;;  %s6092_s24 = smov %s3543_s25 }
 0x46d   : > { %s6088_s15 = sld [smem:[#allocation18_spill]]  ;;  %s6094_s28 = smov %s3563_s30 }
 0x46e   : > { %s6091_s23 = smov %s6083_s10 }
 0x46f   : > { %s6093_s25 = smov %s6084_s12  ;;  %30 = sbr.rel (!%p28_p5) target bundleno = 21 (0x15), region = 129 }
 0x473   : > { %s6095_s30 = smov %s6088_s15 }
 0x474   :  { %2833 = vsyncpa [#allocation4], 1 }
 0x475   :  { %2835 = vsyncpa [#allocation4 + $0x1], 1 }
 0x476   :  { %2836 = vsyncpa [#allocation7], 1 }
 0x477   :  { %2838 = vsyncpa [#allocation7 + $0x1], 1 }
 0x478   :  { %2839 = vsyncpa [#allocation5], 1 }
 0x479   :  { %2841 = vsyncpa [#allocation5 + $0x1], 1 }

</bundles_post_ra>
